<compile_context>
chip_gen: v7x
topology: tpu7x:2x2x1
jax: 0.10.0
libtpu: 0.0.40
codegen_flags: <defaults>
</compile_context>

<pallas_src>
import functools

import jax
import jax.numpy as jnp
from jax.experimental import pallas as pl
from jax.experimental.pallas import tpu as pltpu


def _identity_block2_kernel(x_ref, w1_ref, b1_ref, w2_ref, b2_ref, mask_ref,
                            o_ref, col1_ref, col2_ref, *, H, W, compute_dtype):
    """Processes `imgs = x_ref.shape[0]` images per grid step.

    x_ref   : (imgs, C, H*W)   f32 input slabs (residual kept in f32)
    w1_ref  : (F1, 9*C)        conv1 weights, BN1 scale folded, compute dtype
    b1_ref  : (F1, 1)          folded conv1 bias + BN1 shift, f32
    w2_ref  : (F2, 9*F1)       conv2 weights, BN2 scale folded, compute dtype
    b2_ref  : (F2, 1)          folded conv2 bias + BN2 shift, f32
    mask_ref: (9, H*W)         per-tap border-validity mask, compute dtype
    o_ref   : (imgs, F2, H*W)  f32 output slabs
    col1_ref: (9*C,  imgs*H*W) im2col scratch for conv1 (VMEM), compute dtype
    col2_ref: (9*F1, imgs*H*W) im2col scratch for conv2 (VMEM), compute dtype
    """
    HW = H * W
    imgs, C, _ = x_ref.shape
    F1 = w1_ref.shape[0]

    masks = mask_ref[...]                                   # (9, HW), hoisted

    def fill_cols(get_img, col_ref, cin):
        # In-register tap extraction: each of the 9 taps of a 3x3 / stride-1 /
        # pad-1 conv is a lane rotation (XLU slot, overlaps VPU/MXU work) of
        # the per-image slab plus a validity-mask multiply, written straight
        # into the sublane/lane-aligned im2col scratch.  No staging buffer,
        # no unaligned lane slices.
        for i in range(imgs):
            img = get_img(i)                       # (cin, HW), compute dtype
            base = i * HW
            for dh in range(3):
                for dw in range(3):
                    j = dh * 3 + dw
                    off = (dh - 1) * W + (dw - 1)
                    if off == 0:                   # center tap: identity
                        tap = img
                    else:
                        tap = pltpu.roll(img, (-off) % HW, 1)
                        tap = tap * masks[j:j + 1, :]
                    col_ref[j * cin:(j + 1) * cin, base:base + HW] = tap

    # ---- conv1 (+ folded BN1 scale): one wide MXU matmul, shift, ReLU ------
    fill_cols(lambda i: x_ref[i].astype(compute_dtype), col1_ref, C)
    y = jnp.dot(w1_ref[...], col1_ref[...],
                preferred_element_type=jnp.float32)          # (F1, imgs*HW)
    y = jnp.maximum(y + b1_ref[...], 0.0)

    # ---- conv2 (+ folded BN2 scale): one wide MXU matmul, shift ------------
    fill_cols(lambda i: y[:, i * HW:(i + 1) * HW].astype(compute_dtype),
              col2_ref, F1)
    z = jnp.dot(w2_ref[...], col2_ref[...],
                preferred_element_type=jnp.float32)          # (F2, imgs*HW)
    z = z + b2_ref[...]

    # ---- residual add (exact f32 skip connection) + ReLU -------------------
    for i in range(imgs):
        o_ref[i] = jnp.maximum(z[:, i * HW:(i + 1) * HW] + x_ref[i],
                               0.0).astype(o_ref.dtype)


def _pick_images_per_step(N, C, F1, F2, HW, cdt_bytes,
                          budget=20 * 1024 * 1024):
    """Largest divisor of N whose per-step VMEM footprint fits the budget."""
    best = 1
    for cand in range(1, N + 1):
        if N % cand:
            continue
        need = (2 * cand * C * HW * 4            # input blocks, double-buffered
                + 2 * cand * F2 * HW * 4         # output blocks, double-buffered
                + cand * HW * 9 * (C + F1) * cdt_bytes      # im2col scratches
                + (F1 * 9 * C + F2 * 9 * F1 + 9 * HW) * cdt_bytes
                + (F1 + F2) * 4)
        if need <= budget:
            best = cand
    return best


def identity_block2_pallas(x_nchw, w1, cb1, g1, be1, m1, v1,
                           w2, cb2, g2, be2, m2, v2, eps=1e-5,
                           compute_dtype=jnp.float32, images_per_step=None):
    """x_nchw: (N, C, H, W) float32. Weights/stats in PyTorch layouts.

    compute_dtype=jnp.bfloat16 runs the matmuls with bf16 operands and f32
    accumulation -- the fast MXU path on v5e/v6e/v7x.  The residual path and
    all elementwise math stay in f32 regardless of compute_dtype.
    """
    N, C, H, W = x_nchw.shape
    F1, F2 = w1.shape[0], w2.shape[0]
    assert F2 == C, "identity shortcut requires C_out == C_in"
    HW = H * W
    cdt_bytes = jnp.dtype(compute_dtype).itemsize

    if images_per_step is None:
        images_per_step = _pick_images_per_step(N, C, F1, F2, HW, cdt_bytes)
    assert N % images_per_step == 0
    imgs = images_per_step

    # Fold conv bias + inference-mode BN: scale goes into the weights, only a
    # per-channel shift remains.
    s1 = g1 / jnp.sqrt(v1 + eps)
    b1 = ((cb1 - m1) * s1 + be1).reshape(F1, 1).astype(jnp.float32)
    s2 = g2 / jnp.sqrt(v2 + eps)
    b2 = ((cb2 - m2) * s2 + be2).reshape(F2, 1).astype(jnp.float32)

    # (Cout, Cin, kh, kw) -> (Cout, kh, kw, Cin) -> (Cout, 9*Cin), tap order
    # (dh, dw, cin) matching the kernel's im2col rows; BN scale folded in.
    w1t = (jnp.transpose(w1, (0, 2, 3, 1)).reshape(F1, 9 * C)
           * s1.reshape(F1, 1)).astype(compute_dtype)
    w2t = (jnp.transpose(w2, (0, 2, 3, 1)).reshape(F2, 9 * F1)
           * s2.reshape(F2, 1)).astype(compute_dtype)

    # Input stays NCHW; just flatten the spatial dims (free, contiguous).
    # Kept f32 so the residual add is exact even on the bf16 path.
    x3 = x_nchw.reshape(N, C, HW).astype(jnp.float32)

    # Border-validity masks for the 9 taps, flattened over (h, w).  Zero where
    # the tap would read outside the image (also guards the circular wrap of
    # pltpu.roll at the top/bottom rows).
    hh, ww = jnp.meshgrid(jnp.arange(H), jnp.arange(W), indexing="ij")
    mask_rows = []
    for dh in range(3):
        for dw in range(3):
            oh, ow = dh - 1, dw - 1
            valid = ((hh + oh >= 0) & (hh + oh < H) &
                     (ww + ow >= 0) & (ww + ow < W))
            mask_rows.append(valid.reshape(HW))
    masks = jnp.stack(mask_rows).astype(compute_dtype)              # (9, HW)

    kernel = functools.partial(_identity_block2_kernel, H=H, W=W,
                               compute_dtype=compute_dtype)

    flops = 2 * N * HW * 9 * (C * F1 + F1 * F2)
    bytes_accessed = (N * C * HW * 4 + N * F2 * HW * 4
                      + (w1t.size + w2t.size + masks.size) * cdt_bytes
                      + (b1.size + b2.size) * 4)

    out3 = pl.pallas_call(
        kernel,
        out_shape=jax.ShapeDtypeStruct((N, F2, HW), jnp.float32),
        grid_spec=pltpu.PrefetchScalarGridSpec(
            num_scalar_prefetch=0,
            grid=(N // imgs,),
            in_specs=[
                pl.BlockSpec((imgs, C, HW), lambda n: (n, 0, 0)),
                # Constant index_maps -> weights/biases/masks fetched once and
                # stay resident across the grid.
                pl.BlockSpec((F1, 9 * C), lambda n: (0, 0)),
                pl.BlockSpec((F1, 1), lambda n: (0, 0)),
                pl.BlockSpec((F2, 9 * F1), lambda n: (0, 0)),
                pl.BlockSpec((F2, 1), lambda n: (0, 0)),
                pl.BlockSpec((9, HW), lambda n: (0, 0)),
            ],
            out_specs=pl.BlockSpec((imgs, F2, HW), lambda n: (n, 0, 0)),
            scratch_shapes=[
                pltpu.VMEM((9 * C, imgs * HW), compute_dtype),    # col1
                pltpu.VMEM((9 * F1, imgs * HW), compute_dtype),   # col2
            ]),
        compiler_params=pltpu.CompilerParams(
            dimension_semantics=("parallel",)),
        cost_estimate=pl.CostEstimate(flops=int(flops), transcendentals=0,
                                      bytes_accessed=int(bytes_accessed)),
    )(x3, w1t, b1, w2t, b2, masks)

    # (N, F2, H*W) -> (N, F2, H, W): already NCHW, free reshape.
    return out3.reshape(N, F2, H, W)


def _reference(x_nchw, w1, cb1, g1, be1, m1, v1,
               w2, cb2, g2, be2, m2, v2, eps=1e-5):
    """Pure-JAX (lax.conv) reference of the same forward pass."""
    def conv(x, w, b):
        y = jax.lax.conv_general_dilated(
            x, w, window_strides=(1, 1), padding=((1, 1), (1, 1)),
            dimension_numbers=("NCHW", "OIHW", "NCHW"))
        return y + b[None, :, None, None]

    def bn(x, g, be, m, v):
        return (x - m[None, :, None, None]) / jnp.sqrt(v + eps)[None, :, None, None] \
               * g[None, :, None, None] + be[None, :, None, None]

    y = jax.nn.relu(bn(conv(x_nchw, w1, cb1), g1, be1, m1, v1))
    y = bn(conv(y, w2, cb2), g2, be2, m2, v2)
    return jax.nn.relu(y + x_nchw)


if __name__ == "__main__":
    # Small shapes consistent with identity_block2(input=C, filter=[C, C], ...)
    N, C, H, W = 2, 32, 16, 16
    F1, F2 = C, C

    key = jax.random.PRNGKey(0)
    keys = jax.random.split(key, 12)

    x = jax.random.normal(keys[0], (N, C, H, W), jnp.float32)

    w1 = jax.random.normal(keys[1], (F1, C, 3, 3), jnp.float32) * 0.1
    cb1 = jax.random.normal(keys[2], (F1,), jnp.float32) * 0.1
    g1 = 1.0 + 0.1 * jax.random.normal(keys[3], (F1,), jnp.float32)
    be1 = 0.1 * jax.random.normal(keys[4], (F1,), jnp.float32)
    m1 = 0.1 * jax.random.normal(keys[5], (F1,), jnp.float32)
    v1 = jnp.abs(1.0 + 0.1 * jax.random.normal(keys[6], (F1,), jnp.float32))

    w2 = jax.random.normal(keys[7], (F2, F1, 3, 3), jnp.float32) * 0.1
    cb2 = jax.random.normal(keys[8], (F2,), jnp.float32) * 0.1
    g2 = 1.0 + 0.1 * jax.random.normal(keys[9], (F2,), jnp.float32)
    be2 = 0.1 * jax.random.normal(keys[10], (F2,), jnp.float32)
    m2 = 0.1 * jax.random.normal(keys[11], (F2,), jnp.float32)
    v2 = jnp.abs(1.0 + 0.05 * jax.random.normal(keys[0], (F2,), jnp.float32))

    ref = _reference(x, w1, cb1, g1, be1, m1, v1,
                     w2, cb2, g2, be2, m2, v2)

    # float32 path (strict check).
    out = identity_block2_pallas(x, w1, cb1, g1, be1, m1, v1,
                                 w2, cb2, g2, be2, m2, v2)
    out = jax.block_until_ready(out)
    assert out.shape == (N, F2, H, W)
    assert jnp.allclose(out, ref, atol=1e-4, rtol=1e-4), \
        f"max abs err {jnp.max(jnp.abs(out - ref))}"

    # bf16 matmul-operand path (fast MXU path on v5e/v6e/v7x); residual and
    # elementwise math stay f32, so only matmul quantization error remains.
    out_bf16 = identity_block2_pallas(x, w1, cb1, g1, be1, m1, v1,
                                      w2, cb2, g2, be2, m2, v2,
                                      compute_dtype=jnp.bfloat16)
    out_bf16 = jax.block_until_ready(out_bf16)
    assert out_bf16.shape == (N, F2, H, W)
    assert jnp.allclose(out_bf16, ref, atol=0.25, rtol=0.05), \
        f"bf16 max abs err {jnp.max(jnp.abs(out_bf16 - ref))}"

    print("KERNEL_OK")
</pallas_src>

<mosaic_0001>
module attributes {stable_mosaic.version = 11 : i64} {
  func.func @_identity_block2_kernel(%arg0: i32, %arg1: memref<2x32x256xf32, #tpu.memory_space<vmem>>, %arg2: memref<32x288xf32, #tpu.memory_space<vmem>>, %arg3: memref<32x1xf32, #tpu.memory_space<vmem>>, %arg4: memref<32x288xf32, #tpu.memory_space<vmem>>, %arg5: memref<32x1xf32, #tpu.memory_space<vmem>>, %arg6: memref<9x256xf32, #tpu.memory_space<vmem>>, %arg7: memref<2x32x256xf32, #tpu.memory_space<vmem>>, %arg8: memref<288x512xf32, #tpu.memory_space<vmem>>, %arg9: memref<288x512xf32, #tpu.memory_space<vmem>>) attributes {dimension_semantics = [#tpu.dimension_semantics<parallel>], iteration_bounds = array<i64: 1>, scalar_prefetch = 0 : i64, scratch_operands = 2 : i64, tpu.core_type = #tpu.core_type<tc>, window_params = [{transform_indices = @transform_0, window_bounds = array<i64: 2, 32, 256>}, {pipeline_mode = #tpu.pipeline_mode<synchronous>, transform_indices = @transform_1, window_bounds = array<i64: 32, 288>}, {pipeline_mode = #tpu.pipeline_mode<synchronous>, transform_indices = @transform_2, window_bounds = array<i64: 32, 1>}, {pipeline_mode = #tpu.pipeline_mode<synchronous>, transform_indices = @transform_3, window_bounds = array<i64: 32, 288>}, {pipeline_mode = #tpu.pipeline_mode<synchronous>, transform_indices = @transform_4, window_bounds = array<i64: 32, 1>}, {pipeline_mode = #tpu.pipeline_mode<synchronous>, transform_indices = @transform_5, window_bounds = array<i64: 9, 256>}, {transform_indices = @transform_6, window_bounds = array<i64: 2, 32, 256>}]} {
    %c0 = arith.constant 0 : index
    %c0_0 = arith.constant 0 : index
    %0 = vector.load %arg6[%c0, %c0_0] : memref<9x256xf32, #tpu.memory_space<vmem>>, vector<9x256xf32>
    %c0_1 = arith.constant 0 : index
    %c0_2 = arith.constant 0 : index
    %c0_3 = arith.constant 0 : index
    %1 = vector.load %arg1[%c0_1, %c0_2, %c0_3] : memref<2x32x256xf32, #tpu.memory_space<vmem>>, vector<1x32x256xf32>
    %2 = vector.shape_cast %1 : vector<1x32x256xf32> to vector<32x256xf32>
    %c17_i32 = arith.constant 17 : i32
    %3 = tpu.dynamic_rotate %2 by %c17_i32 dim 1 : vector<32x256xf32>, i32 -> vector<32x256xf32>
    %4 = vector.extract_strided_slice %0 {offsets = [0, 0], sizes = [1, 256], strides = [1, 1]} : vector<9x256xf32> to vector<1x256xf32>
    %5 = vector.broadcast %4 : vector<1x256xf32> to vector<32x256xf32>
    %6 = arith.mulf %3, %5 : vector<32x256xf32>
    %c0_4 = arith.constant 0 : index
    %c0_5 = arith.constant 0 : index
    %7 = vector.load %arg8[%c0_4, %c0_5] : memref<288x512xf32, #tpu.memory_space<vmem>>, vector<32x256xf32>
    tpu.vector_store %arg8[%c0_4, %c0_5], %6 {strides = array<i32>} : memref<288x512xf32, #tpu.memory_space<vmem>>, vector<32x256xf32>,
    %c16_i32 = arith.constant 16 : i32
    %8 = tpu.dynamic_rotate %2 by %c16_i32 dim 1 : vector<32x256xf32>, i32 -> vector<32x256xf32>
    %9 = vector.extract_strided_slice %0 {offsets = [1, 0], sizes = [1, 256], strides = [1, 1]} : vector<9x256xf32> to vector<1x256xf32>
    %10 = vector.broadcast %9 : vector<1x256xf32> to vector<32x256xf32>
    %11 = arith.mulf %8, %10 : vector<32x256xf32>
    %c32 = arith.constant 32 : index
    %c0_6 = arith.constant 0 : index
    %12 = vector.load %arg8[%c32, %c0_6] : memref<288x512xf32, #tpu.memory_space<vmem>>, vector<32x256xf32>
    tpu.vector_store %arg8[%c32, %c0_6], %11 {strides = array<i32>} : memref<288x512xf32, #tpu.memory_space<vmem>>, vector<32x256xf32>,
    %c15_i32 = arith.constant 15 : i32
    %13 = tpu.dynamic_rotate %2 by %c15_i32 dim 1 : vector<32x256xf32>, i32 -> vector<32x256xf32>
    %14 = vector.extract_strided_slice %0 {offsets = [2, 0], sizes = [1, 256], strides = [1, 1]} : vector<9x256xf32> to vector<1x256xf32>
    %15 = vector.broadcast %14 : vector<1x256xf32> to vector<32x256xf32>
    %16 = arith.mulf %13, %15 : vector<32x256xf32>
    %c64 = arith.constant 64 : index
    %c0_7 = arith.constant 0 : index
    %17 = vector.load %arg8[%c64, %c0_7] : memref<288x512xf32, #tpu.memory_space<vmem>>, vector<32x256xf32>
    tpu.vector_store %arg8[%c64, %c0_7], %16 {strides = array<i32>} : memref<288x512xf32, #tpu.memory_space<vmem>>, vector<32x256xf32>,
    %c1_i32 = arith.constant 1 : i32
    %18 = tpu.dynamic_rotate %2 by %c1_i32 dim 1 : vector<32x256xf32>, i32 -> vector<32x256xf32>
    %19 = vector.extract_strided_slice %0 {offsets = [3, 0], sizes = [1, 256], strides = [1, 1]} : vector<9x256xf32> to vector<1x256xf32>
    %20 = vector.broadcast %19 : vector<1x256xf32> to vector<32x256xf32>
    %21 = arith.mulf %18, %20 : vector<32x256xf32>
    %c96 = arith.constant 96 : index
    %c0_8 = arith.constant 0 : index
    %22 = vector.load %arg8[%c96, %c0_8] : memref<288x512xf32, #tpu.memory_space<vmem>>, vector<32x256xf32>
    tpu.vector_store %arg8[%c96, %c0_8], %21 {strides = array<i32>} : memref<288x512xf32, #tpu.memory_space<vmem>>, vector<32x256xf32>,
    %c128 = arith.constant 128 : index
    %c0_9 = arith.constant 0 : index
    %23 = vector.load %arg8[%c128, %c0_9] : memref<288x512xf32, #tpu.memory_space<vmem>>, vector<32x256xf32>
    tpu.vector_store %arg8[%c128, %c0_9], %2 {strides = array<i32>} : memref<288x512xf32, #tpu.memory_space<vmem>>, vector<32x256xf32>,
    %c255_i32 = arith.constant 255 : i32
    %24 = tpu.dynamic_rotate %2 by %c255_i32 dim 1 : vector<32x256xf32>, i32 -> vector<32x256xf32>
    %25 = vector.extract_strided_slice %0 {offsets = [5, 0], sizes = [1, 256], strides = [1, 1]} : vector<9x256xf32> to vector<1x256xf32>
    %26 = vector.broadcast %25 : vector<1x256xf32> to vector<32x256xf32>
    %27 = arith.mulf %24, %26 : vector<32x256xf32>
    %c160 = arith.constant 160 : index
    %c0_10 = arith.constant 0 : index
    %28 = vector.load %arg8[%c160, %c0_10] : memref<288x512xf32, #tpu.memory_space<vmem>>, vector<32x256xf32>
    tpu.vector_store %arg8[%c160, %c0_10], %27 {strides = array<i32>} : memref<288x512xf32, #tpu.memory_space<vmem>>, vector<32x256xf32>,
    %c241_i32 = arith.constant 241 : i32
    %29 = tpu.dynamic_rotate %2 by %c241_i32 dim 1 : vector<32x256xf32>, i32 -> vector<32x256xf32>
    %30 = vector.extract_strided_slice %0 {offsets = [6, 0], sizes = [1, 256], strides = [1, 1]} : vector<9x256xf32> to vector<1x256xf32>
    %31 = vector.broadcast %30 : vector<1x256xf32> to vector<32x256xf32>
    %32 = arith.mulf %29, %31 : vector<32x256xf32>
    %c192 = arith.constant 192 : index
    %c0_11 = arith.constant 0 : index
    %33 = vector.load %arg8[%c192, %c0_11] : memref<288x512xf32, #tpu.memory_space<vmem>>, vector<32x256xf32>
    tpu.vector_store %arg8[%c192, %c0_11], %32 {strides = array<i32>} : memref<288x512xf32, #tpu.memory_space<vmem>>, vector<32x256xf32>,
    %c240_i32 = arith.constant 240 : i32
    %34 = tpu.dynamic_rotate %2 by %c240_i32 dim 1 : vector<32x256xf32>, i32 -> vector<32x256xf32>
    %35 = vector.extract_strided_slice %0 {offsets = [7, 0], sizes = [1, 256], strides = [1, 1]} : vector<9x256xf32> to vector<1x256xf32>
    %36 = vector.broadcast %35 : vector<1x256xf32> to vector<32x256xf32>
    %37 = arith.mulf %34, %36 : vector<32x256xf32>
    %c224 = arith.constant 224 : index
    %c0_12 = arith.constant 0 : index
    %38 = vector.load %arg8[%c224, %c0_12] : memref<288x512xf32, #tpu.memory_space<vmem>>, vector<32x256xf32>
    tpu.vector_store %arg8[%c224, %c0_12], %37 {strides = array<i32>} : memref<288x512xf32, #tpu.memory_space<vmem>>, vector<32x256xf32>,
    %c239_i32 = arith.constant 239 : i32
    %39 = tpu.dynamic_rotate %2 by %c239_i32 dim 1 : vector<32x256xf32>, i32 -> vector<32x256xf32>
    %40 = vector.extract_strided_slice %0 {offsets = [8, 0], sizes = [1, 256], strides = [1, 1]} : vector<9x256xf32> to vector<1x256xf32>
    %41 = vector.broadcast %40 : vector<1x256xf32> to vector<32x256xf32>
    %42 = arith.mulf %39, %41 : vector<32x256xf32>
    %c256 = arith.constant 256 : index
    %c0_13 = arith.constant 0 : index
    %43 = vector.load %arg8[%c256, %c0_13] : memref<288x512xf32, #tpu.memory_space<vmem>>, vector<32x256xf32>
    tpu.vector_store %arg8[%c256, %c0_13], %42 {strides = array<i32>} : memref<288x512xf32, #tpu.memory_space<vmem>>, vector<32x256xf32>,
    %c1 = arith.constant 1 : index
    %c0_14 = arith.constant 0 : index
    %c0_15 = arith.constant 0 : index
    %44 = vector.load %arg1[%c1, %c0_14, %c0_15] : memref<2x32x256xf32, #tpu.memory_space<vmem>>, vector<1x32x256xf32>
    %45 = vector.shape_cast %44 : vector<1x32x256xf32> to vector<32x256xf32>
    %c17_i32_16 = arith.constant 17 : i32
    %46 = tpu.dynamic_rotate %45 by %c17_i32_16 dim 1 : vector<32x256xf32>, i32 -> vector<32x256xf32>
    %47 = vector.extract_strided_slice %0 {offsets = [0, 0], sizes = [1, 256], strides = [1, 1]} : vector<9x256xf32> to vector<1x256xf32>
    %48 = vector.broadcast %47 : vector<1x256xf32> to vector<32x256xf32>
    %49 = arith.mulf %46, %48 : vector<32x256xf32>
    %c0_17 = arith.constant 0 : index
    %c256_18 = arith.constant 256 : index
    %50 = vector.load %arg8[%c0_17, %c256_18] : memref<288x512xf32, #tpu.memory_space<vmem>>, vector<32x256xf32>
    tpu.vector_store %arg8[%c0_17, %c256_18], %49 {strides = array<i32>} : memref<288x512xf32, #tpu.memory_space<vmem>>, vector<32x256xf32>,
    %c16_i32_19 = arith.constant 16 : i32
    %51 = tpu.dynamic_rotate %45 by %c16_i32_19 dim 1 : vector<32x256xf32>, i32 -> vector<32x256xf32>
    %52 = vector.extract_strided_slice %0 {offsets = [1, 0], sizes = [1, 256], strides = [1, 1]} : vector<9x256xf32> to vector<1x256xf32>
    %53 = vector.broadcast %52 : vector<1x256xf32> to vector<32x256xf32>
    %54 = arith.mulf %51, %53 : vector<32x256xf32>
    %c32_20 = arith.constant 32 : index
    %c256_21 = arith.constant 256 : index
    %55 = vector.load %arg8[%c32_20, %c256_21] : memref<288x512xf32, #tpu.memory_space<vmem>>, vector<32x256xf32>
    tpu.vector_store %arg8[%c32_20, %c256_21], %54 {strides = array<i32>} : memref<288x512xf32, #tpu.memory_space<vmem>>, vector<32x256xf32>,
    %c15_i32_22 = arith.constant 15 : i32
    %56 = tpu.dynamic_rotate %45 by %c15_i32_22 dim 1 : vector<32x256xf32>, i32 -> vector<32x256xf32>
    %57 = vector.extract_strided_slice %0 {offsets = [2, 0], sizes = [1, 256], strides = [1, 1]} : vector<9x256xf32> to vector<1x256xf32>
    %58 = vector.broadcast %57 : vector<1x256xf32> to vector<32x256xf32>
    %59 = arith.mulf %56, %58 : vector<32x256xf32>
    %c64_23 = arith.constant 64 : index
    %c256_24 = arith.constant 256 : index
    %60 = vector.load %arg8[%c64_23, %c256_24] : memref<288x512xf32, #tpu.memory_space<vmem>>, vector<32x256xf32>
    tpu.vector_store %arg8[%c64_23, %c256_24], %59 {strides = array<i32>} : memref<288x512xf32, #tpu.memory_space<vmem>>, vector<32x256xf32>,
    %c1_i32_25 = arith.constant 1 : i32
    %61 = tpu.dynamic_rotate %45 by %c1_i32_25 dim 1 : vector<32x256xf32>, i32 -> vector<32x256xf32>
    %62 = vector.extract_strided_slice %0 {offsets = [3, 0], sizes = [1, 256], strides = [1, 1]} : vector<9x256xf32> to vector<1x256xf32>
    %63 = vector.broadcast %62 : vector<1x256xf32> to vector<32x256xf32>
    %64 = arith.mulf %61, %63 : vector<32x256xf32>
    %c96_26 = arith.constant 96 : index
    %c256_27 = arith.constant 256 : index
    %65 = vector.load %arg8[%c96_26, %c256_27] : memref<288x512xf32, #tpu.memory_space<vmem>>, vector<32x256xf32>
    tpu.vector_store %arg8[%c96_26, %c256_27], %64 {strides = array<i32>} : memref<288x512xf32, #tpu.memory_space<vmem>>, vector<32x256xf32>,
    %c128_28 = arith.constant 128 : index
    %c256_29 = arith.constant 256 : index
    %66 = vector.load %arg8[%c128_28, %c256_29] : memref<288x512xf32, #tpu.memory_space<vmem>>, vector<32x256xf32>
    tpu.vector_store %arg8[%c128_28, %c256_29], %45 {strides = array<i32>} : memref<288x512xf32, #tpu.memory_space<vmem>>, vector<32x256xf32>,
    %c255_i32_30 = arith.constant 255 : i32
    %67 = tpu.dynamic_rotate %45 by %c255_i32_30 dim 1 : vector<32x256xf32>, i32 -> vector<32x256xf32>
    %68 = vector.extract_strided_slice %0 {offsets = [5, 0], sizes = [1, 256], strides = [1, 1]} : vector<9x256xf32> to vector<1x256xf32>
    %69 = vector.broadcast %68 : vector<1x256xf32> to vector<32x256xf32>
    %70 = arith.mulf %67, %69 : vector<32x256xf32>
    %c160_31 = arith.constant 160 : index
    %c256_32 = arith.constant 256 : index
    %71 = vector.load %arg8[%c160_31, %c256_32] : memref<288x512xf32, #tpu.memory_space<vmem>>, vector<32x256xf32>
    tpu.vector_store %arg8[%c160_31, %c256_32], %70 {strides = array<i32>} : memref<288x512xf32, #tpu.memory_space<vmem>>, vector<32x256xf32>,
    %c241_i32_33 = arith.constant 241 : i32
    %72 = tpu.dynamic_rotate %45 by %c241_i32_33 dim 1 : vector<32x256xf32>, i32 -> vector<32x256xf32>
    %73 = vector.extract_strided_slice %0 {offsets = [6, 0], sizes = [1, 256], strides = [1, 1]} : vector<9x256xf32> to vector<1x256xf32>
    %74 = vector.broadcast %73 : vector<1x256xf32> to vector<32x256xf32>
    %75 = arith.mulf %72, %74 : vector<32x256xf32>
    %c192_34 = arith.constant 192 : index
    %c256_35 = arith.constant 256 : index
    %76 = vector.load %arg8[%c192_34, %c256_35] : memref<288x512xf32, #tpu.memory_space<vmem>>, vector<32x256xf32>
    tpu.vector_store %arg8[%c192_34, %c256_35], %75 {strides = array<i32>} : memref<288x512xf32, #tpu.memory_space<vmem>>, vector<32x256xf32>,
    %c240_i32_36 = arith.constant 240 : i32
    %77 = tpu.dynamic_rotate %45 by %c240_i32_36 dim 1 : vector<32x256xf32>, i32 -> vector<32x256xf32>
    %78 = vector.extract_strided_slice %0 {offsets = [7, 0], sizes = [1, 256], strides = [1, 1]} : vector<9x256xf32> to vector<1x256xf32>
    %79 = vector.broadcast %78 : vector<1x256xf32> to vector<32x256xf32>
    %80 = arith.mulf %77, %79 : vector<32x256xf32>
    %c224_37 = arith.constant 224 : index
    %c256_38 = arith.constant 256 : index
    %81 = vector.load %arg8[%c224_37, %c256_38] : memref<288x512xf32, #tpu.memory_space<vmem>>, vector<32x256xf32>
    tpu.vector_store %arg8[%c224_37, %c256_38], %80 {strides = array<i32>} : memref<288x512xf32, #tpu.memory_space<vmem>>, vector<32x256xf32>,
    %c239_i32_39 = arith.constant 239 : i32
    %82 = tpu.dynamic_rotate %45 by %c239_i32_39 dim 1 : vector<32x256xf32>, i32 -> vector<32x256xf32>
    %83 = vector.extract_strided_slice %0 {offsets = [8, 0], sizes = [1, 256], strides = [1, 1]} : vector<9x256xf32> to vector<1x256xf32>
    %84 = vector.broadcast %83 : vector<1x256xf32> to vector<32x256xf32>
    %85 = arith.mulf %82, %84 : vector<32x256xf32>
    %c256_40 = arith.constant 256 : index
    %c256_41 = arith.constant 256 : index
    %86 = vector.load %arg8[%c256_40, %c256_41] : memref<288x512xf32, #tpu.memory_space<vmem>>, vector<32x256xf32>
    tpu.vector_store %arg8[%c256_40, %c256_41], %85 {strides = array<i32>} : memref<288x512xf32, #tpu.memory_space<vmem>>, vector<32x256xf32>,
    %c0_42 = arith.constant 0 : index
    %c0_43 = arith.constant 0 : index
    %87 = vector.load %arg2[%c0_42, %c0_43] : memref<32x288xf32, #tpu.memory_space<vmem>>, vector<32x288xf32>
    %c0_44 = arith.constant 0 : index
    %c0_45 = arith.constant 0 : index
    %88 = vector.load %arg8[%c0_44, %c0_45] : memref<288x512xf32, #tpu.memory_space<vmem>>, vector<288x512xf32>
    %cst = arith.constant dense<0.000000e+00> : vector<32x512xf32>
    %89 = tpu.matmul %87, %88, %cst {dimension_numbers = #tpu.dot_dimension_numbers<[1], [0], [0], [1], [0, 0, 1, 1], [], []>} : vector<32x288xf32>, vector<288x512xf32>, vector<32x512xf32> -> vector<32x512xf32>
    %c0_46 = arith.constant 0 : index
    %c0_47 = arith.constant 0 : index
    %90 = vector.load %arg3[%c0_46, %c0_47] : memref<32x1xf32, #tpu.memory_space<vmem>>, vector<32x1xf32>
    %91 = vector.broadcast %90 : vector<32x1xf32> to vector<32x512xf32>
    %92 = arith.addf %89, %91 : vector<32x512xf32>
    %cst_48 = arith.constant 0.000000e+00 : f32
    %93 = vector.broadcast %cst_48 : f32 to vector<32x512xf32>
    %94 = arith.maximumf %92, %93 : vector<32x512xf32>
    %95 = vector.extract_strided_slice %94 {offsets = [0, 0], sizes = [32, 256], strides = [1, 1]} : vector<32x512xf32> to vector<32x256xf32>
    %c17_i32_49 = arith.constant 17 : i32
    %96 = tpu.dynamic_rotate %95 by %c17_i32_49 dim 1 : vector<32x256xf32>, i32 -> vector<32x256xf32>
    %97 = vector.extract_strided_slice %0 {offsets = [0, 0], sizes = [1, 256], strides = [1, 1]} : vector<9x256xf32> to vector<1x256xf32>
    %98 = vector.broadcast %97 : vector<1x256xf32> to vector<32x256xf32>
    %99 = arith.mulf %96, %98 : vector<32x256xf32>
    %c0_50 = arith.constant 0 : index
    %c0_51 = arith.constant 0 : index
    %100 = vector.load %arg9[%c0_50, %c0_51] : memref<288x512xf32, #tpu.memory_space<vmem>>, vector<32x256xf32>
    tpu.vector_store %arg9[%c0_50, %c0_51], %99 {strides = array<i32>} : memref<288x512xf32, #tpu.memory_space<vmem>>, vector<32x256xf32>,
    %c16_i32_52 = arith.constant 16 : i32
    %101 = tpu.dynamic_rotate %95 by %c16_i32_52 dim 1 : vector<32x256xf32>, i32 -> vector<32x256xf32>
    %102 = vector.extract_strided_slice %0 {offsets = [1, 0], sizes = [1, 256], strides = [1, 1]} : vector<9x256xf32> to vector<1x256xf32>
    %103 = vector.broadcast %102 : vector<1x256xf32> to vector<32x256xf32>
    %104 = arith.mulf %101, %103 : vector<32x256xf32>
    %c32_53 = arith.constant 32 : index
    %c0_54 = arith.constant 0 : index
    %105 = vector.load %arg9[%c32_53, %c0_54] : memref<288x512xf32, #tpu.memory_space<vmem>>, vector<32x256xf32>
    tpu.vector_store %arg9[%c32_53, %c0_54], %104 {strides = array<i32>} : memref<288x512xf32, #tpu.memory_space<vmem>>, vector<32x256xf32>,
    %c15_i32_55 = arith.constant 15 : i32
    %106 = tpu.dynamic_rotate %95 by %c15_i32_55 dim 1 : vector<32x256xf32>, i32 -> vector<32x256xf32>
    %107 = vector.extract_strided_slice %0 {offsets = [2, 0], sizes = [1, 256], strides = [1, 1]} : vector<9x256xf32> to vector<1x256xf32>
    %108 = vector.broadcast %107 : vector<1x256xf32> to vector<32x256xf32>
    %109 = arith.mulf %106, %108 : vector<32x256xf32>
    %c64_56 = arith.constant 64 : index
    %c0_57 = arith.constant 0 : index
    %110 = vector.load %arg9[%c64_56, %c0_57] : memref<288x512xf32, #tpu.memory_space<vmem>>, vector<32x256xf32>
    tpu.vector_store %arg9[%c64_56, %c0_57], %109 {strides = array<i32>} : memref<288x512xf32, #tpu.memory_space<vmem>>, vector<32x256xf32>,
    %c1_i32_58 = arith.constant 1 : i32
    %111 = tpu.dynamic_rotate %95 by %c1_i32_58 dim 1 : vector<32x256xf32>, i32 -> vector<32x256xf32>
    %112 = vector.extract_strided_slice %0 {offsets = [3, 0], sizes = [1, 256], strides = [1, 1]} : vector<9x256xf32> to vector<1x256xf32>
    %113 = vector.broadcast %112 : vector<1x256xf32> to vector<32x256xf32>
    %114 = arith.mulf %111, %113 : vector<32x256xf32>
    %c96_59 = arith.constant 96 : index
    %c0_60 = arith.constant 0 : index
    %115 = vector.load %arg9[%c96_59, %c0_60] : memref<288x512xf32, #tpu.memory_space<vmem>>, vector<32x256xf32>
    tpu.vector_store %arg9[%c96_59, %c0_60], %114 {strides = array<i32>} : memref<288x512xf32, #tpu.memory_space<vmem>>, vector<32x256xf32>,
    %c128_61 = arith.constant 128 : index
    %c0_62 = arith.constant 0 : index
    %116 = vector.load %arg9[%c128_61, %c0_62] : memref<288x512xf32, #tpu.memory_space<vmem>>, vector<32x256xf32>
    tpu.vector_store %arg9[%c128_61, %c0_62], %95 {strides = array<i32>} : memref<288x512xf32, #tpu.memory_space<vmem>>, vector<32x256xf32>,
    %c255_i32_63 = arith.constant 255 : i32
    %117 = tpu.dynamic_rotate %95 by %c255_i32_63 dim 1 : vector<32x256xf32>, i32 -> vector<32x256xf32>
    %118 = vector.extract_strided_slice %0 {offsets = [5, 0], sizes = [1, 256], strides = [1, 1]} : vector<9x256xf32> to vector<1x256xf32>
    %119 = vector.broadcast %118 : vector<1x256xf32> to vector<32x256xf32>
    %120 = arith.mulf %117, %119 : vector<32x256xf32>
    %c160_64 = arith.constant 160 : index
    %c0_65 = arith.constant 0 : index
    %121 = vector.load %arg9[%c160_64, %c0_65] : memref<288x512xf32, #tpu.memory_space<vmem>>, vector<32x256xf32>
    tpu.vector_store %arg9[%c160_64, %c0_65], %120 {strides = array<i32>} : memref<288x512xf32, #tpu.memory_space<vmem>>, vector<32x256xf32>,
    %c241_i32_66 = arith.constant 241 : i32
    %122 = tpu.dynamic_rotate %95 by %c241_i32_66 dim 1 : vector<32x256xf32>, i32 -> vector<32x256xf32>
    %123 = vector.extract_strided_slice %0 {offsets = [6, 0], sizes = [1, 256], strides = [1, 1]} : vector<9x256xf32> to vector<1x256xf32>
    %124 = vector.broadcast %123 : vector<1x256xf32> to vector<32x256xf32>
    %125 = arith.mulf %122, %124 : vector<32x256xf32>
    %c192_67 = arith.constant 192 : index
    %c0_68 = arith.constant 0 : index
    %126 = vector.load %arg9[%c192_67, %c0_68] : memref<288x512xf32, #tpu.memory_space<vmem>>, vector<32x256xf32>
    tpu.vector_store %arg9[%c192_67, %c0_68], %125 {strides = array<i32>} : memref<288x512xf32, #tpu.memory_space<vmem>>, vector<32x256xf32>,
    %c240_i32_69 = arith.constant 240 : i32
    %127 = tpu.dynamic_rotate %95 by %c240_i32_69 dim 1 : vector<32x256xf32>, i32 -> vector<32x256xf32>
    %128 = vector.extract_strided_slice %0 {offsets = [7, 0], sizes = [1, 256], strides = [1, 1]} : vector<9x256xf32> to vector<1x256xf32>
    %129 = vector.broadcast %128 : vector<1x256xf32> to vector<32x256xf32>
    %130 = arith.mulf %127, %129 : vector<32x256xf32>
    %c224_70 = arith.constant 224 : index
    %c0_71 = arith.constant 0 : index
    %131 = vector.load %arg9[%c224_70, %c0_71] : memref<288x512xf32, #tpu.memory_space<vmem>>, vector<32x256xf32>
    tpu.vector_store %arg9[%c224_70, %c0_71], %130 {strides = array<i32>} : memref<288x512xf32, #tpu.memory_space<vmem>>, vector<32x256xf32>,
    %c239_i32_72 = arith.constant 239 : i32
    %132 = tpu.dynamic_rotate %95 by %c239_i32_72 dim 1 : vector<32x256xf32>, i32 -> vector<32x256xf32>
    %133 = vector.extract_strided_slice %0 {offsets = [8, 0], sizes = [1, 256], strides = [1, 1]} : vector<9x256xf32> to vector<1x256xf32>
    %134 = vector.broadcast %133 : vector<1x256xf32> to vector<32x256xf32>
    %135 = arith.mulf %132, %134 : vector<32x256xf32>
    %c256_73 = arith.constant 256 : index
    %c0_74 = arith.constant 0 : index
    %136 = vector.load %arg9[%c256_73, %c0_74] : memref<288x512xf32, #tpu.memory_space<vmem>>, vector<32x256xf32>
    tpu.vector_store %arg9[%c256_73, %c0_74], %135 {strides = array<i32>} : memref<288x512xf32, #tpu.memory_space<vmem>>, vector<32x256xf32>,
    %137 = vector.extract_strided_slice %94 {offsets = [0, 256], sizes = [32, 256], strides = [1, 1]} : vector<32x512xf32> to vector<32x256xf32>
    %c17_i32_75 = arith.constant 17 : i32
    %138 = tpu.dynamic_rotate %137 by %c17_i32_75 dim 1 : vector<32x256xf32>, i32 -> vector<32x256xf32>
    %139 = vector.extract_strided_slice %0 {offsets = [0, 0], sizes = [1, 256], strides = [1, 1]} : vector<9x256xf32> to vector<1x256xf32>
    %140 = vector.broadcast %139 : vector<1x256xf32> to vector<32x256xf32>
    %141 = arith.mulf %138, %140 : vector<32x256xf32>
    %c0_76 = arith.constant 0 : index
    %c256_77 = arith.constant 256 : index
    %142 = vector.load %arg9[%c0_76, %c256_77] : memref<288x512xf32, #tpu.memory_space<vmem>>, vector<32x256xf32>
    tpu.vector_store %arg9[%c0_76, %c256_77], %141 {strides = array<i32>} : memref<288x512xf32, #tpu.memory_space<vmem>>, vector<32x256xf32>,
    %c16_i32_78 = arith.constant 16 : i32
    %143 = tpu.dynamic_rotate %137 by %c16_i32_78 dim 1 : vector<32x256xf32>, i32 -> vector<32x256xf32>
    %144 = vector.extract_strided_slice %0 {offsets = [1, 0], sizes = [1, 256], strides = [1, 1]} : vector<9x256xf32> to vector<1x256xf32>
    %145 = vector.broadcast %144 : vector<1x256xf32> to vector<32x256xf32>
    %146 = arith.mulf %143, %145 : vector<32x256xf32>
    %c32_79 = arith.constant 32 : index
    %c256_80 = arith.constant 256 : index
    %147 = vector.load %arg9[%c32_79, %c256_80] : memref<288x512xf32, #tpu.memory_space<vmem>>, vector<32x256xf32>
    tpu.vector_store %arg9[%c32_79, %c256_80], %146 {strides = array<i32>} : memref<288x512xf32, #tpu.memory_space<vmem>>, vector<32x256xf32>,
    %c15_i32_81 = arith.constant 15 : i32
    %148 = tpu.dynamic_rotate %137 by %c15_i32_81 dim 1 : vector<32x256xf32>, i32 -> vector<32x256xf32>
    %149 = vector.extract_strided_slice %0 {offsets = [2, 0], sizes = [1, 256], strides = [1, 1]} : vector<9x256xf32> to vector<1x256xf32>
    %150 = vector.broadcast %149 : vector<1x256xf32> to vector<32x256xf32>
    %151 = arith.mulf %148, %150 : vector<32x256xf32>
    %c64_82 = arith.constant 64 : index
    %c256_83 = arith.constant 256 : index
    %152 = vector.load %arg9[%c64_82, %c256_83] : memref<288x512xf32, #tpu.memory_space<vmem>>, vector<32x256xf32>
    tpu.vector_store %arg9[%c64_82, %c256_83], %151 {strides = array<i32>} : memref<288x512xf32, #tpu.memory_space<vmem>>, vector<32x256xf32>,
    %c1_i32_84 = arith.constant 1 : i32
    %153 = tpu.dynamic_rotate %137 by %c1_i32_84 dim 1 : vector<32x256xf32>, i32 -> vector<32x256xf32>
    %154 = vector.extract_strided_slice %0 {offsets = [3, 0], sizes = [1, 256], strides = [1, 1]} : vector<9x256xf32> to vector<1x256xf32>
    %155 = vector.broadcast %154 : vector<1x256xf32> to vector<32x256xf32>
    %156 = arith.mulf %153, %155 : vector<32x256xf32>
    %c96_85 = arith.constant 96 : index
    %c256_86 = arith.constant 256 : index
    %157 = vector.load %arg9[%c96_85, %c256_86] : memref<288x512xf32, #tpu.memory_space<vmem>>, vector<32x256xf32>
    tpu.vector_store %arg9[%c96_85, %c256_86], %156 {strides = array<i32>} : memref<288x512xf32, #tpu.memory_space<vmem>>, vector<32x256xf32>,
    %c128_87 = arith.constant 128 : index
    %c256_88 = arith.constant 256 : index
    %158 = vector.load %arg9[%c128_87, %c256_88] : memref<288x512xf32, #tpu.memory_space<vmem>>, vector<32x256xf32>
    tpu.vector_store %arg9[%c128_87, %c256_88], %137 {strides = array<i32>} : memref<288x512xf32, #tpu.memory_space<vmem>>, vector<32x256xf32>,
    %c255_i32_89 = arith.constant 255 : i32
    %159 = tpu.dynamic_rotate %137 by %c255_i32_89 dim 1 : vector<32x256xf32>, i32 -> vector<32x256xf32>
    %160 = vector.extract_strided_slice %0 {offsets = [5, 0], sizes = [1, 256], strides = [1, 1]} : vector<9x256xf32> to vector<1x256xf32>
    %161 = vector.broadcast %160 : vector<1x256xf32> to vector<32x256xf32>
    %162 = arith.mulf %159, %161 : vector<32x256xf32>
    %c160_90 = arith.constant 160 : index
    %c256_91 = arith.constant 256 : index
    %163 = vector.load %arg9[%c160_90, %c256_91] : memref<288x512xf32, #tpu.memory_space<vmem>>, vector<32x256xf32>
    tpu.vector_store %arg9[%c160_90, %c256_91], %162 {strides = array<i32>} : memref<288x512xf32, #tpu.memory_space<vmem>>, vector<32x256xf32>,
    %c241_i32_92 = arith.constant 241 : i32
    %164 = tpu.dynamic_rotate %137 by %c241_i32_92 dim 1 : vector<32x256xf32>, i32 -> vector<32x256xf32>
    %165 = vector.extract_strided_slice %0 {offsets = [6, 0], sizes = [1, 256], strides = [1, 1]} : vector<9x256xf32> to vector<1x256xf32>
    %166 = vector.broadcast %165 : vector<1x256xf32> to vector<32x256xf32>
    %167 = arith.mulf %164, %166 : vector<32x256xf32>
    %c192_93 = arith.constant 192 : index
    %c256_94 = arith.constant 256 : index
    %168 = vector.load %arg9[%c192_93, %c256_94] : memref<288x512xf32, #tpu.memory_space<vmem>>, vector<32x256xf32>
    tpu.vector_store %arg9[%c192_93, %c256_94], %167 {strides = array<i32>} : memref<288x512xf32, #tpu.memory_space<vmem>>, vector<32x256xf32>,
    %c240_i32_95 = arith.constant 240 : i32
    %169 = tpu.dynamic_rotate %137 by %c240_i32_95 dim 1 : vector<32x256xf32>, i32 -> vector<32x256xf32>
    %170 = vector.extract_strided_slice %0 {offsets = [7, 0], sizes = [1, 256], strides = [1, 1]} : vector<9x256xf32> to vector<1x256xf32>
    %171 = vector.broadcast %170 : vector<1x256xf32> to vector<32x256xf32>
    %172 = arith.mulf %169, %171 : vector<32x256xf32>
    %c224_96 = arith.constant 224 : index
    %c256_97 = arith.constant 256 : index
    %173 = vector.load %arg9[%c224_96, %c256_97] : memref<288x512xf32, #tpu.memory_space<vmem>>, vector<32x256xf32>
    tpu.vector_store %arg9[%c224_96, %c256_97], %172 {strides = array<i32>} : memref<288x512xf32, #tpu.memory_space<vmem>>, vector<32x256xf32>,
    %c239_i32_98 = arith.constant 239 : i32
    %174 = tpu.dynamic_rotate %137 by %c239_i32_98 dim 1 : vector<32x256xf32>, i32 -> vector<32x256xf32>
    %175 = vector.extract_strided_slice %0 {offsets = [8, 0], sizes = [1, 256], strides = [1, 1]} : vector<9x256xf32> to vector<1x256xf32>
    %176 = vector.broadcast %175 : vector<1x256xf32> to vector<32x256xf32>
    %177 = arith.mulf %174, %176 : vector<32x256xf32>
    %c256_99 = arith.constant 256 : index
    %c256_100 = arith.constant 256 : index
    %178 = vector.load %arg9[%c256_99, %c256_100] : memref<288x512xf32, #tpu.memory_space<vmem>>, vector<32x256xf32>
    tpu.vector_store %arg9[%c256_99, %c256_100], %177 {strides = array<i32>} : memref<288x512xf32, #tpu.memory_space<vmem>>, vector<32x256xf32>,
    %c0_101 = arith.constant 0 : index
    %c0_102 = arith.constant 0 : index
    %179 = vector.load %arg4[%c0_101, %c0_102] : memref<32x288xf32, #tpu.memory_space<vmem>>, vector<32x288xf32>
    %c0_103 = arith.constant 0 : index
    %c0_104 = arith.constant 0 : index
    %180 = vector.load %arg9[%c0_103, %c0_104] : memref<288x512xf32, #tpu.memory_space<vmem>>, vector<288x512xf32>
    %cst_105 = arith.constant dense<0.000000e+00> : vector<32x512xf32>
    %181 = tpu.matmul %179, %180, %cst_105 {dimension_numbers = #tpu.dot_dimension_numbers<[1], [0], [0], [1], [0, 0, 1, 1], [], []>} : vector<32x288xf32>, vector<288x512xf32>, vector<32x512xf32> -> vector<32x512xf32>
    %c0_106 = arith.constant 0 : index
    %c0_107 = arith.constant 0 : index
    %182 = vector.load %arg5[%c0_106, %c0_107] : memref<32x1xf32, #tpu.memory_space<vmem>>, vector<32x1xf32>
    %183 = vector.broadcast %182 : vector<32x1xf32> to vector<32x512xf32>
    %184 = arith.addf %181, %183 : vector<32x512xf32>
    %185 = vector.extract_strided_slice %184 {offsets = [0, 0], sizes = [32, 256], strides = [1, 1]} : vector<32x512xf32> to vector<32x256xf32>
    %c0_108 = arith.constant 0 : index
    %c0_109 = arith.constant 0 : index
    %c0_110 = arith.constant 0 : index
    %186 = vector.load %arg1[%c0_108, %c0_109, %c0_110] : memref<2x32x256xf32, #tpu.memory_space<vmem>>, vector<1x32x256xf32>
    %187 = vector.shape_cast %186 : vector<1x32x256xf32> to vector<32x256xf32>
    %188 = arith.addf %185, %187 : vector<32x256xf32>
    %cst_111 = arith.constant 0.000000e+00 : f32
    %189 = vector.broadcast %cst_111 : f32 to vector<32x256xf32>
    %190 = arith.maximumf %188, %189 : vector<32x256xf32>
    %c0_112 = arith.constant 0 : index
    %c0_113 = arith.constant 0 : index
    %c0_114 = arith.constant 0 : index
    %191 = vector.load %arg7[%c0_112, %c0_113, %c0_114] : memref<2x32x256xf32, #tpu.memory_space<vmem>>, vector<1x32x256xf32>
    %192 = vector.shape_cast %191 : vector<1x32x256xf32> to vector<32x256xf32>
    %193 = vector.shape_cast %190 : vector<32x256xf32> to vector<1x32x256xf32>
    tpu.vector_store %arg7[%c0_112, %c0_113, %c0_114], %193 {strides = array<i32>} : memref<2x32x256xf32, #tpu.memory_space<vmem>>, vector<1x32x256xf32>,
    %194 = vector.extract_strided_slice %184 {offsets = [0, 256], sizes = [32, 256], strides = [1, 1]} : vector<32x512xf32> to vector<32x256xf32>
    %c1_115 = arith.constant 1 : index
    %c0_116 = arith.constant 0 : index
    %c0_117 = arith.constant 0 : index
    %195 = vector.load %arg1[%c1_115, %c0_116, %c0_117] : memref<2x32x256xf32, #tpu.memory_space<vmem>>, vector<1x32x256xf32>
    %196 = vector.shape_cast %195 : vector<1x32x256xf32> to vector<32x256xf32>
    %197 = arith.addf %194, %196 : vector<32x256xf32>
    %cst_118 = arith.constant 0.000000e+00 : f32
    %198 = vector.broadcast %cst_118 : f32 to vector<32x256xf32>
    %199 = arith.maximumf %197, %198 : vector<32x256xf32>
    %c1_119 = arith.constant 1 : index
    %c0_120 = arith.constant 0 : index
    %c0_121 = arith.constant 0 : index
    %200 = vector.load %arg7[%c1_119, %c0_120, %c0_121] : memref<2x32x256xf32, #tpu.memory_space<vmem>>, vector<1x32x256xf32>
    %201 = vector.shape_cast %200 : vector<1x32x256xf32> to vector<32x256xf32>
    %202 = vector.shape_cast %199 : vector<32x256xf32> to vector<1x32x256xf32>
    tpu.vector_store %arg7[%c1_119, %c0_120, %c0_121], %202 {strides = array<i32>} : memref<2x32x256xf32, #tpu.memory_space<vmem>>, vector<1x32x256xf32>,
    return
  }
  func.func @transform_0(%arg0: i32) -> (i32, i32, i32) {
    %c0_i32 = arith.constant 0 : i32
    %c0_i32_0 = arith.constant 0 : i32
    %c0_i32_1 = arith.constant 0 : i32
    return %arg0, %c0_i32, %c0_i32_0 : i32, i32, i32
  }
  func.func @transform_1(%arg0: i32) -> (i32, i32) {
    %c0_i32 = arith.constant 0 : i32
    %c0_i32_0 = arith.constant 0 : i32
    %c0_i32_1 = arith.constant 0 : i32
    return %c0_i32, %c0_i32_0 : i32, i32
  }
  func.func @transform_2(%arg0: i32) -> (i32, i32) {
    %c0_i32 = arith.constant 0 : i32
    %c0_i32_0 = arith.constant 0 : i32
    %c0_i32_1 = arith.constant 0 : i32
    return %c0_i32, %c0_i32_0 : i32, i32
  }
  func.func @transform_3(%arg0: i32) -> (i32, i32) {
    %c0_i32 = arith.constant 0 : i32
    %c0_i32_0 = arith.constant 0 : i32
    %c0_i32_1 = arith.constant 0 : i32
    return %c0_i32, %c0_i32_0 : i32, i32
  }
  func.func @transform_4(%arg0: i32) -> (i32, i32) {
    %c0_i32 = arith.constant 0 : i32
    %c0_i32_0 = arith.constant 0 : i32
    %c0_i32_1 = arith.constant 0 : i32
    return %c0_i32, %c0_i32_0 : i32, i32
  }
  func.func @transform_5(%arg0: i32) -> (i32, i32) {
    %c0_i32 = arith.constant 0 : i32
    %c0_i32_0 = arith.constant 0 : i32
    %c0_i32_1 = arith.constant 0 : i32
    return %c0_i32, %c0_i32_0 : i32, i32
  }
  func.func @transform_6(%arg0: i32) -> (i32, i32, i32) {
    %c0_i32 = arith.constant 0 : i32
    %c0_i32_0 = arith.constant 0 : i32
    %c0_i32_1 = arith.constant 0 : i32
    return %arg0, %c0_i32, %c0_i32_0 : i32, i32, i32
  }
}

</mosaic_0001>

<bundles_post_ra>
// kernel: tpu_custom_call.1
= control target key start
LH: loop header
LB: loop body
LE: loop exit
PB: predicated region body
PF: predicated region fallthrough
CT: control target
= control target key end

     0   :  { %11 = vsyncpa [#allocation5], 0  ;;  %s5113_s0 = inlined_call_operand.hbm [shape: f32[2,32,256], index: 0, kind: input, shape index: {}]   ;;  %s5114_s1 = inlined_call_operand.hbm [shape: f32[32,288], index: 1, kind: input, shape index: {}]   ;;  %s5115_s2 = inlined_call_operand.vmem [shape: f32[32,1], index: 2, kind: input, shape index: {}]   ;;  %s5116_s3 = inlined_call_operand.hbm [shape: f32[32,288], index: 3, kind: input, shape index: {}]   ;;  %s5117_s4 = inlined_call_operand.vmem [shape: f32[32,1], index: 4, kind: input, shape index: {}]   ;;  %s5118_s5 = inlined_call_operand.vmem [shape: f32[9,256], index: 5, kind: input, shape index: {}]   ;;  %s5119_s6 = inlined_call_operand.hbm [shape: f32[2,32,256], index: 6, kind: output, shape index: {}]  }
   0x1   :  { %12 = vsyncpa [#allocation8], 0 }
   0x2   :  { %13 = vsyncpa [#allocation6], 0  ;;  %s3155_s21 = smov [#allocation7]   ;;  %s3061_s25 = scalar_lea.hbm %s5114_s1, 1536 }
   0x3   :  { %s31_s22 = sshll.u32 %s3155_s21, 4  ;;  %p3062_p0 = scmp.ne.s32.totalorder %s5114_s1, %s3061_s25  ;;  %s32_s22 = int_to_ptr.vmem [resolvable:$true] %s31_s22 }
   0x4   :  { %p3065_p1 = scmp.lt.u32.totalorder %s3061_s25, %s5114_s1 }
   0x6   :  { %p3067_p2 = pnand %p3065_p1, %p3062_p0 }
   0x8   :  { %3070 = shalt.err (!%p3067_p2)
}
   0x9   :  { %s3071_s30 = scalar_lea.vmem %s32_s22, 1536  ;;  %p3076_p4 = scmp.lt.s32.totalorder %s32_s22, %s32_s22 }
   0xa   :  { %p3072_p3 = scmp.ne.s32.totalorder %s32_s22, %s3071_s30  ;;  %p3077_p5 = scmp.lt.s32.totalorder %s3071_s30, %s3071_s30 }
   0xc   :  { %p3078_p6 = por %p3077_p5, %p3076_p4 }
   0xe   :  { %p3079_p7 = pnand %p3078_p6, %p3072_p3 }
  0x10   :  { %3082 = shalt.err (!%p3079_p7)
}
  0x11   :  { %s3156_s7 = smov 384   ;;  %s3157_s8 = smov 24  }
  0x12   :  { %37 = dma.hbm_to_vmem [thread:$0]  %s5114_s1, 1536, %s32_s22, [#allocation8], %s3156_s7, %s3156_s7, %s3157_s8  }
  0x13   :  { %s3158_s11 = smov [#allocation4]   ;;  %s3083_s15 = scalar_lea.hbm %s5113_s0, 2048 }
  0x14   :  { %s19_s12 = sshll.u32 %s3158_s11, 4  ;;  %p3084_p8 = scmp.ne.s32.totalorder %s5113_s0, %s3083_s15  ;;  %s20_s12 = int_to_ptr.vmem [resolvable:$true] %s19_s12 }
  0x15   :  { %p3087_p9 = scmp.lt.u32.totalorder %s3083_s15, %s5113_s0 }
  0x17   :  { %p3089_p10 = pnand %p3087_p9, %p3084_p8 }
  0x19   :  { %3092 = shalt.err (!%p3089_p10)
}
  0x1a   :  { %s3093_s20 = scalar_lea.vmem %s20_s12, 2048  ;;  %p3098_p12 = scmp.lt.s32.totalorder %s20_s12, %s20_s12 }
  0x1b   :  { %p3094_p11 = scmp.ne.s32.totalorder %s20_s12, %s3093_s20  ;;  %p3099_p13 = scmp.lt.s32.totalorder %s3093_s20, %s3093_s20 }
  0x1d   :  { %p3100_p0 = por %p3099_p13, %p3098_p12 }
  0x1f   :  { %p3101_p1 = pnand %p3100_p0, %p3094_p11 }
  0x21   :  { %3104 = shalt.err (!%p3101_p1)
}
  0x22   :  { %s3159_s1 = smov 256   ;;  %s3160_s21 = smov 16  }
  0x23   :  { %25 = dma.hbm_to_vmem [thread:$0]  %s5113_s0, 2048, %s20_s12, [#allocation5], %s3159_s1, %s3159_s1, %s3160_s21  }
  0x24   :  { %s3161_s24 = smov [#allocation9]   ;;  %s3105_s28 = scalar_lea.hbm %s5116_s3, 1536 }
  0x25   :  { %s45_s25 = sshll.u32 %s3161_s24, 4  ;;  %p3106_p2 = scmp.ne.s32.totalorder %s5116_s3, %s3105_s28  ;;  %s46_s25 = int_to_ptr.vmem [resolvable:$true] %s45_s25 }
  0x26   :  { %p3109_p3 = scmp.lt.u32.totalorder %s3105_s28, %s5116_s3 }
  0x28   :  { %p3111_p4 = pnand %p3109_p3, %p3106_p2 }
  0x2a   :  { %3114 = shalt.err (!%p3111_p4)
}
  0x2b   :  { %s3115_s11 = scalar_lea.vmem %s46_s25, 1536  ;;  %p3120_p6 = scmp.lt.s32.totalorder %s46_s25, %s46_s25 }
  0x2c   :  { %p3116_p5 = scmp.ne.s32.totalorder %s46_s25, %s3115_s11  ;;  %p3121_p7 = scmp.lt.s32.totalorder %s3115_s11, %s3115_s11 }
  0x2e   :  { %p3122_p8 = por %p3121_p7, %p3120_p6 }
  0x30   :  { %p3123_p9 = pnand %p3122_p8, %p3116_p5 }
  0x32   :  { %3126 = shalt.err (!%p3123_p9)
}
  0x33   :  { %51 = dma.hbm_to_vmem [thread:$0]  %s5116_s3, 1536, %s46_s25, [#allocation8], %s3156_s7, %s3156_s7, %s3157_s8  }
  0x34   :  { %3149 = dma.done.wait [#allocation5], 2048  }
  0x35   :  { %3150 = vsyncadd [#allocation5], 4294965248 }
  0x36   :  { %3151 = dma.done.wait [#allocation8], 3072  }
  0x37   :  { %3152 = vsyncadd [#allocation8], 4294964224  ;;  %v3252_v0 = vld [vmem:[#allocation4 + $0x8] sm:$0xff]  ;;  %v3254_v1 = vld [vmem:[#allocation4] sm:$0xff]  ;;  %s3162_s13 = smov 17   ;;  %s3163_s3 = smov 15   ;;  %v93_v16 = vlaneseq }
  0x38   :  { %85 = vrot.lane.b32.xlu1 %v3252_v0, %s3162_s13  ;;  %77 = vrot.lane.b32.xlu0 %v3254_v1, %s3162_s13  ;;  %v3260_v2 = vld [vmem:[#allocation4 + $0x18] sm:$0xff]  ;;  %v3262_v3 = vld [vmem:[#allocation4 + $0x10] sm:$0xff]  ;;  %v3270_v5 = vld [vmem:[#allocation4 + $0x40] sm:$0xff]  ;;  %s3164_s7 = smov 1   ;;  %s3165_s17 = smov 127   ;;  %vm996_vm8 = vcmask 261120  }
  0x39   :  { %v3268_v4 = vld [vmem:[#allocation4 + $0x50] sm:$0xff]  ;;  %v3276_v6 = vld [vmem:[#allocation4 + $0x58] sm:$0xff]  ;;  %v3278_v7 = vld [vmem:[#allocation4 + $0x48] sm:$0xff]  ;;  %v3392_v17 = vshrl.u32 %v93_v16, 7  ;;  %v3398_v18 = vand.u32 127, %v93_v16  ;;  %s3166_s18 = smov 113  }
  0x3a   :  { %v3284_v8 = vld [vmem:[#allocation4 + $0x30] sm:$0xff]  ;;  %v3286_v9 = vld [vmem:[#allocation4 + $0x20] sm:$0xff]  ;;  %v3292_v10 = vld [vmem:[#allocation4 + $0x38] sm:$0xff]  ;;  %s3167_s19 = smov 112   ;;  %s3168_s20 = smov 111  }
  0x3b   :  { %v3294_v11 = vld [vmem:[#allocation4 + $0x28] sm:$0xff]  ;;  %v3300_v12 = vld [vmem:[#allocation4 + $0x70] sm:$0xff]  ;;  %v3302_v13 = vld [vmem:[#allocation4 + $0x60] sm:$0xff]  ;;  %v106_v19 = vsub.s32 0, %v3392_v17  ;;  %vm95_vm0 = vcmp.lt.s32.totalorder %v3398_v18, 17  ;;  %vm144_vm1 = vcmp.lt.s32.totalorder %v3398_v18, 16 }
  0x3c   :  { %87 = vrot.lane.b32.xlu1 %v3260_v2, %s3162_s13  ;;  %79 = vrot.lane.b32.xlu0 %v3262_v3, %s3162_s13  ;;  %v3308_v14 = vld [vmem:[#allocation4 + $0x78] sm:$0xff]  ;;  %v3310_v15 = vld [vmem:[#allocation4 + $0x68] sm:$0xff]  ;;  %v3414_v21 = vld [vmem:[%s5118_s5] sm:$0xff]  ;;  %vm193_vm2 = vcmp.lt.s32.totalorder %v3398_v18, 15  ;;  %vm242_vm3 = vcmp.lt.s32.totalorder %v3398_v18, 1  ;;  %vm299_vm4 = vcmp.lt.s32.totalorder %v3398_v18, 127 }
  0x3d   :  { %v3408_v20 = vld [vmem:[%s5118_s5 + $0x8] sm:$0xff]  ;;  %v3426_v26 = vrot.slane %v3414_v21, %v106_v19  ;;  %vm348_vm5 = vcmp.lt.s32.totalorder %v3398_v18, 113  ;;  %vm397_vm6 = vcmp.lt.s32.totalorder %v3398_v18, 112  ;;  %vm446_vm7 = vcmp.lt.s32.totalorder %v3398_v18, 111  ;;  %v2045_v18 = vld [vmem:[#allocation9 + $0x40] sm:$0xff] }
  0x3e   :  { %v3417_v24 = vrot.slane %v3408_v20, %v106_v19 }
  0x40   :  { %490 = vrot.lane.b32.xlu1 %v3268_v4, %s3162_s13  ;;  %488 = vrot.lane.b32.xlu0 %v3270_v5, %s3162_s13 }
  0x44   :  { %498 = vrot.lane.b32.xlu1 %v3276_v6, %s3162_s13  ;;  %496 = vrot.lane.b32.xlu0 %v3278_v7, %s3162_s13 }
  0x48   :  { %83 = vrot.lane.b32.xlu1 %v3284_v8, %s3162_s13  ;;  %81 = vrot.lane.b32.xlu0 %v3286_v9, %s3162_s13 }
  0x4c   :  { %91 = vrot.lane.b32.xlu1 %v3292_v10, %s3162_s13  ;;  %89 = vrot.lane.b32.xlu0 %v3294_v11, %s3162_s13 }
  0x50   :  { %494 = vrot.lane.b32.xlu1 %v3300_v12, %s3162_s13  ;;  %492 = vrot.lane.b32.xlu0 %v3302_v13, %s3162_s13 }
  0x54   :  { %502 = vrot.lane.b32.xlu1 %v3308_v14, %s3162_s13  ;;  %500 = vrot.lane.b32.xlu0 %v3310_v15, %s3162_s13 }
  0x58   :  { %130 = vrot.lane.b32.xlu1 %v3262_v3, %s3160_s21  ;;  %128 = vrot.lane.b32.xlu0 %v3254_v1, %s3160_s21 }
  0x5c   :  { %138 = vrot.lane.b32.xlu1 %v3260_v2, %s3160_s21  ;;  %136 = vrot.lane.b32.xlu0 %v3252_v0, %s3160_s21 }
  0x60   :  { %530 = vrot.lane.b32.xlu1 %v3268_v4, %s3160_s21  ;;  %528 = vrot.lane.b32.xlu0 %v3270_v5, %s3160_s21 }
  0x64   :  { %538 = vrot.lane.b32.xlu1 %v3276_v6, %s3160_s21  ;;  %536 = vrot.lane.b32.xlu0 %v3278_v7, %s3160_s21 }
  0x68   :  { %134 = vrot.lane.b32.xlu1 %v3284_v8, %s3160_s21  ;;  %132 = vrot.lane.b32.xlu0 %v3286_v9, %s3160_s21 }
  0x6c   :  { %142 = vrot.lane.b32.xlu1 %v3292_v10, %s3160_s21  ;;  %140 = vrot.lane.b32.xlu0 %v3294_v11, %s3160_s21 }
  0x70   :  { %534 = vrot.lane.b32.xlu1 %v3300_v12, %s3160_s21  ;;  %532 = vrot.lane.b32.xlu0 %v3302_v13, %s3160_s21 }
  0x74   :  { %542 = vrot.lane.b32.xlu1 %v3308_v14, %s3160_s21  ;;  %540 = vrot.lane.b32.xlu0 %v3310_v15, %s3160_s21 }
  0x78   :  { %179 = vrot.lane.b32.xlu1 %v3262_v3, %s3163_s3  ;;  %177 = vrot.lane.b32.xlu0 %v3254_v1, %s3163_s3 }
  0x7c   :  { %187 = vrot.lane.b32.xlu1 %v3260_v2, %s3163_s3  ;;  %185 = vrot.lane.b32.xlu0 %v3252_v0, %s3163_s3 }
  0x80   :  { %570 = vrot.lane.b32.xlu1 %v3268_v4, %s3163_s3  ;;  %568 = vrot.lane.b32.xlu0 %v3270_v5, %s3163_s3 }
  0x84   :  { %578 = vrot.lane.b32.xlu1 %v3276_v6, %s3163_s3  ;;  %576 = vrot.lane.b32.xlu0 %v3278_v7, %s3163_s3 }
  0x88   :  { %183 = vrot.lane.b32.xlu1 %v3284_v8, %s3163_s3  ;;  %181 = vrot.lane.b32.xlu0 %v3286_v9, %s3163_s3 }
  0x8c   :  { %191 = vrot.lane.b32.xlu1 %v3292_v10, %s3163_s3  ;;  %189 = vrot.lane.b32.xlu0 %v3294_v11, %s3163_s3 }
  0x90   :  { %574 = vrot.lane.b32.xlu1 %v3300_v12, %s3163_s3  ;;  %572 = vrot.lane.b32.xlu0 %v3302_v13, %s3163_s3 }
  0x94   :  { %582 = vrot.lane.b32.xlu1 %v3308_v14, %s3163_s3  ;;  %580 = vrot.lane.b32.xlu0 %v3310_v15, %s3163_s3 }
  0x98   :  { %228 = vrot.lane.b32.xlu1 %v3262_v3, %s3164_s7  ;;  %226 = vrot.lane.b32.xlu0 %v3254_v1, %s3164_s7 }
  0x9c   :  { %236 = vrot.lane.b32.xlu1 %v3260_v2, %s3164_s7  ;;  %234 = vrot.lane.b32.xlu0 %v3252_v0, %s3164_s7 }
  0xa0   :  { %610 = vrot.lane.b32.xlu1 %v3268_v4, %s3164_s7  ;;  %608 = vrot.lane.b32.xlu0 %v3270_v5, %s3164_s7 }
  0xa4   :  { %618 = vrot.lane.b32.xlu1 %v3276_v6, %s3164_s7  ;;  %616 = vrot.lane.b32.xlu0 %v3278_v7, %s3164_s7 }
  0xa8   :  { %232 = vrot.lane.b32.xlu1 %v3284_v8, %s3164_s7  ;;  %230 = vrot.lane.b32.xlu0 %v3286_v9, %s3164_s7 }
  0xaa   :  { %v86_v22 = vpop.permute.xlu1 %85  ;;  %v78_v23 = vpop.permute.xlu0 %77 }
  0xab   :  { %v96_v25 = vsel %vm95_vm0, %v78_v23, %v86_v22  ;;  %v100_v27 = vsel %vm95_vm0, %v86_v22, %v78_v23 }
  0xac   :  { %240 = vrot.lane.b32.xlu1 %v3292_v10, %s3164_s7  ;;  %238 = vrot.lane.b32.xlu0 %v3294_v11, %s3164_s7  ;;  %v113_v32 = vmul.f32 %v3417_v24, %v96_v25  ;;  %v112_v34 = vmul.f32 %v3426_v26, %v100_v27 }
  0xae   :  { %v88_v28 = vpop.permute.xlu1 %87  ;;  %v80_v29 = vpop.permute.xlu0 %79 }
  0xaf   :  { %v101_v30 = vsel %vm95_vm0, %v88_v28, %v80_v29  ;;  %v97_v31 = vsel %vm95_vm0, %v80_v29, %v88_v28  ;;  %v155_v28 = vsub.s32 1, %v3392_v17 }
  0xb0   :  { %614 = vrot.lane.b32.xlu1 %v3300_v12, %s3164_s7  ;;  %612 = vrot.lane.b32.xlu0 %v3302_v13, %s3164_s7  ;;  %v115_v33 = vmul.f32 %v3417_v24, %v97_v31  ;;  %v114_v35 = vmul.f32 %v3426_v26, %v101_v30 }
  0xb2   :  { %v491_v36 = vpop.permute.xlu1 %490  ;;  %v489_v37 = vpop.permute.xlu0 %488  ;;  %v2686_v38 = vpack.c.bf16 %v115_v33, %v113_v32  ;;  %v2688_v39 = vpack.c.bf16 %v114_v35, %v112_v34 }
  0xb4   :  { %622 = vrot.lane.b32.xlu1 %v3308_v14, %s3164_s7  ;;  %620 = vrot.lane.b32.xlu0 %v3310_v15, %s3164_s7 }
  0xb5   :  { %2687 = vmatprep.subr.bf16.mxu0 %v2686_v38 }
  0xb6   :  { %2689 = vmatpush1.bf16.msra.mxu0 %v2688_v39  ;;  %v499_v40 = vpop.permute.xlu1 %498  ;;  %v497_v41 = vpop.permute.xlu0 %496 }
  0xb7   :  { %v509_v42 = vsel %vm95_vm0, %v499_v40, %v491_v36  ;;  %v508_v43 = vsel %vm95_vm0, %v497_v41, %v489_v37  ;;  %v504_v44 = vsel %vm95_vm0, %v489_v37, %v497_v41  ;;  %v505_v45 = vsel %vm95_vm0, %v491_v36, %v499_v40 }
  0xb8   :  { %285 = vrot.lane.b32.xlu1 %v3262_v3, %s3165_s17  ;;  %283 = vrot.lane.b32.xlu0 %v3254_v1, %s3165_s17  ;;  %v513_v46 = vmul.f32 %v504_v44, %v3417_v24  ;;  %v515_v47 = vmul.f32 %v505_v45, %v3417_v24  ;;  %v512_v48 = vmul.f32 %v508_v43, %v3426_v26 }
  0xb9   :  { %v514_v49 = vmul.f32 %v509_v42, %v3426_v26  ;;  %v3507_v41 = vrot.slane %v3414_v21, %v155_v28  ;;  %v3510_v42 = vrot.slane %v3408_v20, %v155_v28 }
  0xba   :  { %v84_v50 = vpop.permute.xlu1 %83  ;;  %v82_v51 = vpop.permute.xlu0 %81  ;;  %v2758_v52 = vpack.c.bf16 %v515_v47, %v513_v46 }
  0xbb   :  { %v2760_v53 = vpack.c.bf16 %v514_v49, %v512_v48 }
  0xbc   :  { %293 = vrot.lane.b32.xlu1 %v3260_v2, %s3165_s17  ;;  %291 = vrot.lane.b32.xlu0 %v3252_v0, %s3165_s17 }
  0xbd   :  { %2759 = vmatprep.subr.bf16.mxu1 %v2758_v52 }
  0xbe   :  { %2761 = vmatpush1.bf16.msra.mxu1 %v2760_v53  ;;  %v92_v54 = vpop.permute.xlu1 %91  ;;  %v90_v55 = vpop.permute.xlu0 %89 }
  0xbf   :  { %v99_v56 = vsel %vm95_vm0, %v84_v50, %v92_v54  ;;  %v103_v57 = vsel %vm95_vm0, %v92_v54, %v84_v50  ;;  %v98_v58 = vsel %vm95_vm0, %v82_v51, %v90_v55  ;;  %v102_v59 = vsel %vm95_vm0, %v90_v55, %v82_v51 }
  0xc0   :  { %v118_v60 = vmul.f32 %v3426_v26, %v103_v57  ;;  %v119_v61 = vmul.f32 %v3417_v24, %v99_v56  ;;  %v116_v62 = vmul.f32 %v3426_v26, %v102_v59  ;;  %v117_v63 = vmul.f32 %v3417_v24, %v98_v58  ;;  %658 = vrot.lane.b32.xlu1 %v3268_v4, %s3165_s17 }
  0xc1   :  { %656 = vrot.lane.b32.xlu0 %v3270_v5, %s3165_s17 }
  0xc2   :  { %v495_v16 = vpop.permute.xlu1 %494  ;;  %v493_v19 = vpop.permute.xlu0 %492  ;;  %v2690_v22 = vpack.c.bf16 %v119_v61, %v117_v63  ;;  %v2692_v23 = vpack.c.bf16 %v118_v60, %v116_v62 }
  0xc4   :  { %666 = vrot.lane.b32.xlu1 %v3276_v6, %s3165_s17  ;;  %2691 = vmatprep.subr.bf16.mxu0 %v2690_v22 }
  0xc5   :  { %664 = vrot.lane.b32.xlu0 %v3278_v7, %s3165_s17  ;;  %2693 = vmatpush1.bf16.msra.mxu0 %v2692_v23 }
  0xc6   :  { %v503_v25 = vpop.permute.xlu1 %502  ;;  %v501_v27 = vpop.permute.xlu0 %500 }
  0xc7   :  { %v507_v29 = vsel %vm95_vm0, %v495_v16, %v503_v25  ;;  %v511_v30 = vsel %vm95_vm0, %v503_v25, %v495_v16  ;;  %v506_v31 = vsel %vm95_vm0, %v493_v19, %v501_v27  ;;  %v510_v32 = vsel %vm95_vm0, %v501_v27, %v493_v19 }
  0xc8   :  { %v518_v33 = vmul.f32 %v511_v30, %v3426_v26  ;;  %v519_v34 = vmul.f32 %v507_v29, %v3417_v24  ;;  %v516_v35 = vmul.f32 %v510_v32, %v3426_v26  ;;  %v517_v36 = vmul.f32 %v506_v31, %v3417_v24  ;;  %289 = vrot.lane.b32.xlu1 %v3284_v8, %s3165_s17 }
  0xc9   :  { %287 = vrot.lane.b32.xlu0 %v3286_v9, %s3165_s17 }
  0xca   :  { %v131_v37 = vpop.permute.xlu1 %130  ;;  %v129_v38 = vpop.permute.xlu0 %128  ;;  %v2762_v39 = vpack.c.bf16 %v519_v34, %v517_v36  ;;  %v2764_v40 = vpack.c.bf16 %v518_v33, %v516_v35 }
  0xcc   :  { %297 = vrot.lane.b32.xlu1 %v3292_v10, %s3165_s17  ;;  %2763 = vmatprep.subr.bf16.mxu1 %v2762_v39 }
  0xcd   :  { %295 = vrot.lane.b32.xlu0 %v3294_v11, %s3165_s17  ;;  %2765 = vmatpush1.bf16.msra.mxu1 %v2764_v40 }
  0xce   :  { %v139_v43 = vpop.permute.xlu1 %138  ;;  %v137_v44 = vpop.permute.xlu0 %136 }
  0xcf   :  { %v146_v45 = vsel %vm144_vm1, %v131_v37, %v139_v43  ;;  %v150_v46 = vsel %vm144_vm1, %v139_v43, %v131_v37  ;;  %v145_v47 = vsel %vm144_vm1, %v129_v38, %v137_v44  ;;  %v149_v48 = vsel %vm144_vm1, %v137_v44, %v129_v38 }
  0xd0   :  { %v163_v49 = vmul.f32 %v3507_v41, %v150_v46  ;;  %v164_v50 = vmul.f32 %v3510_v42, %v146_v45  ;;  %v161_v51 = vmul.f32 %v3507_v41, %v149_v48  ;;  %v162_v52 = vmul.f32 %v3510_v42, %v145_v47  ;;  %662 = vrot.lane.b32.xlu1 %v3300_v12, %s3165_s17 }
  0xd1   :  { %660 = vrot.lane.b32.xlu0 %v3302_v13, %s3165_s17  ;;  %v204_v47 = vsub.s32 2, %v3392_v17 }
  0xd2   :  { %v531_v53 = vpop.permute.xlu1 %530  ;;  %v529_v54 = vpop.permute.xlu0 %528  ;;  %v2694_v55 = vpack.c.bf16 %v164_v50, %v162_v52  ;;  %v2696_v56 = vpack.c.bf16 %v163_v49, %v161_v51 }
  0xd4   :  { %670 = vrot.lane.b32.xlu1 %v3308_v14, %s3165_s17  ;;  %2695 = vmatprep.subr.bf16.mxu0 %v2694_v55 }
  0xd5   :  { %668 = vrot.lane.b32.xlu0 %v3310_v15, %s3165_s17  ;;  %2697 = vmatpush1.bf16.msra.mxu0 %v2696_v56 }
  0xd6   :  { %v539_v57 = vpop.permute.xlu1 %538  ;;  %v537_v58 = vpop.permute.xlu0 %536 }
  0xd7   :  { %v545_v59 = vsel %vm144_vm1, %v531_v53, %v539_v57  ;;  %v549_v60 = vsel %vm144_vm1, %v539_v57, %v531_v53  ;;  %v544_v61 = vsel %vm144_vm1, %v529_v54, %v537_v58  ;;  %v548_v62 = vsel %vm144_vm1, %v537_v58, %v529_v54 }
  0xd8   :  { %v554_v63 = vmul.f32 %v549_v60, %v3507_v41  ;;  %v555_v16 = vmul.f32 %v545_v59, %v3510_v42  ;;  %v552_v19 = vmul.f32 %v548_v62, %v3507_v41  ;;  %v553_v22 = vmul.f32 %v544_v61, %v3510_v42  ;;  %334 = vrot.lane.b32.xlu1 %v3262_v3, %s3166_s18 }
  0xd9   :  { %332 = vrot.lane.b32.xlu0 %v3254_v1, %s3166_s18  ;;  %v3595_v60 = vrot.slane %v3414_v21, %v204_v47  ;;  %v3598_v61 = vrot.slane %v3408_v20, %v204_v47 }
  0xda   :  { %v135_v23 = vpop.permute.xlu1 %134  ;;  %v133_v25 = vpop.permute.xlu0 %132  ;;  %v2766_v27 = vpack.c.bf16 %v555_v16, %v553_v22  ;;  %v2768_v28 = vpack.c.bf16 %v554_v63, %v552_v19 }
  0xdc   :  { %342 = vrot.lane.b32.xlu1 %v3260_v2, %s3166_s18  ;;  %2767 = vmatprep.subr.bf16.mxu1 %v2766_v27 }
  0xdd   :  { %340 = vrot.lane.b32.xlu0 %v3252_v0, %s3166_s18  ;;  %2769 = vmatpush1.bf16.msra.mxu1 %v2768_v28 }
  0xde   :  { %v143_v29 = vpop.permute.xlu1 %142  ;;  %v141_v30 = vpop.permute.xlu0 %140 }
  0xdf   :  { %v148_v31 = vsel %vm144_vm1, %v135_v23, %v143_v29  ;;  %v152_v32 = vsel %vm144_vm1, %v143_v29, %v135_v23  ;;  %v147_v33 = vsel %vm144_vm1, %v133_v25, %v141_v30  ;;  %v151_v34 = vsel %vm144_vm1, %v141_v30, %v133_v25 }
  0xe0   :  { %v167_v35 = vmul.f32 %v3507_v41, %v152_v32  ;;  %v168_v36 = vmul.f32 %v3510_v42, %v148_v31  ;;  %v165_v37 = vmul.f32 %v3507_v41, %v151_v34  ;;  %v166_v38 = vmul.f32 %v3510_v42, %v147_v33  ;;  %698 = vrot.lane.b32.xlu1 %v3268_v4, %s3166_s18 }
  0xe1   :  { %696 = vrot.lane.b32.xlu0 %v3270_v5, %s3166_s18 }
  0xe2   :  { %v535_v39 = vpop.permute.xlu1 %534  ;;  %v533_v40 = vpop.permute.xlu0 %532  ;;  %v2698_v43 = vpack.c.bf16 %v168_v36, %v166_v38  ;;  %v2700_v44 = vpack.c.bf16 %v167_v35, %v165_v37 }
  0xe4   :  { %706 = vrot.lane.b32.xlu1 %v3276_v6, %s3166_s18  ;;  %2699 = vmatprep.subr.bf16.mxu0 %v2698_v43 }
  0xe5   :  { %704 = vrot.lane.b32.xlu0 %v3278_v7, %s3166_s18  ;;  %2701 = vmatpush1.bf16.msra.mxu0 %v2700_v44 }
  0xe6   :  { %v543_v45 = vpop.permute.xlu1 %542  ;;  %v541_v46 = vpop.permute.xlu0 %540 }
  0xe7   :  { %v547_v48 = vsel %vm144_vm1, %v535_v39, %v543_v45  ;;  %v551_v49 = vsel %vm144_vm1, %v543_v45, %v535_v39  ;;  %v546_v50 = vsel %vm144_vm1, %v533_v40, %v541_v46  ;;  %v550_v51 = vsel %vm144_vm1, %v541_v46, %v533_v40 }
  0xe8   :  { %v558_v52 = vmul.f32 %v551_v49, %v3507_v41  ;;  %v559_v53 = vmul.f32 %v547_v48, %v3510_v42  ;;  %v556_v54 = vmul.f32 %v550_v51, %v3507_v41  ;;  %v557_v55 = vmul.f32 %v546_v50, %v3510_v42  ;;  %338 = vrot.lane.b32.xlu1 %v3284_v8, %s3166_s18 }
  0xe9   :  { %336 = vrot.lane.b32.xlu0 %v3286_v9, %s3166_s18 }
  0xea   :  { %v180_v56 = vpop.permute.xlu1 %179  ;;  %v178_v57 = vpop.permute.xlu0 %177  ;;  %v2770_v58 = vpack.c.bf16 %v559_v53, %v557_v55  ;;  %v2772_v59 = vpack.c.bf16 %v558_v52, %v556_v54 }
  0xec   :  { %346 = vrot.lane.b32.xlu1 %v3292_v10, %s3166_s18  ;;  %2771 = vmatprep.subr.bf16.mxu1 %v2770_v58 }
  0xed   :  { %344 = vrot.lane.b32.xlu0 %v3294_v11, %s3166_s18  ;;  %2773 = vmatpush1.bf16.msra.mxu1 %v2772_v59 }
  0xee   :  { %v188_v62 = vpop.permute.xlu1 %187  ;;  %v186_v63 = vpop.permute.xlu0 %185 }
  0xef   :  { %v195_v16 = vsel %vm193_vm2, %v180_v56, %v188_v62  ;;  %v199_v19 = vsel %vm193_vm2, %v188_v62, %v180_v56  ;;  %v194_v22 = vsel %vm193_vm2, %v178_v57, %v186_v63  ;;  %v198_v23 = vsel %vm193_vm2, %v186_v63, %v178_v57 }
  0xf0   :  { %v212_v25 = vmul.f32 %v3595_v60, %v199_v19  ;;  %v213_v27 = vmul.f32 %v3598_v61, %v195_v16  ;;  %v210_v28 = vmul.f32 %v3595_v60, %v198_v23  ;;  %v211_v29 = vmul.f32 %v3598_v61, %v194_v22  ;;  %702 = vrot.lane.b32.xlu1 %v3300_v12, %s3166_s18 }
  0xf1   :  { %700 = vrot.lane.b32.xlu0 %v3302_v13, %s3166_s18 }
  0xf2   :  { %v571_v30 = vpop.permute.xlu1 %570  ;;  %v569_v31 = vpop.permute.xlu0 %568  ;;  %v2702_v32 = vpack.c.bf16 %v213_v27, %v211_v29  ;;  %v2704_v33 = vpack.c.bf16 %v212_v25, %v210_v28  ;;  %v253_v25 = vsub.s32 3, %v3392_v17 }
  0xf4   :  { %710 = vrot.lane.b32.xlu1 %v3308_v14, %s3166_s18  ;;  %2703 = vmatprep.subr.bf16.mxu0 %v2702_v32 }
  0xf5   :  { %708 = vrot.lane.b32.xlu0 %v3310_v15, %s3166_s18  ;;  %2705 = vmatpush1.bf16.msra.mxu0 %v2704_v33 }
  0xf6   :  { %v579_v34 = vpop.permute.xlu1 %578  ;;  %v577_v35 = vpop.permute.xlu0 %576 }
  0xf7   :  { %v585_v36 = vsel %vm193_vm2, %v571_v30, %v579_v34  ;;  %v589_v37 = vsel %vm193_vm2, %v579_v34, %v571_v30  ;;  %v584_v38 = vsel %vm193_vm2, %v569_v31, %v577_v35  ;;  %v588_v39 = vsel %vm193_vm2, %v577_v35, %v569_v31 }
  0xf8   :  { %v594_v40 = vmul.f32 %v589_v37, %v3595_v60  ;;  %v595_v43 = vmul.f32 %v585_v36, %v3598_v61  ;;  %v592_v44 = vmul.f32 %v588_v39, %v3595_v60  ;;  %v593_v45 = vmul.f32 %v584_v38, %v3598_v61  ;;  %383 = vrot.lane.b32.xlu1 %v3262_v3, %s3167_s19 }
  0xf9   :  { %381 = vrot.lane.b32.xlu0 %v3254_v1, %s3167_s19  ;;  %v3683_v39 = vrot.slane %v3414_v21, %v253_v25 }
  0xfa   :  { %v184_v46 = vpop.permute.xlu1 %183  ;;  %v182_v47 = vpop.permute.xlu0 %181  ;;  %v2774_v48 = vpack.c.bf16 %v595_v43, %v593_v45  ;;  %v2776_v49 = vpack.c.bf16 %v594_v40, %v592_v44  ;;  %v3686_v40 = vrot.slane %v3408_v20, %v253_v25 }
  0xfc   :  { %391 = vrot.lane.b32.xlu1 %v3260_v2, %s3167_s19  ;;  %2775 = vmatprep.subr.bf16.mxu1 %v2774_v48 }
  0xfd   :  { %389 = vrot.lane.b32.xlu0 %v3252_v0, %s3167_s19  ;;  %2777 = vmatpush1.bf16.msra.mxu1 %v2776_v49 }
  0xfe   :  { %v192_v50 = vpop.permute.xlu1 %191  ;;  %v190_v51 = vpop.permute.xlu0 %189 }
  0xff   :  { %v197_v52 = vsel %vm193_vm2, %v184_v46, %v192_v50  ;;  %v201_v53 = vsel %vm193_vm2, %v192_v50, %v184_v46  ;;  %v196_v54 = vsel %vm193_vm2, %v182_v47, %v190_v51  ;;  %v200_v55 = vsel %vm193_vm2, %v190_v51, %v182_v47 }
 0x100   :  { %v216_v56 = vmul.f32 %v3595_v60, %v201_v53  ;;  %v217_v57 = vmul.f32 %v3598_v61, %v197_v52  ;;  %v214_v58 = vmul.f32 %v3595_v60, %v200_v55  ;;  %v215_v59 = vmul.f32 %v3598_v61, %v196_v54  ;;  %738 = vrot.lane.b32.xlu1 %v3268_v4, %s3167_s19 }
 0x101   :  { %736 = vrot.lane.b32.xlu0 %v3270_v5, %s3167_s19 }
 0x102   :  { %v575_v62 = vpop.permute.xlu1 %574  ;;  %v573_v63 = vpop.permute.xlu0 %572  ;;  %v2706_v16 = vpack.c.bf16 %v217_v57, %v215_v59  ;;  %v2708_v19 = vpack.c.bf16 %v216_v56, %v214_v58  ;;  %v817_v57 = vld [vmem:[#allocation7 + $0x8] sm:$0xff] }
 0x103   :  { %1073 = vmatprep.mubr.f32.mxu0 %v817_v57  ;;  %1251 = vmatprep.mubr.f32.mxu1 %v817_v57 }
 0x104   :  { %746 = vrot.lane.b32.xlu1 %v3276_v6, %s3167_s19  ;;  %2707 = vmatprep.subr.bf16.mxu0 %v2706_v16 }
 0x105   :  { %744 = vrot.lane.b32.xlu0 %v3278_v7, %s3167_s19  ;;  %2709 = vmatpush1.bf16.msra.mxu0 %v2708_v19 }
 0x106   :  { %v583_v22 = vpop.permute.xlu1 %582  ;;  %v581_v23 = vpop.permute.xlu0 %580 }
 0x107   :  { %v587_v27 = vsel %vm193_vm2, %v575_v62, %v583_v22  ;;  %v591_v28 = vsel %vm193_vm2, %v583_v22, %v575_v62  ;;  %v586_v29 = vsel %vm193_vm2, %v573_v63, %v581_v23  ;;  %v590_v30 = vsel %vm193_vm2, %v581_v23, %v573_v63 }
 0x108   :  { %v598_v31 = vmul.f32 %v591_v28, %v3595_v60  ;;  %v599_v32 = vmul.f32 %v587_v27, %v3598_v61  ;;  %v596_v33 = vmul.f32 %v590_v30, %v3595_v60  ;;  %v597_v34 = vmul.f32 %v586_v29, %v3598_v61  ;;  %387 = vrot.lane.b32.xlu1 %v3284_v8, %s3167_s19 }
 0x109   :  { %385 = vrot.lane.b32.xlu0 %v3286_v9, %s3167_s19 }
 0x10a   :  { %v229_v35 = vpop.permute.xlu1 %228  ;;  %v227_v36 = vpop.permute.xlu0 %226  ;;  %v2778_v37 = vpack.c.bf16 %v599_v32, %v597_v34  ;;  %v2780_v38 = vpack.c.bf16 %v598_v31, %v596_v33 }
 0x10c   :  { %395 = vrot.lane.b32.xlu1 %v3292_v10, %s3167_s19  ;;  %2779 = vmatprep.subr.bf16.mxu1 %v2778_v37 }
 0x10d   :  { %393 = vrot.lane.b32.xlu0 %v3294_v11, %s3167_s19  ;;  %2781 = vmatpush1.bf16.msra.mxu1 %v2780_v38 }
 0x10e   :  { %v237_v43 = vpop.permute.xlu1 %236  ;;  %v235_v44 = vpop.permute.xlu0 %234 }
 0x10f   :  { %v244_v45 = vsel %vm242_vm3, %v229_v35, %v237_v43  ;;  %v248_v46 = vsel %vm242_vm3, %v237_v43, %v229_v35  ;;  %v243_v47 = vsel %vm242_vm3, %v227_v36, %v235_v44  ;;  %v247_v48 = vsel %vm242_vm3, %v235_v44, %v227_v36 }
 0x110   :  { %v261_v49 = vmul.f32 %v3683_v39, %v248_v46  ;;  %v262_v50 = vmul.f32 %v3686_v40, %v244_v45  ;;  %v259_v51 = vmul.f32 %v3683_v39, %v247_v48  ;;  %v260_v52 = vmul.f32 %v3686_v40, %v243_v47  ;;  %742 = vrot.lane.b32.xlu1 %v3300_v12, %s3167_s19 }
 0x111   :  { %740 = vrot.lane.b32.xlu0 %v3302_v13, %s3167_s19 }
 0x112   :  { %v611_v53 = vpop.permute.xlu1 %610  ;;  %v609_v54 = vpop.permute.xlu0 %608  ;;  %v2710_v55 = vpack.c.bf16 %v262_v50, %v260_v52  ;;  %v2712_v56 = vpack.c.bf16 %v261_v49, %v259_v51  ;;  %v2718_v50 = vpack.c.bf16 %v3260_v2, %v3252_v0  ;;  %v2720_v51 = vpack.c.bf16 %v3262_v3, %v3254_v1 }
 0x114   :  { %750 = vrot.lane.b32.xlu1 %v3308_v14, %s3167_s19  ;;  %2711 = vmatprep.subr.bf16.mxu0 %v2710_v55  ;;  %v2722_v55 = vpack.c.bf16 %v3292_v10, %v3294_v11 }
 0x115   :  { %748 = vrot.lane.b32.xlu0 %v3310_v15, %s3167_s19  ;;  %2713 = vmatpush1.bf16.msra.mxu0 %v2712_v56 }
 0x116   :  { %v619_v58 = vpop.permute.xlu1 %618  ;;  %v617_v59 = vpop.permute.xlu0 %616 }
 0x117   :  { %v625_v62 = vsel %vm242_vm3, %v611_v53, %v619_v58  ;;  %v629_v63 = vsel %vm242_vm3, %v619_v58, %v611_v53  ;;  %v624_v16 = vsel %vm242_vm3, %v609_v54, %v617_v59  ;;  %v628_v19 = vsel %vm242_vm3, %v617_v59, %v609_v54 }
 0x118   :  { %v634_v22 = vmul.f32 %v629_v63, %v3683_v39  ;;  %v635_v23 = vmul.f32 %v625_v62, %v3686_v40  ;;  %v632_v25 = vmul.f32 %v628_v19, %v3683_v39  ;;  %v633_v27 = vmul.f32 %v624_v16, %v3686_v40  ;;  %432 = vrot.lane.b32.xlu1 %v3262_v3, %s3168_s20 }
 0x119   :  { %430 = vrot.lane.b32.xlu0 %v3254_v1, %s3168_s20  ;;  %v310_v54 = vsub.s32 5, %v3392_v17 }
 0x11a   :  { %v233_v28 = vpop.permute.xlu1 %232  ;;  %v231_v29 = vpop.permute.xlu0 %230  ;;  %v2782_v30 = vpack.c.bf16 %v635_v23, %v633_v27  ;;  %v2784_v31 = vpack.c.bf16 %v634_v22, %v632_v25  ;;  %v2724_v22 = vpack.c.bf16 %v3284_v8, %v3286_v9  ;;  %v2790_v23 = vpack.c.bf16 %v3276_v6, %v3278_v7 }
 0x11b   :  { %v3781_v25 = vrot.slane %v3414_v21, %v310_v54  ;;  %v3784_v27 = vrot.slane %v3408_v20, %v310_v54  ;;  %v3169_v54 = vmov 0  }
 0x11c   :  { %440 = vrot.lane.b32.xlu1 %v3260_v2, %s3168_s20  ;;  %2783 = vmatprep.subr.bf16.mxu1 %v2782_v30 }
 0x11d   :  { %438 = vrot.lane.b32.xlu0 %v3252_v0, %s3168_s20  ;;  %2785 = vmatpush1.bf16.msra.mxu1 %v2784_v31  ;;  %5166 = vst [vmem:[#allocation14_spill] sm:$0xff] %v3781_v25  ;;  %5167 = vst [vmem:[#allocation15_spill] sm:$0xff] %v3784_v27 }
 0x11e   :  { %v241_v32 = vpop.permute.xlu1 %240  ;;  %v239_v33 = vpop.permute.xlu0 %238  ;;  %3055 = vset.pattern.permute.xlu0 %v3169_v54  ;;  %3056 = vset.pattern.permute.xlu1 %v3169_v54 }
 0x11f   :  { %v246_v34 = vsel %vm242_vm3, %v233_v28, %v241_v32  ;;  %v250_v35 = vsel %vm242_vm3, %v241_v32, %v233_v28  ;;  %v245_v36 = vsel %vm242_vm3, %v231_v29, %v239_v33  ;;  %v249_v37 = vsel %vm242_vm3, %v239_v33, %v231_v29 }
 0x120   :  { %v265_v38 = vmul.f32 %v3683_v39, %v250_v35  ;;  %v266_v43 = vmul.f32 %v3686_v40, %v246_v34  ;;  %v263_v44 = vmul.f32 %v3683_v39, %v249_v37  ;;  %v264_v45 = vmul.f32 %v3686_v40, %v245_v36  ;;  %778 = vrot.lane.b32.xlu1 %v3268_v4, %s3168_s20 }
 0x121   :  { %776 = vrot.lane.b32.xlu0 %v3270_v5, %s3168_s20  ;;  %v2796_v35 = vpack.c.bf16 %v3300_v12, %v3302_v13 }
 0x122   :  { %v615_v46 = vpop.permute.xlu1 %614  ;;  %v613_v47 = vpop.permute.xlu0 %612  ;;  %v2714_v48 = vpack.c.bf16 %v266_v43, %v264_v45  ;;  %v2716_v49 = vpack.c.bf16 %v265_v38, %v263_v44 }
 0x124   :  { %786 = vrot.lane.b32.xlu1 %v3276_v6, %s3168_s20  ;;  %2715 = vmatprep.subr.bf16.mxu0 %v2714_v48 }
 0x125   :  { %784 = vrot.lane.b32.xlu0 %v3278_v7, %s3168_s20  ;;  %2717 = vmatpush1.bf16.msra.mxu0 %v2716_v49 }
 0x126   :  { %v623_v52 = vpop.permute.xlu1 %622  ;;  %v621_v53 = vpop.permute.xlu0 %620  ;;  %2719 = vmatprep.subr.bf16.mxu0 %v2718_v50 }
 0x127   :  { %v627_v0 = vsel %vm242_vm3, %v615_v46, %v623_v52  ;;  %v631_v2 = vsel %vm242_vm3, %v623_v52, %v615_v46  ;;  %v626_v56 = vsel %vm242_vm3, %v613_v47, %v621_v53  ;;  %v630_v1 = vsel %vm242_vm3, %v621_v53, %v613_v47  ;;  %v973_v52 = vld [vmem:[%s5115_s2 + $0x8] sm:$0xff] }
 0x128   :  { %v638_v3 = vmul.f32 %v631_v2, %v3683_v39  ;;  %v639_v57 = vmul.f32 %v627_v0, %v3686_v40  ;;  %v636_v58 = vmul.f32 %v630_v1, %v3683_v39  ;;  %v637_v59 = vmul.f32 %v626_v56, %v3686_v40  ;;  %436 = vrot.lane.b32.xlu1 %v3284_v8, %s3168_s20 }
 0x129   :  { %434 = vrot.lane.b32.xlu0 %v3286_v9, %s3168_s20  ;;  %2721 = vmatpush1.bf16.msra.mxu0 %v2720_v51  ;;  %v2792_v8 = vpack.c.bf16 %v3268_v4, %v3270_v5  ;;  %v2794_v9 = vpack.c.bf16 %v3308_v14, %v3310_v15  ;;  %v972_v51 = vld [vmem:[%s5115_s2] sm:$0xff] }
 0x12a   :  { %v286_v62 = vpop.permute.xlu1 %285  ;;  %v284_v63 = vpop.permute.xlu0 %283  ;;  %v2786_v16 = vpack.c.bf16 %v639_v57, %v637_v59  ;;  %v2788_v19 = vpack.c.bf16 %v638_v3, %v636_v58  ;;  %2723 = vmatprep.subr.bf16.mxu0 %v2722_v55  ;;  %v975_v58 = vld [vmem:[%s5115_s2 + $0x18] sm:$0xff] }
 0x12c   :  { %444 = vrot.lane.b32.xlu1 %v3292_v10, %s3168_s20  ;;  %2787 = vmatprep.subr.bf16.mxu1 %v2786_v16 }
 0x12d   :  { %442 = vrot.lane.b32.xlu0 %v3294_v11, %s3168_s20  ;;  %2789 = vmatpush1.bf16.msra.mxu1 %v2788_v19 }
 0x12e   :  { %v294_v6 = vpop.permute.xlu1 %293  ;;  %v292_v7 = vpop.permute.xlu0 %291  ;;  %2725 = vmatpush1.bf16.msra.mxu0 %v2724_v22  ;;  %2791 = vmatprep.subr.bf16.mxu1 %v2790_v23 }
 0x12f   :  { %v301_v10 = vsel %vm299_vm4, %v286_v62, %v294_v6  ;;  %v305_v28 = vsel %vm299_vm4, %v294_v6, %v286_v62  ;;  %v300_v11 = vsel %vm299_vm4, %v284_v63, %v292_v7  ;;  %v304_v29 = vsel %vm299_vm4, %v292_v7, %v284_v63  ;;  %v974_v63 = vld [vmem:[%s5115_s2 + $0x10] sm:$0xff] }
 0x130   :  { %v318_v4 = vmul.f32 %v3781_v25, %v301_v10  ;;  %v319_v5 = vmul.f32 %v3784_v27, %v305_v28  ;;  %v316_v30 = vmul.f32 %v3781_v25, %v300_v11  ;;  %v317_v31 = vmul.f32 %v3784_v27, %v304_v29  ;;  %782 = vrot.lane.b32.xlu1 %v3300_v12, %s3168_s20 }
 0x131   :  { %780 = vrot.lane.b32.xlu0 %v3302_v13, %s3168_s20  ;;  %2793 = vmatpush1.bf16.msra.mxu1 %v2792_v8  ;;  %v359_v10 = vsub.s32 6, %v3392_v17 }
 0x132   :  { %v659_v32 = vpop.permute.xlu1 %658  ;;  %v2726_v33 = vpack.c.bf16 %v319_v5, %v317_v31  ;;  %v2728_v34 = vpack.c.bf16 %v318_v4, %v316_v30  ;;  %2795 = vmatprep.subr.bf16.mxu1 %v2794_v9 }
 0x133   :  { %v657_v36 = vpop.permute.xlu0 %656 }
 0x134   :  { %790 = vrot.lane.b32.xlu1 %v3308_v14, %s3168_s20  ;;  %2727 = vmatprep.subr.bf16.mxu0 %v2726_v33 }
 0x135   :  { %788 = vrot.lane.b32.xlu0 %v3310_v15, %s3168_s20  ;;  %2729 = vmatpush1.bf16.msra.mxu0 %v2728_v34 }
 0x136   :  { %v667_v37 = vpop.permute.xlu1 %666  ;;  %2797 = vmatpush1.bf16.msra.mxu1 %v2796_v35  ;;  %v3865_v35 = vrot.slane %v3414_v21, %v359_v10 }
 0x137   :  { %v673_v38 = vsel %vm299_vm4, %v659_v32, %v667_v37  ;;  %v677_v43 = vsel %vm299_vm4, %v667_v37, %v659_v32  ;;  %v665_v44 = vpop.permute.xlu0 %664 }
 0x138   :  { %v682_v12 = vmul.f32 %v673_v38, %v3781_v25  ;;  %v683_v13 = vmul.f32 %v677_v43, %v3784_v27  ;;  %v672_v14 = vsel %vm299_vm4, %v657_v36, %v665_v44  ;;  %v676_v15 = vsel %vm299_vm4, %v665_v44, %v657_v36  ;;  %983 = vperm.xlu1 %3056, %v973_v52  }
 0x139   :  { %v680_v45 = vmul.f32 %v672_v14, %v3781_v25  ;;  %v681_v46 = vmul.f32 %v676_v15, %v3784_v27  ;;  %978 = vperm.xlu0 %3055, %v972_v51   ;;  %5168 = vst [vmem:[#allocation16_spill] sm:$0xff] %v3865_v35  ;;  %v3868_v36 = vrot.slane %v3408_v20, %v359_v10 }
 0x13a   :  { %v290_v47 = vpop.permute.xlu1 %289 }
 0x13b   :  { %v288_v48 = vpop.permute.xlu0 %287  ;;  %v2798_v49 = vpack.c.bf16 %v683_v13, %v681_v46  ;;  %v2800_v50 = vpack.c.bf16 %v682_v12, %v680_v45  ;;  %5169 = vst [vmem:[#allocation17_spill] sm:$0xff] %v3868_v36 }
 0x13c   :  { %988 = vperm.xlu1 %3056, %v974_v63  }
 0x13d   :  { %2799 = vmatprep.subr.bf16.mxu1 %v2798_v49  ;;  %993 = vperm.xlu0 %3055, %v975_v58  }
 0x13e   :  { %2801 = vmatpush1.bf16.msra.mxu1 %v2800_v50  ;;  %v298_v53 = vpop.permute.xlu1 %297 }
 0x13f   :  { %v303_v55 = vsel %vm299_vm4, %v290_v47, %v298_v53  ;;  %v307_v0 = vsel %vm299_vm4, %v298_v53, %v290_v47  ;;  %v296_v2 = vpop.permute.xlu0 %295 }
 0x140   :  { %v322_v56 = vmul.f32 %v3781_v25, %v303_v55  ;;  %v323_v1 = vmul.f32 %v3784_v27, %v307_v0  ;;  %v302_v3 = vsel %vm299_vm4, %v288_v48, %v296_v2  ;;  %v306_v57 = vsel %vm299_vm4, %v296_v2, %v288_v48 }
 0x141   :  { %v320_v59 = vmul.f32 %v3781_v25, %v302_v3  ;;  %v321_v62 = vmul.f32 %v3784_v27, %v306_v57 }
 0x142   :  { %v663_v16 = vpop.permute.xlu1 %662 }
 0x143   :  { %v661_v19 = vpop.permute.xlu0 %660  ;;  %v2730_v22 = vpack.c.bf16 %v323_v1, %v321_v62  ;;  %v2732_v23 = vpack.c.bf16 %v322_v56, %v320_v59 }
 0x145   :  { %2731 = vmatprep.subr.bf16.mxu0 %v2730_v22 }
 0x146   :  { %2733 = vmatpush1.bf16.msra.mxu0 %v2732_v23  ;;  %v671_v8 = vpop.permute.xlu1 %670 }
 0x147   :  { %v675_v6 = vsel %vm299_vm4, %v663_v16, %v671_v8  ;;  %v679_v7 = vsel %vm299_vm4, %v671_v8, %v663_v16  ;;  %v669_v9 = vpop.permute.xlu0 %668 }
 0x148   :  { %v686_v28 = vmul.f32 %v675_v6, %v3781_v25  ;;  %v687_v11 = vmul.f32 %v679_v7, %v3784_v27  ;;  %v674_v29 = vsel %vm299_vm4, %v661_v19, %v669_v9  ;;  %v678_v4 = vsel %vm299_vm4, %v669_v9, %v661_v19 }
 0x149   :  { %v684_v5 = vmul.f32 %v674_v29, %v3781_v25  ;;  %v685_v30 = vmul.f32 %v678_v4, %v3784_v27 }
 0x14a   :  { %v335_v31 = vpop.permute.xlu1 %334 }
 0x14b   :  { %v333_v32 = vpop.permute.xlu0 %332  ;;  %v2802_v33 = vpack.c.bf16 %v687_v11, %v685_v30  ;;  %v2804_v34 = vpack.c.bf16 %v686_v28, %v684_v5 }
 0x14d   :  { %2803 = vmatprep.subr.bf16.mxu1 %v2802_v33 }
 0x14e   :  { %2805 = vmatpush1.bf16.msra.mxu1 %v2804_v34  ;;  %v343_v37 = vpop.permute.xlu1 %342 }
 0x14f   :  { %v350_v38 = vsel %vm348_vm5, %v335_v31, %v343_v37  ;;  %v354_v43 = vsel %vm348_vm5, %v343_v37, %v335_v31  ;;  %v341_v44 = vpop.permute.xlu0 %340  ;;  %v408_v31 = vsub.s32 7, %v3392_v17  ;;  %v3057_v17 = vld [vmem:[%s5118_s5] sm:$0xff] }
 0x150   :  { %v367_v12 = vmul.f32 %v3865_v35, %v350_v38  ;;  %v368_v13 = vmul.f32 %v3868_v36, %v354_v43  ;;  %v349_v21 = vsel %vm348_vm5, %v333_v32, %v341_v44  ;;  %v353_v20 = vsel %vm348_vm5, %v341_v44, %v333_v32 }
 0x151   :  { %v365_v14 = vmul.f32 %v3865_v35, %v349_v21  ;;  %v366_v15 = vmul.f32 %v3868_v36, %v353_v20  ;;  %v3923_v20 = vrot.slane %v3057_v17, %v408_v31  ;;  %v820_v17 = vld [vmem:[#allocation7 + $0x20] sm:$0xff] }
 0x152   :  { %v699_v45 = vpop.permute.xlu1 %698 }
 0x153   :  { %v697_v46 = vpop.permute.xlu0 %696  ;;  %v2734_v47 = vpack.c.bf16 %v368_v13, %v366_v15  ;;  %v2736_v48 = vpack.c.bf16 %v367_v12, %v365_v14  ;;  %5170 = vst [vmem:[#allocation18_spill] sm:$0xff] %v3923_v20  ;;  %v3058_v14 = vld [vmem:[%s5118_s5 + $0x8] sm:$0xff] }
 0x154   :  { %v3928_v15 = vrot.slane %v3058_v14, %v408_v31 }
 0x155   :  { %2735 = vmatprep.subr.bf16.mxu0 %v2734_v47 }
 0x156   :  { %2737 = vmatpush1.bf16.msra.mxu0 %v2736_v48  ;;  %v707_v49 = vpop.permute.xlu1 %706  ;;  %5171 = vst [vmem:[#allocation19_spill] sm:$0xff] %v3928_v15 }
 0x157   :  { %v713_v50 = vsel %vm348_vm5, %v699_v45, %v707_v49  ;;  %v717_v51 = vsel %vm348_vm5, %v707_v49, %v699_v45  ;;  %v705_v52 = vpop.permute.xlu0 %704 }
 0x158   :  { %v722_v53 = vmul.f32 %v713_v50, %v3865_v35  ;;  %v723_v54 = vmul.f32 %v717_v51, %v3868_v36  ;;  %v712_v55 = vsel %vm348_vm5, %v697_v46, %v705_v52  ;;  %v716_v0 = vsel %vm348_vm5, %v705_v52, %v697_v46 }
 0x159   :  { %v720_v2 = vmul.f32 %v712_v55, %v3865_v35  ;;  %v721_v56 = vmul.f32 %v716_v0, %v3868_v36 }
 0x15a   :  { %v339_v1 = vpop.permute.xlu1 %338 }
 0x15b   :  { %v337_v3 = vpop.permute.xlu0 %336  ;;  %v2806_v57 = vpack.c.bf16 %v723_v54, %v721_v56  ;;  %v2808_v58 = vpack.c.bf16 %v722_v53, %v720_v2 }
 0x15d   :  { %2807 = vmatprep.subr.bf16.mxu1 %v2806_v57 }
 0x15e   :  { %2809 = vmatpush1.bf16.msra.mxu1 %v2808_v58  ;;  %v347_v59 = vpop.permute.xlu1 %346 }
 0x15f   :  { %v352_v62 = vsel %vm348_vm5, %v339_v1, %v347_v59  ;;  %v356_v63 = vsel %vm348_vm5, %v347_v59, %v339_v1  ;;  %v345_v16 = vpop.permute.xlu0 %344 }
 0x160   :  { %v371_v19 = vmul.f32 %v3865_v35, %v352_v62  ;;  %v372_v22 = vmul.f32 %v3868_v36, %v356_v63  ;;  %v351_v23 = vsel %vm348_vm5, %v337_v3, %v345_v16  ;;  %v355_v8 = vsel %vm348_vm5, %v345_v16, %v337_v3 }
 0x161   :  { %v369_v6 = vmul.f32 %v3865_v35, %v351_v23  ;;  %v370_v7 = vmul.f32 %v3868_v36, %v355_v8 }
 0x162   :  { %v703_v9 = vpop.permute.xlu1 %702 }
 0x163   :  { %v701_v10 = vpop.permute.xlu0 %700  ;;  %v2738_v28 = vpack.c.bf16 %v372_v22, %v370_v7  ;;  %v2740_v11 = vpack.c.bf16 %v371_v19, %v369_v6 }
 0x165   :  { %2739 = vmatprep.subr.bf16.mxu0 %v2738_v28 }
 0x166   :  { %2741 = vmatpush1.bf16.msra.mxu0 %v2740_v11  ;;  %v711_v29 = vpop.permute.xlu1 %710 }
 0x167   :  { %v715_v4 = vsel %vm348_vm5, %v703_v9, %v711_v29  ;;  %v719_v5 = vsel %vm348_vm5, %v711_v29, %v703_v9  ;;  %v709_v30 = vpop.permute.xlu0 %708 }
 0x168   :  { %v726_v32 = vmul.f32 %v715_v4, %v3865_v35  ;;  %v727_v33 = vmul.f32 %v719_v5, %v3868_v36  ;;  %v714_v34 = vsel %vm348_vm5, %v701_v10, %v709_v30  ;;  %v718_v37 = vsel %vm348_vm5, %v709_v30, %v701_v10 }
 0x169   :  { %v724_v38 = vmul.f32 %v714_v34, %v3865_v35  ;;  %v725_v43 = vmul.f32 %v718_v37, %v3868_v36 }
 0x16a   :  { %v384_v44 = vpop.permute.xlu1 %383 }
 0x16b   :  { %v382_v12 = vpop.permute.xlu0 %381  ;;  %v2810_v13 = vpack.c.bf16 %v727_v33, %v725_v43  ;;  %v2812_v21 = vpack.c.bf16 %v726_v32, %v724_v38 }
 0x16d   :  { %2811 = vmatprep.subr.bf16.mxu1 %v2810_v13 }
 0x16e   :  { %2813 = vmatpush1.bf16.msra.mxu1 %v2812_v21  ;;  %v392_v45 = vpop.permute.xlu1 %391 }
 0x16f   :  { %v399_v46 = vsel %vm397_vm6, %v384_v44, %v392_v45  ;;  %v403_v47 = vsel %vm397_vm6, %v392_v45, %v384_v44  ;;  %v390_v48 = vpop.permute.xlu0 %389  ;;  %v816_v44 = vld [vmem:[#allocation7] sm:$0xff] }
 0x170   :  { %v416_v49 = vmul.f32 %v3923_v20, %v399_v46  ;;  %v417_v50 = vmul.f32 %v3928_v15, %v403_v47  ;;  %v398_v51 = vsel %vm397_vm6, %v382_v12, %v390_v48  ;;  %v402_v52 = vsel %vm397_vm6, %v390_v48, %v382_v12 }
 0x171   :  { %v414_v53 = vmul.f32 %v3923_v20, %v398_v51  ;;  %v415_v54 = vmul.f32 %v3928_v15, %v402_v52  ;;  %v819_v51 = vld [vmem:[#allocation7 + $0x18] sm:$0xff] }
 0x172   :  { %v739_v55 = vpop.permute.xlu1 %738 }
 0x173   :  { %v737_v0 = vpop.permute.xlu0 %736  ;;  %v2742_v2 = vpack.c.bf16 %v417_v50, %v415_v54  ;;  %v2744_v56 = vpack.c.bf16 %v416_v49, %v414_v53 }
 0x175   :  { %2743 = vmatprep.subr.bf16.mxu0 %v2742_v2  ;;  %v3987_v2 = vld [vmem:[%s5118_s5 + $0x18] ss:$0 sm:$0xff] }
 0x176   :  { %2745 = vmatpush1.bf16.msra.mxu0 %v2744_v56  ;;  %v747_v1 = vpop.permute.xlu1 %746 }
 0x177   :  { %v753_v3 = vsel %vm397_vm6, %v739_v55, %v747_v1  ;;  %v757_v57 = vsel %vm397_vm6, %v747_v1, %v739_v55  ;;  %v745_v58 = vpop.permute.xlu0 %744  ;;  %v823_v55 = vld [vmem:[#allocation7 + $0x38] sm:$0xff]  ;;  %v822_v1 = vld [vmem:[#allocation7 + $0x30] sm:$0xff] }
 0x178   :  { %v762_v59 = vmul.f32 %v753_v3, %v3923_v20  ;;  %v763_v62 = vmul.f32 %v757_v57, %v3928_v15  ;;  %v752_v63 = vsel %vm397_vm6, %v737_v0, %v745_v58  ;;  %v756_v16 = vsel %vm397_vm6, %v745_v58, %v737_v0  ;;  %v3982_v0 = vld [vmem:[%s5118_s5 + $0x10] ss:$0 sm:$0xff] }
 0x179   :  { %v760_v19 = vmul.f32 %v752_v63, %v3923_v20  ;;  %v761_v22 = vmul.f32 %v756_v16, %v3928_v15 }
 0x17a   :  { %v388_v23 = vpop.permute.xlu1 %387 }
 0x17b   :  { %v386_v8 = vpop.permute.xlu0 %385  ;;  %v2814_v6 = vpack.c.bf16 %v763_v62, %v761_v22  ;;  %v2816_v7 = vpack.c.bf16 %v762_v59, %v760_v19  ;;  %v826_v59 = vld [vmem:[#allocation7 + $0x50] sm:$0xff] }
 0x17d   :  { %2815 = vmatprep.subr.bf16.mxu1 %v2814_v6  ;;  %v825_v6 = vld [vmem:[#allocation7 + $0x48] sm:$0xff] }
 0x17e   :  { %2817 = vmatpush1.bf16.msra.mxu1 %v2816_v7  ;;  %v396_v9 = vpop.permute.xlu1 %395 }
 0x17f   :  { %v401_v10 = vsel %vm397_vm6, %v388_v23, %v396_v9  ;;  %v405_v28 = vsel %vm397_vm6, %v396_v9, %v388_v23  ;;  %v394_v11 = vpop.permute.xlu0 %393 }
 0x180   :  { %v420_v29 = vmul.f32 %v3923_v20, %v401_v10  ;;  %v421_v4 = vmul.f32 %v3928_v15, %v405_v28  ;;  %v400_v5 = vsel %vm397_vm6, %v386_v8, %v394_v11  ;;  %v404_v30 = vsel %vm397_vm6, %v394_v11, %v386_v8 }
 0x181   :  { %v418_v31 = vmul.f32 %v3923_v20, %v400_v5  ;;  %v419_v32 = vmul.f32 %v3928_v15, %v404_v30  ;;  %v5120_v5 = vmov 0.0  }
 0x182   :  { %v743_v33 = vpop.permute.xlu1 %742 }
 0x183   :  { %v741_v34 = vpop.permute.xlu0 %740  ;;  %v2746_v37 = vpack.c.bf16 %v421_v4, %v419_v32  ;;  %v2748_v38 = vpack.c.bf16 %v420_v29, %v418_v31 }
 0x185   :  { %2747 = vmatprep.subr.bf16.mxu0 %v2746_v37 }
 0x186   :  { %2749 = vmatpush1.bf16.msra.mxu0 %v2748_v38  ;;  %v751_v43 = vpop.permute.xlu1 %750 }
 0x187   :  { %v755_v12 = vsel %vm397_vm6, %v743_v33, %v751_v43  ;;  %v759_v13 = vsel %vm397_vm6, %v751_v43, %v743_v33  ;;  %v749_v21 = vpop.permute.xlu0 %748 }
 0x188   :  { %v766_v14 = vmul.f32 %v755_v12, %v3923_v20  ;;  %v767_v45 = vmul.f32 %v759_v13, %v3928_v15  ;;  %v754_v46 = vsel %vm397_vm6, %v741_v34, %v749_v21  ;;  %v758_v47 = vsel %vm397_vm6, %v749_v21, %v741_v34 }
 0x189   :  { %v764_v48 = vmul.f32 %v754_v46, %v3923_v20  ;;  %v765_v49 = vmul.f32 %v758_v47, %v3928_v15  ;;  %1074 = vmatmul.mubr.f32.vlgmr.msra.gmra.mrb[0].mxu0 %v816_v44 }
 0x18a   :  { %v433_v50 = vpop.permute.xlu1 %432  ;;  %1079 = vmatprep.mubr.f32.mxu0 %v820_v17 }
 0x18b   :  { %v431_v52 = vpop.permute.xlu0 %430  ;;  %v2818_v53 = vpack.c.bf16 %v767_v45, %v765_v49  ;;  %v2820_v54 = vpack.c.bf16 %v766_v14, %v764_v48 }
 0x18d   :  { %2819 = vmatprep.subr.bf16.mxu1 %v2818_v53  ;;  %1080 = vmatmul.mubr.f32.gmra.mrb[2].mxu0 %v819_v51 }
 0x18e   :  { %2821 = vmatpush1.bf16.msra.mxu1 %v2820_v54  ;;  %v441_v56 = vpop.permute.xlu1 %440  ;;  %1085 = vmatprep.mubr.f32.mxu0 %v823_v55 }
 0x18f   :  { %v448_v3 = vsel %vm446_vm7, %v433_v50, %v441_v56  ;;  %v452_v57 = vsel %vm446_vm7, %v441_v56, %v433_v50  ;;  %v439_v58 = vpop.permute.xlu0 %438  ;;  %v818_v56 = vld [vmem:[#allocation7 + $0x10] sm:$0xff] }
 0x190   :  { %v465_v62 = vmul.f32 %v3982_v0, %v448_v3  ;;  %v466_v63 = vmul.f32 %v3987_v2, %v452_v57  ;;  %v447_v16 = vsel %vm446_vm7, %v431_v52, %v439_v58  ;;  %v451_v19 = vsel %vm446_vm7, %v439_v58, %v431_v52 }
 0x191   :  { %v463_v22 = vmul.f32 %v3982_v0, %v447_v16  ;;  %v464_v23 = vmul.f32 %v3987_v2, %v451_v19  ;;  %1252 = vmatmul.mubr.f32.vlgmr.msra.gmra.mrb[0].mxu1 %v816_v44  ;;  %1086 = vmatmul.mubr.f32.gmra.mrb[4].mxu0 %v822_v1 }
 0x192   :  { %v779_v8 = vpop.permute.xlu1 %778  ;;  %1091 = vmatprep.mubr.f32.mxu0 %v826_v59  ;;  %1257 = vmatprep.mubr.f32.mxu1 %v820_v17 }
 0x193   :  { %v2752_v7 = vpack.c.bf16 %v465_v62, %v463_v22  ;;  %v777_v9 = vpop.permute.xlu0 %776  ;;  %v2750_v10 = vpack.c.bf16 %v466_v63, %v464_v23  ;;  %v821_v22 = vld [vmem:[#allocation7 + $0x28] sm:$0xff] }
 0x195   :  { %2751 = vmatprep.subr.bf16.mxu0 %v2750_v10  ;;  %1092 = vmatmul.mubr.f32.gmra.mrb[6].mxu0 %v825_v6 }
 0x196   :  { %2753 = vmatpush1.bf16.msra.mxu0 %v2752_v7  ;;  %v787_v28 = vpop.permute.xlu1 %786  ;;  %1258 = vmatmul.mubr.f32.gmra.mrb[2].mxu1 %v819_v51 }
 0x197   :  { %v793_v11 = vsel %vm446_vm7, %v779_v8, %v787_v28  ;;  %v797_v29 = vsel %vm446_vm7, %v787_v28, %v779_v8  ;;  %v785_v4 = vpop.permute.xlu0 %784  ;;  %1162 = vmatprep.mubr.f32.mxu0 %v5120_v5  ;;  %1263 = vmatprep.mubr.f32.mxu1 %v823_v55 }
 0x198   :  { %v802_v30 = vmul.f32 %v3982_v0, %v793_v11  ;;  %v803_v31 = vmul.f32 %v3987_v2, %v797_v29  ;;  %v792_v32 = vsel %vm446_vm7, %v777_v9, %v785_v4  ;;  %v796_v33 = vsel %vm446_vm7, %v785_v4, %v777_v9 }
 0x199   :  { %v800_v34 = vmul.f32 %v3982_v0, %v792_v32  ;;  %v801_v37 = vmul.f32 %v3987_v2, %v796_v33 }
 0x19a   :  { %v437_v38 = vpop.permute.xlu1 %436  ;;  %1264 = vmatmul.mubr.f32.gmra.mrb[4].mxu1 %v822_v1 }
 0x19b   :  { %v2824_v43 = vpack.c.bf16 %v802_v30, %v800_v34  ;;  %v435_v44 = vpop.permute.xlu0 %434  ;;  %v2822_v12 = vpack.c.bf16 %v803_v31, %v801_v37  ;;  %1269 = vmatprep.mubr.f32.mxu1 %v826_v59 }
 0x19d   :  { %2823 = vmatprep.subr.bf16.mxu1 %v2822_v12 }
 0x19e   :  { %2825 = vmatpush1.bf16.msra.mxu1 %v2824_v43  ;;  %v445_v13 = vpop.permute.xlu1 %444 }
 0x19f   :  { %v450_v21 = vsel %vm446_vm7, %v437_v38, %v445_v13  ;;  %v454_v17 = vsel %vm446_vm7, %v445_v13, %v437_v38  ;;  %v443_v14 = vpop.permute.xlu0 %442  ;;  %1270 = vmatmul.mubr.f32.gmra.mrb[6].mxu1 %v825_v6  ;;  %v824_v6 = vld [vmem:[#allocation7 + $0x40] sm:$0xff] }
 0x1a0   :  { %v469_v45 = vmul.f32 %v3982_v0, %v450_v21  ;;  %v470_v46 = vmul.f32 %v3987_v2, %v454_v17  ;;  %v449_v47 = vsel %vm446_vm7, %v435_v44, %v443_v14  ;;  %v453_v48 = vsel %vm446_vm7, %v443_v14, %v435_v44  ;;  %1340 = vmatprep.mubr.f32.mxu1 %v5120_v5 }
 0x1a1   :  { %v467_v49 = vmul.f32 %v3982_v0, %v449_v47  ;;  %v468_v50 = vmul.f32 %v3987_v2, %v453_v48 }
 0x1a2   :  { %v783_v51 = vpop.permute.xlu1 %782 }
 0x1a3   :  { %v2756_v52 = vpack.c.bf16 %v469_v45, %v467_v49  ;;  %v781_v53 = vpop.permute.xlu0 %780  ;;  %v2754_v54 = vpack.c.bf16 %v470_v46, %v468_v50 }
 0x1a5   :  { %2755 = vmatprep.subr.bf16.mxu0 %v2754_v54 }
 0x1a6   :  { %2757 = vmatpush1.bf16.msra.mxu0 %v2756_v52  ;;  %v791_v55 = vpop.permute.xlu1 %790 }
 0x1a7   :  { %v795_v1 = vsel %vm446_vm7, %v783_v51, %v791_v55  ;;  %v799_v3 = vsel %vm446_vm7, %v791_v55, %v783_v51  ;;  %v789_v57 = vpop.permute.xlu0 %788 }
 0x1a8   :  { %v806_v58 = vmul.f32 %v3982_v0, %v795_v1  ;;  %v807_v59 = vmul.f32 %v3987_v2, %v799_v3  ;;  %v794_v62 = vsel %vm446_vm7, %v781_v53, %v789_v57  ;;  %v798_v63 = vsel %vm446_vm7, %v789_v57, %v781_v53 }
 0x1a9   :  { %v804_v16 = vmul.f32 %v3982_v0, %v794_v62  ;;  %v805_v19 = vmul.f32 %v3987_v2, %v798_v63  ;;  %2670 = vmatmul.mubr.msk.f32.vlgmr.msra.gmra.mrb[0].mxu0 %vm996_vm8, %v818_v56  ;;  %v827_v0 = vld [vmem:[#allocation7 + $0x58] sm:$0xff] }
 0x1aa   :  { %1168 = vmatprep.mubr.f32.mxu0 %v5120_v5 }
 0x1ab   :  { %v2828_v23 = vpack.c.bf16 %v806_v58, %v804_v16  ;;  %v2826_v8 = vpack.c.bf16 %v807_v59, %v805_v19 }
 0x1ad   :  { %2671 = vmatmul.mubr.msk.f32.gmra.mrb[2].mxu0 %vm996_vm8, %v821_v22  ;;  %2827 = vmatprep.subr.bf16.mxu1 %v2826_v8 }
 0x1ae   :  { %2829 = vmatpush1.bf16.msra.mxu1 %v2828_v23  ;;  %1174 = vmatprep.mubr.f32.mxu0 %v5120_v5 }
 0x1b1   :  { %2672 = vmatmul.mubr.msk.f32.gmra.mrb[4].mxu0 %vm996_vm8, %v824_v6  ;;  %2674 = vmatmul.mubr.msk.f32.vlgmr.msra.gmra.mrb[0].mxu1 %vm996_vm8, %v818_v56 }
 0x1b2   :  { %1180 = vmatprep.mubr.f32.mxu0 %v5120_v5  ;;  %1346 = vmatprep.mubr.f32.mxu1 %v5120_v5 }
 0x1b5   :  { %2673 = vmatmul.mubr.msk.f32.gmra.mrb[6].mxu0 %vm996_vm8, %v827_v0  ;;  %2675 = vmatmul.mubr.msk.f32.gmra.mrb[2].mxu1 %vm996_vm8, %v821_v22 }
 0x1b6   :  { %1352 = vmatprep.mubr.f32.mxu1 %v5120_v5 }
 0x1b7   :  { %v984_v28 = vpop.permute.xlu1 %983 }
 0x1b8   :  { %v979_v2 = vpop.permute.xlu0 %978 }
 0x1b9   :  { %2676 = vmatmul.mubr.msk.f32.gmra.mrb[4].mxu1 %vm996_vm8, %v824_v6 }
 0x1ba   :  { %1358 = vmatprep.mubr.f32.mxu1 %v5120_v5 }
 0x1bb   :  { %v989_v1 = vpop.permute.xlu1 %988 }
 0x1bc   :  { %v994_v57 = vpop.permute.xlu0 %993 }
 0x1bd   :  { %2677 = vmatmul.mubr.msk.f32.gmra.mrb[6].mxu1 %vm996_vm8, %v827_v0 }
 0x27c   :  { %v1164_v7 = vpop.f32.mrb[0].mxu0 }
 0x27d   :  { %v2974_v9 = vadd.f32 %v1164_v7, %v979_v2  ;;  %v1166_v10 = vpop.f32.mrb[1].mxu0 }
 0x27e   :  { %v2975_v49 = vadd.f32 %v1166_v10, %v979_v2 }
 0x27f   :  { %v4053_v11 = vmax.f32 %v2974_v9, 0.0 }
 0x280   :  { %v1170_v29 = vpop.f32.mrb[2].mxu0  ;;  %v4119_v50 = vmax.f32 %v2975_v49, 0.0 }
 0x281   :  { %v2976_v4 = vadd.f32 %v1170_v29, %v984_v28  ;;  %v1172_v30 = vpop.f32.mrb[3].mxu0  ;;  %1381 = vrot.lane.b32.xlu1 %v4053_v11, %s3162_s13 }
 0x282   :  { %v2977_v51 = vadd.f32 %v1172_v30, %v984_v28 }
 0x283   :  { %v4057_v31 = vmax.f32 %v2976_v4, 0.0 }
 0x284   :  { %v4059_v32 = vpop.f32.mrb[4].mxu0  ;;  %v1342_v33 = vpop.f32.mrb[0].mxu1  ;;  %v4125_v53 = vmax.f32 %v2977_v51, 0.0 }
 0x285   :  { %v2982_v34 = vadd.f32 %v1342_v33, %v979_v2  ;;  %v4061_v37 = vpop.f32.mrb[5].mxu0  ;;  %v1344_v38 = vpop.f32.mrb[1].mxu1  ;;  %1383 = vrot.lane.b32.xlu0 %v4057_v31, %s3162_s13  ;;  %v2978_v3 = vadd.f32 %v4059_v32, %v989_v1 }
 0x286   :  { %v2983_v52 = vadd.f32 %v1344_v38, %v979_v2  ;;  %v2979_v7 = vadd.f32 %v4061_v37, %v989_v1 }
 0x287   :  { %v4065_v43 = vmax.f32 %v2982_v34, 0.0  ;;  %v4172_v58 = vmax.f32 %v2978_v3, 0.0 }
 0x288   :  { %v4067_v44 = vpop.f32.mrb[6].mxu0  ;;  %v1348_v12 = vpop.f32.mrb[2].mxu1  ;;  %v4127_v54 = vmax.f32 %v2983_v52, 0.0 }
 0x289   :  { %5172 = vst [vmem:[#allocation20_spill] sm:$0xff] %v4065_v43  ;;  %v2984_v13 = vadd.f32 %v1348_v12, %v984_v28  ;;  %v4069_v21 = vpop.f32.mrb[7].mxu0  ;;  %v1350_v17 = vpop.f32.mrb[3].mxu1  ;;  %1709 = vrot.lane.b32.xlu1 %v4065_v43, %s3162_s13  ;;  %5174 = vst [vmem:[#allocation22_spill] sm:$0xff] %v4172_v58  ;;  %v2980_v59 = vadd.f32 %v4067_v44, %v994_v57 }
 0x28a   :  { %v2985_v55 = vadd.f32 %v1350_v17, %v984_v28  ;;  %v4232_v28 = vmax.f32 %v2979_v7, 0.0  ;;  %v2981_v29 = vadd.f32 %v4069_v21, %v994_v57 }
 0x28b   :  { %v4073_v14 = vmax.f32 %v2984_v13, 0.0  ;;  %v4179_v63 = vmax.f32 %v2980_v59, 0.0 }
 0x28c   :  { %v1354_v45 = vpop.f32.mrb[4].mxu1  ;;  %v4133_v56 = vmax.f32 %v2985_v55, 0.0  ;;  %5178 = vst [vmem:[#allocation26_spill] sm:$0xff] %v4232_v28  ;;  %v4244_v33 = vmax.f32 %v2981_v29, 0.0 }
 0x28d   :  { %5173 = vst [vmem:[#allocation21_spill] sm:$0xff] %v4073_v14  ;;  %v4075_v46 = vpop.f32.mrb[5].mxu1  ;;  %1711 = vrot.lane.b32.xlu0 %v4073_v14, %s3162_s13  ;;  %1421 = vrot.lane.b32.xlu1 %v4053_v11, %s3160_s21  ;;  %v2986_v62 = vadd.f32 %v1354_v45, %v989_v1  ;;  %5175 = vst [vmem:[#allocation23_spill] sm:$0xff] %v4179_v63 }
 0x28e   :  { %v2987_v4 = vadd.f32 %v4075_v46, %v989_v1  ;;  %5179 = vst [vmem:[#allocation27_spill] sm:$0xff] %v4244_v33 }
 0x28f   :  { %v4181_v16 = vmax.f32 %v2986_v62, 0.0 }
 0x290   :  { %v1360_v47 = vpop.f32.mrb[6].mxu1  ;;  %v4246_v34 = vmax.f32 %v2987_v4, 0.0 }
 0x291   :  { %v4081_v48 = vpop.f32.mrb[7].mxu1  ;;  %1423 = vrot.lane.b32.xlu0 %v4057_v31, %s3160_s21  ;;  %1749 = vrot.lane.b32.xlu1 %v4065_v43, %s3160_s21  ;;  %5176 = vst [vmem:[#allocation24_spill] sm:$0xff] %v4181_v16  ;;  %v2988_v19 = vadd.f32 %v1360_v47, %v994_v57 }
 0x292   :  { %v2989_v37 = vadd.f32 %v4081_v48, %v994_v57 }
 0x293   :  { %v4187_v22 = vmax.f32 %v2988_v19, 0.0 }
 0x294   :  { %v4257_v12 = vmax.f32 %v2989_v37, 0.0 }
 0x295   :  { %1751 = vrot.lane.b32.xlu0 %v4073_v14, %s3160_s21  ;;  %1461 = vrot.lane.b32.xlu1 %v4053_v11, %s3163_s3  ;;  %5177 = vst [vmem:[#allocation25_spill] sm:$0xff] %v4187_v22 }
 0x299   :  { %1463 = vrot.lane.b32.xlu0 %v4057_v31, %s3163_s3  ;;  %1789 = vrot.lane.b32.xlu1 %v4065_v43, %s3163_s3 }
 0x29d   :  { %1791 = vrot.lane.b32.xlu0 %v4073_v14, %s3163_s3  ;;  %1501 = vrot.lane.b32.xlu1 %v4053_v11, %s3164_s7 }
 0x2a1   :  { %1503 = vrot.lane.b32.xlu0 %v4057_v31, %s3164_s7  ;;  %1829 = vrot.lane.b32.xlu1 %v4065_v43, %s3164_s7 }
 0x2a5   :  { %1831 = vrot.lane.b32.xlu0 %v4073_v14, %s3164_s7  ;;  %1549 = vrot.lane.b32.xlu1 %v4053_v11, %s3165_s17 }
 0x2a9   :  { %1551 = vrot.lane.b32.xlu0 %v4057_v31, %s3165_s17  ;;  %1877 = vrot.lane.b32.xlu1 %v4065_v43, %s3165_s17 }
 0x2ad   :  { %1879 = vrot.lane.b32.xlu0 %v4073_v14, %s3165_s17  ;;  %1589 = vrot.lane.b32.xlu1 %v4053_v11, %s3166_s18 }
 0x2b1   :  { %1591 = vrot.lane.b32.xlu0 %v4057_v31, %s3166_s18  ;;  %1917 = vrot.lane.b32.xlu1 %v4065_v43, %s3166_s18 }
 0x2b5   :  { %1919 = vrot.lane.b32.xlu0 %v4073_v14, %s3166_s18  ;;  %1389 = vrot.lane.b32.xlu1 %v4119_v50, %s3162_s13 }
 0x2b9   :  { %1391 = vrot.lane.b32.xlu0 %v4125_v53, %s3162_s13  ;;  %1717 = vrot.lane.b32.xlu1 %v4127_v54, %s3162_s13 }
 0x2bd   :  { %1719 = vrot.lane.b32.xlu0 %v4133_v56, %s3162_s13  ;;  %1429 = vrot.lane.b32.xlu1 %v4119_v50, %s3160_s21 }
 0x2c1   :  { %1431 = vrot.lane.b32.xlu0 %v4125_v53, %s3160_s21  ;;  %1757 = vrot.lane.b32.xlu1 %v4127_v54, %s3160_s21 }
 0x2c5   :  { %1759 = vrot.lane.b32.xlu0 %v4133_v56, %s3160_s21  ;;  %1469 = vrot.lane.b32.xlu1 %v4119_v50, %s3163_s3 }
 0x2c9   :  { %1471 = vrot.lane.b32.xlu0 %v4125_v53, %s3163_s3  ;;  %1797 = vrot.lane.b32.xlu1 %v4127_v54, %s3163_s3 }
 0x2cd   :  { %1799 = vrot.lane.b32.xlu0 %v4133_v56, %s3163_s3  ;;  %1509 = vrot.lane.b32.xlu1 %v4119_v50, %s3164_s7 }
 0x2d1   :  { %1511 = vrot.lane.b32.xlu0 %v4125_v53, %s3164_s7  ;;  %1837 = vrot.lane.b32.xlu1 %v4127_v54, %s3164_s7 }
 0x2d5   :  { %1839 = vrot.lane.b32.xlu0 %v4133_v56, %s3164_s7  ;;  %1557 = vrot.lane.b32.xlu1 %v4119_v50, %s3165_s17 }
 0x2d9   :  { %1559 = vrot.lane.b32.xlu0 %v4125_v53, %s3165_s17  ;;  %1885 = vrot.lane.b32.xlu1 %v4127_v54, %s3165_s17 }
 0x2dd   :  { %1887 = vrot.lane.b32.xlu0 %v4133_v56, %s3165_s17  ;;  %1597 = vrot.lane.b32.xlu1 %v4119_v50, %s3166_s18 }
 0x2e1   :  { %1599 = vrot.lane.b32.xlu0 %v4125_v53, %s3166_s18  ;;  %1385 = vrot.lane.b32.xlu1 %v4172_v58, %s3162_s13 }
 0x2e5   :  { %1387 = vrot.lane.b32.xlu0 %v4179_v63, %s3162_s13  ;;  %1713 = vrot.lane.b32.xlu1 %v4181_v16, %s3162_s13 }
 0x2e9   :  { %1715 = vrot.lane.b32.xlu0 %v4187_v22, %s3162_s13  ;;  %1425 = vrot.lane.b32.xlu1 %v4172_v58, %s3160_s21 }
 0x2ed   :  { %1427 = vrot.lane.b32.xlu0 %v4179_v63, %s3160_s21  ;;  %1753 = vrot.lane.b32.xlu1 %v4181_v16, %s3160_s21 }
 0x2f1   :  { %1755 = vrot.lane.b32.xlu0 %v4187_v22, %s3160_s21  ;;  %1465 = vrot.lane.b32.xlu1 %v4172_v58, %s3163_s3 }
 0x2f3   :  { %v1382_v23 = vpop.permute.xlu1 %1381 }
 0x2f5   :  { %1467 = vrot.lane.b32.xlu0 %v4179_v63, %s3163_s3  ;;  %1793 = vrot.lane.b32.xlu1 %v4181_v16, %s3163_s3 }
 0x2f7   :  { %v1384_v8 = vpop.permute.xlu0 %1383 }
 0x2f9   :  { %1795 = vrot.lane.b32.xlu0 %v4187_v22, %s3163_s3  ;;  %1505 = vrot.lane.b32.xlu1 %v4172_v58, %s3164_s7 }
 0x2fb   :  { %v4209_v6 = vpop.permute.xlu1 %1709 }
 0x2fd   :  { %1507 = vrot.lane.b32.xlu0 %v4179_v63, %s3164_s7  ;;  %1833 = vrot.lane.b32.xlu1 %v4181_v16, %s3164_s7 }
 0x2ff   :  { %v4215_v0 = vpop.permute.xlu0 %1711  ;;  %v4217_v2 = vpop.permute.xlu1 %1421 }
 0x301   :  { %1835 = vrot.lane.b32.xlu0 %v4187_v22, %s3164_s7  ;;  %1553 = vrot.lane.b32.xlu1 %v4172_v58, %s3165_s17 }
 0x303   :  { %v4224_v9 = vpop.permute.xlu0 %1423  ;;  %v4226_v10 = vpop.permute.xlu1 %1749 }
 0x305   :  { %1555 = vrot.lane.b32.xlu0 %v4179_v63, %s3165_s17  ;;  %1881 = vrot.lane.b32.xlu1 %v4181_v16, %s3165_s17 }
 0x307   :  { %v4236_v30 = vpop.permute.xlu0 %1751  ;;  %v4238_v32 = vpop.permute.xlu1 %1461 }
 0x309   :  { %1883 = vrot.lane.b32.xlu0 %v4187_v22, %s3165_s17  ;;  %1393 = vrot.lane.b32.xlu1 %v4232_v28, %s3162_s13 }
 0x30b   :  { %v4249_v38 = vpop.permute.xlu0 %1463  ;;  %v4251_v44 = vpop.permute.xlu1 %1789 }
 0x30d   :  { %1395 = vrot.lane.b32.xlu0 %v4244_v33, %s3162_s13  ;;  %1721 = vrot.lane.b32.xlu1 %v4246_v34, %s3162_s13 }
 0x30f   :  { %v4259_v13 = vpop.permute.xlu0 %1791  ;;  %v4261_v21 = vpop.permute.xlu1 %1501 }
 0x311   :  { %1723 = vrot.lane.b32.xlu0 %v4257_v12, %s3162_s13  ;;  %1433 = vrot.lane.b32.xlu1 %v4232_v28, %s3160_s21 }
 0x313   :  { %v4267_v17 = vpop.permute.xlu0 %1503  ;;  %v4269_v45 = vpop.permute.xlu1 %1829 }
 0x315   :  { %1435 = vrot.lane.b32.xlu0 %v4244_v33, %s3160_s21  ;;  %1761 = vrot.lane.b32.xlu1 %v4246_v34, %s3160_s21 }
 0x317   :  { %v4275_v46 = vpop.permute.xlu0 %1831  ;;  %v4277_v47 = vpop.permute.xlu1 %1549 }
 0x319   :  { %1763 = vrot.lane.b32.xlu0 %v4257_v12, %s3160_s21  ;;  %1473 = vrot.lane.b32.xlu1 %v4232_v28, %s3163_s3 }
 0x31b   :  { %v4283_v48 = vpop.permute.xlu0 %1551  ;;  %v4285_v49 = vpop.permute.xlu1 %1877 }
 0x31d   :  { %1475 = vrot.lane.b32.xlu0 %v4244_v33, %s3163_s3  ;;  %1801 = vrot.lane.b32.xlu1 %v4246_v34, %s3163_s3 }
 0x31f   :  { %v4291_v51 = vpop.permute.xlu0 %1879  ;;  %v4293_v52 = vpop.permute.xlu1 %1589 }
 0x321   :  { %1803 = vrot.lane.b32.xlu0 %v4257_v12, %s3163_s3  ;;  %1513 = vrot.lane.b32.xlu1 %v4232_v28, %s3164_s7 }
 0x323   :  { %v4299_v55 = vpop.permute.xlu0 %1591  ;;  %v4301_v1 = vpop.permute.xlu1 %1917 }
 0x324   :  { %5180 = vst [vmem:[#allocation28_spill] sm:$0xff] %v4301_v1 }
 0x325   :  { %1515 = vrot.lane.b32.xlu0 %v4244_v33, %s3164_s7  ;;  %1841 = vrot.lane.b32.xlu1 %v4246_v34, %s3164_s7 }
 0x327   :  { %v4307_v3 = vpop.permute.xlu0 %1919  ;;  %v1390_v57 = vpop.permute.xlu1 %1389 }
 0x328   :  { %5181 = vst [vmem:[#allocation29_spill] sm:$0xff] %v4307_v3  ;;  %v1397_v59 = vsel %vm95_vm0, %v1382_v23, %v1390_v57  ;;  %v1401_v62 = vsel %vm95_vm0, %v1390_v57, %v1382_v23 }
 0x329   :  { %1843 = vrot.lane.b32.xlu0 %v4257_v12, %s3164_s7  ;;  %1561 = vrot.lane.b32.xlu1 %v4232_v28, %s3165_s17  ;;  %v1405_v37 = vmul.f32 %v1401_v62, %v3426_v26  ;;  %v1406_v5 = vmul.f32 %v1397_v59, %v3417_v24 }
 0x32b   :  { %v1392_v19 = vpop.permute.xlu0 %1391  ;;  %v1718_v7 = vpop.permute.xlu1 %1717 }
 0x32c   :  { %v1398_v29 = vsel %vm95_vm0, %v1384_v8, %v1392_v19  ;;  %v1402_v4 = vsel %vm95_vm0, %v1392_v19, %v1384_v8  ;;  %v1725_v23 = vsel %vm95_vm0, %v4209_v6, %v1718_v7  ;;  %v1729_v57 = vsel %vm95_vm0, %v1718_v7, %v4209_v6 }
 0x32d   :  { %v1407_v15 = vmul.f32 %v1402_v4, %v3426_v26  ;;  %v1408_v20 = vmul.f32 %v1398_v29, %v3417_v24  ;;  %1563 = vrot.lane.b32.xlu0 %v4244_v33, %s3165_s17  ;;  %1889 = vrot.lane.b32.xlu1 %v4246_v34, %s3165_s17  ;;  %v1733_v1 = vmul.f32 %v1729_v57, %v3426_v26 }
 0x32e   :  { %v1734_v6 = vmul.f32 %v1725_v23, %v3417_v24 }
 0x32f   :  { %v2832_v8 = vpack.c.bf16 %v1407_v15, %v1405_v37  ;;  %v1720_v59 = vpop.permute.xlu0 %1719  ;;  %v4335_v62 = vpop.permute.xlu1 %1429  ;;  %v2830_v19 = vpack.c.bf16 %v1408_v20, %v1406_v5 }
 0x330   :  { %v1726_v29 = vsel %vm95_vm0, %v4215_v0, %v1720_v59  ;;  %v1730_v4 = vsel %vm95_vm0, %v1720_v59, %v4215_v0 }
 0x331   :  { %v1735_v7 = vmul.f32 %v1730_v4, %v3426_v26  ;;  %v1736_v15 = vmul.f32 %v1726_v29, %v3417_v24  ;;  %1891 = vrot.lane.b32.xlu0 %v4257_v12, %s3165_s17  ;;  %1925 = vrot.lane.b32.xlu1 %v4127_v54, %s3166_s18 }
 0x332   :  { %2831 = vmatprep.subr.bf16.mxu0 %v2830_v19 }
 0x333   :  { %v2904_v20 = vpack.c.bf16 %v1735_v7, %v1733_v1  ;;  %2833 = vmatpush1.bf16.msra.mxu0 %v2832_v8  ;;  %v4351_v5 = vpop.permute.xlu0 %1431  ;;  %v4353_v0 = vpop.permute.xlu1 %1757  ;;  %v2902_v37 = vpack.c.bf16 %v1736_v15, %v1734_v6 }
 0x335   :  { %1927 = vrot.lane.b32.xlu0 %v4133_v56, %s3166_s18  ;;  %1593 = vrot.lane.b32.xlu1 %v4172_v58, %s3166_s18 }
 0x336   :  { %2903 = vmatprep.subr.bf16.mxu1 %v2902_v37 }
 0x337   :  { %2905 = vmatpush1.bf16.msra.mxu1 %v2904_v20  ;;  %v4359_v23 = vpop.permute.xlu0 %1759  ;;  %v4361_v57 = vpop.permute.xlu1 %1469 }
 0x339   :  { %1595 = vrot.lane.b32.xlu0 %v4179_v63, %s3166_s18  ;;  %1601 = vrot.lane.b32.xlu1 %v4232_v28, %s3166_s18 }
 0x33b   :  { %v4367_v1 = vpop.permute.xlu0 %1471  ;;  %v1798_v8 = vpop.permute.xlu1 %1797 }
 0x33c   :  { %v1805_v59 = vsel %vm193_vm2, %v4251_v44, %v1798_v8  ;;  %v1809_v19 = vsel %vm193_vm2, %v1798_v8, %v4251_v44 }
 0x33d   :  { %1603 = vrot.lane.b32.xlu0 %v4244_v33, %s3166_s18  ;;  %1921 = vrot.lane.b32.xlu1 %v4181_v16, %s3166_s18  ;;  %v4386_v15 = vmul.f32 %v1809_v19, %v3595_v60  ;;  %v4389_v20 = vmul.f32 %v1805_v59, %v3598_v61 }
 0x33f   :  { %v1800_v29 = vpop.permute.xlu0 %1799  ;;  %v1510_v4 = vpop.permute.xlu1 %1509  ;;  %5182 = vst [vmem:[#allocation30_spill] sm:$0xff] %v4386_v15 }
 0x340   :  { %v1806_v6 = vsel %vm193_vm2, %v4259_v13, %v1800_v29  ;;  %v1810_v7 = vsel %vm193_vm2, %v1800_v29, %v4259_v13  ;;  %v1517_v8 = vsel %vm242_vm3, %v4261_v21, %v1510_v4  ;;  %v1521_v13 = vsel %vm242_vm3, %v1510_v4, %v4261_v21 }
 0x341   :  { %v4392_v44 = vmul.f32 %v1810_v7, %v3595_v60  ;;  %v4395_v37 = vmul.f32 %v1806_v6, %v3598_v61  ;;  %1923 = vrot.lane.b32.xlu0 %v4187_v22, %s3166_s18  ;;  %1929 = vrot.lane.b32.xlu1 %v4246_v34, %s3166_s18  ;;  %v4418_v21 = vmul.f32 %v1521_v13, %v3683_v39 }
 0x342   :  { %v4421_v4 = vmul.f32 %v1517_v8, %v3686_v40 }
 0x343   :  { %5183 = vst [vmem:[#allocation31_spill] sm:$0xff] %v4392_v44  ;;  %v1512_v19 = vpop.permute.xlu0 %1511  ;;  %v1838_v29 = vpop.permute.xlu1 %1837  ;;  %5184 = vst [vmem:[#allocation32_spill] sm:$0xff] %v4418_v21 }
 0x344   :  { %v1518_v7 = vsel %vm242_vm3, %v4267_v17, %v1512_v19  ;;  %v1522_v3 = vsel %vm242_vm3, %v1512_v19, %v4267_v17  ;;  %v1845_v6 = vsel %vm242_vm3, %v4269_v45, %v1838_v29  ;;  %v1849_v17 = vsel %vm242_vm3, %v1838_v29, %v4269_v45 }
 0x345   :  { %v4424_v59 = vmul.f32 %v1522_v3, %v3683_v39  ;;  %v4427_v15 = vmul.f32 %v1518_v7, %v3686_v40  ;;  %1931 = vrot.lane.b32.xlu0 %v4257_v12, %s3166_s18  ;;  %1629 = vrot.lane.b32.xlu1 %v4053_v11, %s3167_s19  ;;  %v4450_v45 = vmul.f32 %v1849_v17, %v3683_v39 }
 0x346   :  { %v4453_v29 = vmul.f32 %v1845_v6, %v3686_v40 }
 0x347   :  { %5185 = vst [vmem:[#allocation33_spill] sm:$0xff] %v4424_v59  ;;  %v1840_v8 = vpop.permute.xlu0 %1839  ;;  %v1558_v13 = vpop.permute.xlu1 %1557  ;;  %5186 = vst [vmem:[#allocation34_spill] sm:$0xff] %v4450_v45 }
 0x348   :  { %v1846_v7 = vsel %vm242_vm3, %v4275_v46, %v1840_v8  ;;  %v1850_v44 = vsel %vm242_vm3, %v1840_v8, %v4275_v46  ;;  %v1565_v19 = vsel %vm299_vm4, %v4277_v47, %v1558_v13  ;;  %v1569_v46 = vsel %vm299_vm4, %v1558_v13, %v4277_v47 }
 0x349   :  { %v4456_v3 = vmul.f32 %v1850_v44, %v3683_v39  ;;  %v4459_v21 = vmul.f32 %v1846_v7, %v3686_v40  ;;  %1631 = vrot.lane.b32.xlu0 %v4057_v31, %s3167_s19  ;;  %1637 = vrot.lane.b32.xlu1 %v4119_v50, %s3167_s19  ;;  %v4482_v47 = vmul.f32 %v1565_v19, %v3781_v25 }
 0x34a   :  { %v4485_v13 = vmul.f32 %v1569_v46, %v3784_v27 }
 0x34b   :  { %5187 = vst [vmem:[#allocation35_spill] sm:$0xff] %v4456_v3  ;;  %v1560_v6 = vpop.permute.xlu0 %1559  ;;  %v1886_v17 = vpop.permute.xlu1 %1885  ;;  %5188 = vst [vmem:[#allocation36_spill] sm:$0xff] %v4482_v47 }
 0x34c   :  { %v1566_v7 = vsel %vm299_vm4, %v4283_v48, %v1560_v6  ;;  %v1570_v59 = vsel %vm299_vm4, %v1560_v6, %v4283_v48  ;;  %5189 = vst [vmem:[#allocation37_spill] sm:$0xff] %v4485_v13  ;;  %v1893_v8 = vsel %vm299_vm4, %v4285_v49, %v1886_v17  ;;  %v1897_v48 = vsel %vm299_vm4, %v1886_v17, %v4285_v49 }
 0x34d   :  { %v4488_v44 = vmul.f32 %v1566_v7, %v3781_v25  ;;  %v4491_v45 = vmul.f32 %v1570_v59, %v3784_v27  ;;  %1639 = vrot.lane.b32.xlu0 %v4125_v53, %s3167_s19  ;;  %1957 = vrot.lane.b32.xlu1 %v4065_v43, %s3167_s19  ;;  %v4514_v49 = vmul.f32 %v1893_v8, %v3781_v25 }
 0x34e   :  { %v4517_v17 = vmul.f32 %v1897_v48, %v3784_v27 }
 0x34f   :  { %5190 = vst [vmem:[#allocation38_spill] sm:$0xff] %v4488_v44  ;;  %5191 = vst [vmem:[#allocation39_spill] sm:$0xff] %v4491_v45  ;;  %v1888_v46 = vpop.permute.xlu0 %1887  ;;  %v1598_v59 = vpop.permute.xlu1 %1597  ;;  %v1442_v45 = vsel %vm144_vm1, %v4351_v5, %v4224_v9 }
 0x350   :  { %v1894_v7 = vsel %vm299_vm4, %v4291_v51, %v1888_v46  ;;  %v1898_v3 = vsel %vm299_vm4, %v1888_v46, %v4291_v51  ;;  %5192 = vst [vmem:[#allocation40_spill] sm:$0xff] %v4514_v49  ;;  %5193 = vst [vmem:[#allocation41_spill] sm:$0xff] %v4517_v17  ;;  %v1605_v6 = vsel %vm348_vm5, %v4293_v52, %v1598_v59 }
 0x351   :  { %v4520_v19 = vmul.f32 %v1894_v7, %v3781_v25  ;;  %v4523_v47 = vmul.f32 %v1898_v3, %v3784_v27  ;;  %1959 = vrot.lane.b32.xlu0 %v4073_v14, %s3167_s19  ;;  %v1609_v51 = vsel %vm348_vm5, %v1598_v59, %v4293_v52  ;;  %1965 = vrot.lane.b32.xlu1 %v4127_v54, %s3167_s19 }
 0x352   :  { %v4546_v52 = vmul.f32 %v1605_v6, %v3865_v35  ;;  %v4549_v59 = vmul.f32 %v1609_v51, %v3868_v36 }
 0x353   :  { %5194 = vst [vmem:[#allocation42_spill] sm:$0xff] %v4520_v19  ;;  %5195 = vst [vmem:[#allocation43_spill] sm:$0xff] %v4523_v47  ;;  %v1600_v48 = vpop.permute.xlu0 %1599  ;;  %v1386_v3 = vpop.permute.xlu1 %1385 }
 0x354   :  { %v1606_v7 = vsel %vm348_vm5, %v4299_v55, %v1600_v48  ;;  %v1610_v44 = vsel %vm348_vm5, %v1600_v48, %v4299_v55  ;;  %5196 = vst [vmem:[#allocation44_spill] sm:$0xff] %v4546_v52  ;;  %5197 = vst [vmem:[#allocation45_spill] sm:$0xff] %v4549_v59 }
 0x355   :  { %v4552_v8 = vmul.f32 %v1606_v7, %v3865_v35  ;;  %v4555_v49 = vmul.f32 %v1610_v44, %v3868_v36  ;;  %1967 = vrot.lane.b32.xlu0 %v4133_v56, %s3167_s19  ;;  %1633 = vrot.lane.b32.xlu1 %v4172_v58, %s3167_s19 }
 0x357   :  { %5198 = vst [vmem:[#allocation46_spill] sm:$0xff] %v4552_v8  ;;  %5199 = vst [vmem:[#allocation47_spill] sm:$0xff] %v4555_v49  ;;  %v1388_v6 = vpop.permute.xlu0 %1387  ;;  %v4563_v48 = vpop.permute.xlu1 %1713  ;;  %v2038_v8 = vld [vmem:[#allocation9 + $0x8] sm:$0xff] }
 0x358   :  { %2293 = vmatprep.mubr.f32.mxu0 %v2038_v8  ;;  %2471 = vmatprep.mubr.f32.mxu1 %v2038_v8 }
 0x359   :  { %1635 = vrot.lane.b32.xlu0 %v4179_v63, %s3167_s19  ;;  %1641 = vrot.lane.b32.xlu1 %v4232_v28, %s3167_s19 }
 0x35b   :  { %v4571_v44 = vpop.permute.xlu0 %1715  ;;  %v4573_v7 = vpop.permute.xlu1 %1425 }
 0x35d   :  { %1643 = vrot.lane.b32.xlu0 %v4244_v33, %s3167_s19  ;;  %1961 = vrot.lane.b32.xlu1 %v4181_v16, %s3167_s19 }
 0x35f   :  { %v4579_v55 = vpop.permute.xlu0 %1427  ;;  %v4581_v46 = vpop.permute.xlu1 %1753 }
 0x361   :  { %1963 = vrot.lane.b32.xlu0 %v4187_v22, %s3167_s19  ;;  %1969 = vrot.lane.b32.xlu1 %v4246_v34, %s3167_s19 }
 0x363   :  { %v4587_v51 = vpop.permute.xlu0 %1755  ;;  %v4589_v52 = vpop.permute.xlu1 %1465 }
 0x365   :  { %1971 = vrot.lane.b32.xlu0 %v4257_v12, %s3167_s19  ;;  %1669 = vrot.lane.b32.xlu1 %v4053_v11, %s3168_s20 }
 0x367   :  { %v4595_v59 = vpop.permute.xlu0 %1467  ;;  %v4597_v49 = vpop.permute.xlu1 %1793 }
 0x369   :  { %1671 = vrot.lane.b32.xlu0 %v4057_v31, %s3168_s20  ;;  %1677 = vrot.lane.b32.xlu1 %v4119_v50, %s3168_s20 }
 0x36b   :  { %v4603_v35 = vpop.permute.xlu0 %1795  ;;  %v4605_v19 = vpop.permute.xlu1 %1505 }
 0x36d   :  { %1679 = vrot.lane.b32.xlu0 %v4125_v53, %s3168_s20  ;;  %1997 = vrot.lane.b32.xlu1 %v4065_v43, %s3168_s20  ;;  %v1437_v43 = vsel %vm144_vm1, %v4217_v2, %v4335_v62 }
 0x36f   :  { %v4611_v36 = vpop.permute.xlu0 %1507  ;;  %v4613_v17 = vpop.permute.xlu1 %1833 }
 0x371   :  { %1999 = vrot.lane.b32.xlu0 %v4073_v14, %s3168_s20  ;;  %2005 = vrot.lane.b32.xlu1 %v4127_v54, %s3168_s20 }
 0x373   :  { %v4619_v8 = vpop.permute.xlu0 %1835  ;;  %v4621_v47 = vpop.permute.xlu1 %1553 }
 0x374   :  { %5200 = vst [vmem:[#allocation48_spill] sm:$0xff] %v4621_v47 }
 0x375   :  { %2007 = vrot.lane.b32.xlu0 %v4133_v56, %s3168_s20  ;;  %1673 = vrot.lane.b32.xlu1 %v4172_v58, %s3168_s20  ;;  %v4660_v58 = vmul.f32 %v1442_v45, %v3507_v41  ;;  %v1765_v45 = vsel %vm144_vm1, %v4226_v10, %v4353_v0 }
 0x377   :  { %v4627_v25 = vpop.permute.xlu0 %1555  ;;  %v4629_v13 = vpop.permute.xlu1 %1881 }
 0x378   :  { %5201 = vst [vmem:[#allocation49_spill] sm:$0xff] %v4627_v25  ;;  %5202 = vst [vmem:[#allocation50_spill] sm:$0xff] %v4629_v13  ;;  %v1441_v13 = vsel %vm144_vm1, %v4335_v62, %v4217_v2  ;;  %v1446_v62 = vmul.f32 %v1437_v43, %v3510_v42 }
 0x379   :  { %1675 = vrot.lane.b32.xlu0 %v4179_v63, %s3168_s20  ;;  %1681 = vrot.lane.b32.xlu1 %v4232_v28, %s3168_s20  ;;  %v1438_v63 = vsel %vm144_vm1, %v4224_v9, %v4351_v5  ;;  %v4669_v9 = vmul.f32 %v1441_v13, %v3507_v41 }
 0x37a   :  { %v1448_v5 = vmul.f32 %v1438_v63, %v3510_v42 }
 0x37b   :  { %v4639_v27 = vpop.permute.xlu0 %1883  ;;  %v1394_v14 = vpop.permute.xlu1 %1393 }
 0x37c   :  { %5203 = vst [vmem:[#allocation51_spill] sm:$0xff] %v4639_v27  ;;  %v1769_v27 = vsel %vm144_vm1, %v4353_v0, %v4226_v10  ;;  %v1399_v47 = vsel %vm95_vm0, %v1386_v3, %v1394_v14  ;;  %v1403_v2 = vsel %vm95_vm0, %v1394_v14, %v1386_v3  ;;  %v1766_v14 = vsel %vm144_vm1, %v4236_v30, %v4359_v23 }
 0x37d   :  { %1683 = vrot.lane.b32.xlu0 %v4244_v33, %s3168_s20  ;;  %2001 = vrot.lane.b32.xlu1 %v4181_v16, %s3168_s20  ;;  %v4678_v28 = vmul.f32 %v1769_v27, %v3507_v41  ;;  %v1409_v13 = vmul.f32 %v1403_v2, %v3426_v26  ;;  %v1410_v10 = vmul.f32 %v1399_v47, %v3417_v24 }
 0x37e   :  { %v2840_v3 = vpack.c.bf16 %v4660_v58, %v4669_v9  ;;  %v1774_v16 = vmul.f32 %v1765_v45, %v3510_v42  ;;  %v2193_v45 = vld [vmem:[%s5117_s4] sm:$0xff] }
 0x37f   :  { %v1396_v25 = vpop.permute.xlu0 %1395  ;;  %v1722_v33 = vpop.permute.xlu1 %1721 }
 0x380   :  { %v1400_v43 = vsel %vm95_vm0, %v1388_v6, %v1396_v25  ;;  %v1404_v63 = vsel %vm95_vm0, %v1396_v25, %v1388_v6  ;;  %v1727_v25 = vsel %vm95_vm0, %v4563_v48, %v1722_v33  ;;  %v1731_v47 = vsel %vm95_vm0, %v1722_v33, %v4563_v48 }
 0x381   :  { %v1411_v0 = vmul.f32 %v1404_v63, %v3426_v26  ;;  %v1412_v27 = vmul.f32 %v1400_v43, %v3417_v24  ;;  %2003 = vrot.lane.b32.xlu0 %v4187_v22, %s3168_s20  ;;  %2009 = vrot.lane.b32.xlu1 %v4246_v34, %s3168_s20  ;;  %v1770_v6 = vsel %vm144_vm1, %v4359_v23, %v4236_v30 }
 0x382   :  { %v2838_v63 = vpack.c.bf16 %v1448_v5, %v1446_v62  ;;  %v1776_v22 = vmul.f32 %v1766_v14, %v3510_v42  ;;  %v1477_v33 = vsel %vm193_vm2, %v4238_v32, %v4361_v57  ;;  %v1737_v48 = vmul.f32 %v1731_v47, %v3426_v26 }
 0x383   :  { %v2836_v2 = vpack.c.bf16 %v1411_v0, %v1409_v13  ;;  %v1724_v58 = vpop.permute.xlu0 %1723  ;;  %v1434_v9 = vpop.permute.xlu1 %1433  ;;  %v2834_v43 = vpack.c.bf16 %v1412_v27, %v1410_v10  ;;  %v1738_v13 = vmul.f32 %v1727_v25, %v3417_v24  ;;  %v1481_v14 = vsel %vm193_vm2, %v4361_v57, %v4238_v32 }
 0x384   :  { %v1728_v30 = vsel %vm95_vm0, %v4571_v44, %v1724_v58  ;;  %v1732_v23 = vsel %vm95_vm0, %v1724_v58, %v4571_v44  ;;  %v1439_v44 = vsel %vm144_vm1, %v4573_v7, %v1434_v9  ;;  %v1443_v10 = vsel %vm144_vm1, %v1434_v9, %v4573_v7  ;;  %v2195_v7 = vld [vmem:[%s5117_s4 + $0x10] sm:$0xff] }
 0x385   :  { %v1739_v62 = vmul.f32 %v1732_v23, %v3426_v26  ;;  %v1740_v5 = vmul.f32 %v1728_v30, %v3417_v24  ;;  %2011 = vrot.lane.b32.xlu0 %v4257_v12, %s3168_s20  ;;  %2199 = vperm.xlu1 %3056, %v2193_v45   ;;  %v2194_v24 = vld [vmem:[%s5117_s4 + $0x8] sm:$0xff]  ;;  %v1775_v26 = vmul.f32 %v1770_v6, %v3507_v41 }
 0x386   :  { %2835 = vmatprep.subr.bf16.mxu0 %v2834_v43  ;;  %v1478_v32 = vsel %vm193_vm2, %v4249_v38, %v4367_v1  ;;  %v1482_v47 = vsel %vm193_vm2, %v4367_v1, %v4249_v38  ;;  %v2910_v58 = vpack.c.bf16 %v1776_v22, %v1774_v16  ;;  %v1449_v9 = vmul.f32 %v1443_v10, %v3507_v41  ;;  %v2196_v16 = vld [vmem:[%s5117_s4 + $0x18] sm:$0xff] }
 0x387   :  { %v2908_v57 = vpack.c.bf16 %v1739_v62, %v1737_v48  ;;  %2837 = vmatpush1.bf16.msra.mxu0 %v2836_v2  ;;  %v1436_v0 = vpop.permute.xlu0 %1435  ;;  %v1762_v27 = vpop.permute.xlu1 %1761  ;;  %v2906_v25 = vpack.c.bf16 %v1740_v5, %v1738_v13  ;;  %v1450_v45 = vmul.f32 %v1439_v44, %v3510_v42  ;;  %v1488_v38 = vmul.f32 %v1478_v32, %v3598_v61 }
 0x388   :  { %v1440_v6 = vsel %vm144_vm1, %v4579_v55, %v1436_v0  ;;  %v1444_v2 = vsel %vm144_vm1, %v1436_v0, %v4579_v55  ;;  %2839 = vmatprep.subr.bf16.mxu0 %v2838_v63  ;;  %v1767_v1 = vsel %vm144_vm1, %v4581_v46, %v1762_v27  ;;  %v1771_v55 = vsel %vm144_vm1, %v1762_v27, %v4581_v46 }
 0x389   :  { %v1451_v43 = vmul.f32 %v1444_v2, %v3507_v41  ;;  %v1452_v30 = vmul.f32 %v1440_v6, %v3510_v42  ;;  %2204 = vperm.xlu0 %3055, %v2194_v24   ;;  %2209 = vperm.xlu1 %3056, %v2195_v7   ;;  %v1486_v22 = vmul.f32 %v1477_v33, %v3598_v61 }
 0x38a   :  { %2907 = vmatprep.subr.bf16.mxu1 %v2906_v25  ;;  %v2912_v62 = vpack.c.bf16 %v1775_v26, %v4678_v28  ;;  %v1487_v5 = vmul.f32 %v1482_v47, %v3595_v60  ;;  %v1777_v33 = vmul.f32 %v1771_v55, %v3507_v41  ;;  %v1485_v28 = vmul.f32 %v1481_v14, %v3595_v60 }
 0x38b   :  { %v2844_v63 = vpack.c.bf16 %v1451_v43, %v1449_v9  ;;  %2841 = vmatpush1.bf16.msra.mxu0 %v2840_v3  ;;  %2909 = vmatpush1.bf16.msra.mxu1 %v2908_v57  ;;  %v1764_v23 = vpop.permute.xlu0 %1763  ;;  %v1474_v48 = vpop.permute.xlu1 %1473  ;;  %v2842_v13 = vpack.c.bf16 %v1452_v30, %v1450_v45  ;;  %v1778_v3 = vmul.f32 %v1767_v1, %v3510_v42 }
 0x38c   :  { %v1768_v46 = vsel %vm144_vm1, %v4587_v51, %v1764_v23  ;;  %v1772_v44 = vsel %vm144_vm1, %v1764_v23, %v4587_v51  ;;  %2911 = vmatprep.subr.bf16.mxu1 %v2910_v58  ;;  %v1479_v26 = vsel %vm193_vm2, %v4589_v52, %v1474_v48  ;;  %v1483_v51 = vsel %vm193_vm2, %v1474_v48, %v4589_v52 }
 0x38d   :  { %v1779_v10 = vmul.f32 %v1772_v44, %v3507_v41  ;;  %v1780_v24 = vmul.f32 %v1768_v46, %v3510_v42  ;;  %2214 = vperm.xlu0 %3055, %v2196_v16   ;;  %2843 = vmatprep.subr.bf16.mxu0 %v2842_v13  ;;  %v2846_v32 = vpack.c.bf16 %v1488_v38, %v1486_v22 }
 0x38e   :  { %v2848_v42 = vpack.c.bf16 %v1487_v5, %v1485_v28  ;;  %v1489_v52 = vmul.f32 %v1483_v51, %v3595_v60  ;;  %v1490_v25 = vmul.f32 %v1479_v26, %v3598_v61  ;;  %v5204_v1 = vpack.c.bf16 %v4395_v37, %v4389_v20  ;;  %v5205_v20 = vld [vmem:[#allocation31_spill] sm:$0xff]  ;;  %v5206_v37 = vld [vmem:[#allocation30_spill] sm:$0xff] }
 0x38f   :  { %v2916_v57 = vpack.c.bf16 %v1779_v10, %v1777_v33  ;;  %2845 = vmatpush1.bf16.msra.mxu0 %v2844_v63  ;;  %2913 = vmatpush1.bf16.msra.mxu1 %v2912_v62  ;;  %v1476_v0 = vpop.permute.xlu0 %1475  ;;  %v1802_v41 = vpop.permute.xlu1 %1801  ;;  %v2914_v27 = vpack.c.bf16 %v1780_v24, %v1778_v3  ;;  %v5207_v48 = vpack.c.bf16 %v5205_v20, %v5206_v37 }
 0x390   :  { %v1480_v14 = vsel %vm193_vm2, %v4595_v59, %v1476_v0  ;;  %v1484_v7 = vsel %vm193_vm2, %v1476_v0, %v4595_v59  ;;  %2847 = vmatprep.subr.bf16.mxu0 %v2846_v32  ;;  %v1807_v2 = vsel %vm193_vm2, %v4597_v49, %v1802_v41  ;;  %v1811_v58 = vsel %vm193_vm2, %v1802_v41, %v4597_v49 }
 0x391   :  { %v1491_v47 = vmul.f32 %v1484_v7, %v3595_v60  ;;  %v1492_v6 = vmul.f32 %v1480_v14, %v3598_v61  ;;  %2915 = vmatprep.subr.bf16.mxu1 %v2914_v27  ;;  %v1817_v49 = vmul.f32 %v1811_v58, %v3595_v60  ;;  %v1818_v55 = vmul.f32 %v1807_v2, %v3598_v61  ;;  %v5216_v2 = vld [vmem:[#allocation26_spill] sm:$0xff]  ;;  %v5217_v58 = vld [vmem:[#allocation27_spill] sm:$0xff] }
 0x392   :  { %v2862_v7 = vpack.c.bf16 %v4125_v53, %v4119_v50  ;;  %v2866_v50 = vpack.c.bf16 %v5217_v58, %v5216_v2  ;;  %v5218_v53 = vld [vmem:[#allocation49_spill] sm:$0xff] }
 0x393   :  { %v2852_v9 = vpack.c.bf16 %v1491_v47, %v1489_v52  ;;  %2849 = vmatpush1.bf16.msra.mxu0 %v2848_v42  ;;  %2917 = vmatpush1.bf16.msra.mxu1 %v2916_v57  ;;  %v1804_v59 = vpop.permute.xlu0 %1803  ;;  %v1514_v45 = vpop.permute.xlu1 %1513  ;;  %v2850_v43 = vpack.c.bf16 %v1492_v6, %v1490_v25  ;;  %v5213_v25 = vld [vmem:[#allocation35_spill] sm:$0xff] }
 0x394   :  { %v1808_v30 = vsel %vm193_vm2, %v4603_v35, %v1804_v59  ;;  %v1812_v38 = vsel %vm193_vm2, %v1804_v59, %v4603_v35  ;;  %2919 = vmatprep.subr.bf16.mxu1 %v5204_v1  ;;  %v1519_v63 = vsel %vm242_vm3, %v4605_v19, %v1514_v45  ;;  %v1523_v35 = vsel %vm242_vm3, %v1514_v45, %v4605_v19 }
 0x395   :  { %v1819_v16 = vmul.f32 %v1812_v38, %v3595_v60  ;;  %v1820_v22 = vmul.f32 %v1808_v30, %v3598_v61  ;;  %2851 = vmatprep.subr.bf16.mxu0 %v2850_v43  ;;  %v5208_v19 = vpack.c.bf16 %v4427_v15, %v4421_v4  ;;  %v1529_v46 = vmul.f32 %v1523_v35, %v3683_v39  ;;  %v5209_v15 = vld [vmem:[#allocation33_spill] sm:$0xff]  ;;  %v5210_v4 = vld [vmem:[#allocation32_spill] sm:$0xff]  ;;  %v5221_v30 = vld [vmem:[#allocation23_spill] sm:$0xff] }
 0x396   :  { %v1530_v44 = vmul.f32 %v1519_v63, %v3686_v40  ;;  %v5211_v28 = vpack.c.bf16 %v5209_v15, %v5210_v4  ;;  %v5219_v43 = vld [vmem:[#allocation48_spill] sm:$0xff]  ;;  %v5223_v38 = vld [vmem:[#allocation21_spill] sm:$0xff]  ;;  %v5225_v63 = vld [vmem:[#allocation51_spill] sm:$0xff] }
 0x397   :  { %v2924_v23 = vpack.c.bf16 %v1819_v16, %v1817_v49  ;;  %2853 = vmatpush1.bf16.msra.mxu0 %v2852_v9  ;;  %2921 = vmatpush1.bf16.msra.mxu1 %v5207_v48  ;;  %v1516_v13 = vpop.permute.xlu0 %1515  ;;  %v1842_v62 = vpop.permute.xlu1 %1841  ;;  %v2922_v60 = vpack.c.bf16 %v1820_v22, %v1818_v55  ;;  %v5224_v55 = vld [vmem:[#allocation15_spill] sm:$0xff]  ;;  %v2938_v22 = vpack.c.bf16 %v4257_v12, %v4246_v34  ;;  %v5227_v12 = vld [vmem:[#allocation37_spill] sm:$0xff] }
 0x398   :  { %v1520_v61 = vsel %vm242_vm3, %v4611_v36, %v1516_v13  ;;  %v1524_v5 = vsel %vm242_vm3, %v1516_v13, %v4611_v36  ;;  %2855 = vmatprep.subr.bf16.mxu0 %v5208_v19  ;;  %v1847_v10 = vsel %vm242_vm3, %v4613_v17, %v1842_v62  ;;  %v1851_v36 = vsel %vm242_vm3, %v1842_v62, %v4613_v17  ;;  %v5226_v34 = vld [vmem:[#allocation39_spill] sm:$0xff]  ;;  %v5233_v4 = vld [vmem:[#allocation29_spill] sm:$0xff] }
 0x399   :  { %v1531_v33 = vmul.f32 %v1524_v5, %v3683_v39  ;;  %v1532_v3 = vmul.f32 %v1520_v61, %v3686_v40  ;;  %2923 = vmatprep.subr.bf16.mxu1 %v2922_v60  ;;  %v5212_v17 = vpack.c.bf16 %v4459_v21, %v4453_v29  ;;  %v1857_v41 = vmul.f32 %v1851_v36, %v3683_v39  ;;  %v5229_v60 = vld [vmem:[#allocation14_spill] sm:$0xff] }
 0x39a   :  { %v1858_v27 = vmul.f32 %v1847_v10, %v3686_v40  ;;  %v5228_v62 = vpack.c.bf16 %v5226_v34, %v5227_v12  ;;  %v5230_v5 = vld [vmem:[#allocation50_spill] sm:$0xff] }
 0x39b   :  { %v2860_v24 = vpack.c.bf16 %v1531_v33, %v1529_v46  ;;  %2857 = vmatpush1.bf16.msra.mxu0 %v5211_v28  ;;  %2925 = vmatpush1.bf16.msra.mxu1 %v2924_v23  ;;  %v1844_v26 = vpop.permute.xlu0 %1843  ;;  %v1562_v51 = vpop.permute.xlu1 %1561  ;;  %v2858_v32 = vpack.c.bf16 %v1532_v3, %v1530_v44  ;;  %v5231_v46 = vld [vmem:[#allocation24_spill] sm:$0xff]  ;;  %v5232_v44 = vld [vmem:[#allocation25_spill] sm:$0xff] }
 0x39c   :  { %v1848_v57 = vsel %vm242_vm3, %v4619_v8, %v1844_v26  ;;  %v1852_v0 = vsel %vm242_vm3, %v1844_v26, %v4619_v8  ;;  %2927 = vmatprep.subr.bf16.mxu1 %v5212_v17  ;;  %v5214_v8 = vld [vmem:[#allocation34_spill] sm:$0xff]  ;;  %v1567_v20 = vsel %vm299_vm4, %v5219_v43, %v1562_v51  ;;  %v2940_v33 = vpack.c.bf16 %v5232_v44, %v5231_v46  ;;  %v5237_v17 = vld [vmem:[#allocation28_spill] sm:$0xff] }
 0x39d   :  { %v1859_v42 = vmul.f32 %v1852_v0, %v3683_v39  ;;  %v1860_v14 = vmul.f32 %v1848_v57, %v3686_v40  ;;  %2859 = vmatprep.subr.bf16.mxu0 %v2858_v32  ;;  %v5215_v47 = vpack.c.bf16 %v5213_v25, %v5214_v8  ;;  %v2864_v39 = vpack.c.bf16 %v4057_v31, %v4053_v11  ;;  %v5220_v31 = vld [vmem:[#allocation22_spill] sm:$0xff] }
 0x39e   :  { %v2934_v40 = vpack.c.bf16 %v4133_v56, %v4127_v54  ;;  %v1571_v11 = vsel %vm299_vm4, %v1562_v51, %v5219_v43  ;;  %v2868_v54 = vpack.c.bf16 %v5221_v30, %v5220_v31  ;;  %v5222_v56 = vld [vmem:[#allocation20_spill] sm:$0xff]  ;;  %v5234_v26 = vld [vmem:[#allocation38_spill] sm:$0xff] }
 0x39f   :  { %v2932_v52 = vpack.c.bf16 %v1859_v42, %v1857_v41  ;;  %2861 = vmatpush1.bf16.msra.mxu0 %v2860_v24  ;;  %2929 = vmatpush1.bf16.msra.mxu1 %v5215_v47  ;;  %v1564_v21 = vpop.permute.xlu0 %1563  ;;  %v2930_v29 = vpack.c.bf16 %v1860_v14, %v1858_v27  ;;  %v1890_v6 = vpop.permute.xlu1 %1889  ;;  %v2936_v1 = vpack.c.bf16 %v5223_v38, %v5222_v56  ;;  %v5235_v51 = vld [vmem:[#allocation36_spill] sm:$0xff]  ;;  %v5238_v27 = vld [vmem:[#allocation43_spill] sm:$0xff]  ;;  %v5239_v42 = vld [vmem:[#allocation41_spill] sm:$0xff] }
 0x3a0   :  { %2863 = vmatprep.subr.bf16.mxu0 %v2862_v7  ;;  %v1572_v9 = vsel %vm299_vm4, %v1564_v21, %v5218_v53  ;;  %v1568_v49 = vsel %vm299_vm4, %v5218_v53, %v1564_v21  ;;  %v1578_v37 = vmul.f32 %v1571_v11, %v5224_v55  ;;  %v1899_v19 = vsel %vm299_vm4, %v1890_v6, %v5230_v5  ;;  %v5241_v47 = vld [vmem:[#allocation17_spill] sm:$0xff]  ;;  %v5243_v53 = vld [vmem:[#allocation40_spill] sm:$0xff]  ;;  %v5246_v56 = vld [vmem:[#allocation47_spill] sm:$0xff] }
 0x3a1   :  { %2931 = vmatprep.subr.bf16.mxu1 %v2930_v29  ;;  %v1580_v16 = vmul.f32 %v1572_v9, %v5224_v55  ;;  %v1579_v61 = vmul.f32 %v1568_v49, %v5229_v60  ;;  %v1895_v3 = vsel %vm299_vm4, %v5230_v5, %v1890_v6  ;;  %v1577_v24 = vmul.f32 %v1567_v20, %v5229_v60  ;;  %v5245_v43 = vld [vmem:[#allocation16_spill] sm:$0xff] }
 0x3a2   :  { %v5236_v32 = vpack.c.bf16 %v5234_v26, %v5235_v51  ;;  %v1906_v0 = vmul.f32 %v1899_v19, %v5224_v55  ;;  %v5240_v14 = vpack.c.bf16 %v5238_v27, %v5239_v42  ;;  %v1905_v25 = vmul.f32 %v1895_v3, %v5229_v60  ;;  %v5250_v20 = vld [vmem:[#allocation44_spill] sm:$0xff]  ;;  %v5253_v27 = vld [vmem:[#allocation19_spill] sm:$0xff] }
 0x3a3   :  { %2865 = vmatpush1.bf16.msra.mxu0 %v2864_v39  ;;  %2933 = vmatpush1.bf16.msra.mxu1 %v2932_v52  ;;  %v1892_v59 = vpop.permute.xlu0 %1891  ;;  %v1926_v45 = vpop.permute.xlu1 %1925  ;;  %v2874_v36 = vpack.c.bf16 %v1580_v16, %v1578_v37  ;;  %v2876_v52 = vpack.c.bf16 %v1579_v61, %v1577_v24 }
 0x3a4   :  { %2935 = vmatprep.subr.bf16.mxu1 %v2934_v40  ;;  %2867 = vmatprep.subr.bf16.mxu0 %v2866_v50  ;;  %v1900_v35 = vsel %vm299_vm4, %v1892_v59, %v5225_v63  ;;  %v1896_v48 = vsel %vm299_vm4, %v5225_v63, %v1892_v59  ;;  %v1937_v41 = vsel %vm348_vm5, %v1926_v45, %v5237_v17  ;;  %v5242_v50 = vld [vmem:[#allocation42_spill] sm:$0xff] }
 0x3a5   :  { %v1908_v10 = vmul.f32 %v1900_v35, %v5224_v55  ;;  %v1907_v15 = vmul.f32 %v1896_v48, %v5229_v60  ;;  %v1933_v2 = vsel %vm348_vm5, %v5237_v17, %v1926_v45  ;;  %v1942_v58 = vmul.f32 %v1937_v41, %v5241_v47  ;;  %v5247_v45 = vld [vmem:[#allocation45_spill] sm:$0xff]  ;;  %v5252_v17 = vld [vmem:[#allocation18_spill] sm:$0xff] }
 0x3a6   :  { %v5244_v9 = vpack.c.bf16 %v5242_v50, %v5243_v53  ;;  %v5248_v38 = vpack.c.bf16 %v5246_v56, %v5247_v45  ;;  %v1941_v63 = vmul.f32 %v1933_v2, %v5245_v43 }
 0x3a7   :  { %2869 = vmatpush1.bf16.msra.mxu0 %v2868_v54  ;;  %2937 = vmatpush1.bf16.msra.mxu1 %v2936_v1  ;;  %v1928_v23 = vpop.permute.xlu0 %1927  ;;  %v1594_v13 = vpop.permute.xlu1 %1593  ;;  %v2946_v39 = vpack.c.bf16 %v1908_v10, %v1906_v0  ;;  %v2948_v40 = vpack.c.bf16 %v1907_v15, %v1905_v25 }
 0x3a8   :  { %2939 = vmatprep.subr.bf16.mxu1 %v2938_v22  ;;  %2871 = vmatprep.subr.bf16.mxu0 %v5228_v62  ;;  %v1938_v28 = vsel %vm348_vm5, %v1928_v23, %v5233_v4  ;;  %v1934_v8 = vsel %vm348_vm5, %v5233_v4, %v1928_v23  ;;  %v5249_v23 = vld [vmem:[#allocation46_spill] sm:$0xff] }
 0x3a9   :  { %v1944_v21 = vmul.f32 %v1938_v28, %v5241_v47  ;;  %v1943_v11 = vmul.f32 %v1934_v8, %v5245_v43  ;;  %v5251_v37 = vpack.c.bf16 %v5249_v23, %v5250_v20 }
 0x3ab   :  { %2873 = vmatpush1.bf16.msra.mxu0 %v5236_v32  ;;  %2941 = vmatpush1.bf16.msra.mxu1 %v2940_v33  ;;  %v1596_v57 = vpop.permute.xlu0 %1595  ;;  %v1602_v7 = vpop.permute.xlu1 %1601  ;;  %v2950_v22 = vpack.c.bf16 %v1944_v21, %v1942_v58  ;;  %v2952_v12 = vpack.c.bf16 %v1943_v11, %v1941_v63 }
 0x3ac   :  { %2943 = vmatprep.subr.bf16.mxu1 %v5240_v14  ;;  %2875 = vmatprep.subr.bf16.mxu0 %v2874_v36  ;;  %v1607_v29 = vsel %vm348_vm5, %v1594_v13, %v1602_v7  ;;  %v1611_v6 = vsel %vm348_vm5, %v1602_v7, %v1594_v13 }
 0x3ad   :  { %v1617_v1 = vmul.f32 %v1607_v29, %v5245_v43  ;;  %v1618_v49 = vmul.f32 %v1611_v6, %v5241_v47 }
 0x3af   :  { %2877 = vmatpush1.bf16.msra.mxu0 %v2876_v52  ;;  %2945 = vmatpush1.bf16.msra.mxu1 %v5244_v9  ;;  %v1604_v59 = vpop.permute.xlu0 %1603  ;;  %v1922_v54 = vpop.permute.xlu1 %1921 }
 0x3b0   :  { %v1608_v31 = vsel %vm348_vm5, %v1596_v57, %v1604_v59  ;;  %v1612_v30 = vsel %vm348_vm5, %v1604_v59, %v1596_v57  ;;  %2947 = vmatprep.subr.bf16.mxu1 %v2946_v39  ;;  %2879 = vmatprep.subr.bf16.mxu0 %v5248_v38 }
 0x3b1   :  { %v1619_v55 = vmul.f32 %v1608_v31, %v5245_v43  ;;  %v1620_v16 = vmul.f32 %v1612_v30, %v5241_v47 }
 0x3b3   :  { %v2884_v35 = vpack.c.bf16 %v1619_v55, %v1617_v1  ;;  %2881 = vmatpush1.bf16.msra.mxu0 %v5251_v37  ;;  %2949 = vmatpush1.bf16.msra.mxu1 %v2948_v40  ;;  %v1924_v48 = vpop.permute.xlu0 %1923  ;;  %v2882_v13 = vpack.c.bf16 %v1620_v16, %v1618_v49  ;;  %v1930_v34 = vpop.permute.xlu1 %1929 }
 0x3b4   :  { %2951 = vmatprep.subr.bf16.mxu1 %v2950_v22  ;;  %v1935_v62 = vsel %vm348_vm5, %v1922_v54, %v1930_v34  ;;  %v1939_v60 = vsel %vm348_vm5, %v1930_v34, %v1922_v54 }
 0x3b5   :  { %2883 = vmatprep.subr.bf16.mxu0 %v2882_v13  ;;  %v1945_v44 = vmul.f32 %v1935_v62, %v5245_v43  ;;  %v1946_v33 = vmul.f32 %v1939_v60, %v5241_v47  ;;  %v2037_v13 = vld [vmem:[#allocation9] sm:$0xff] }
 0x3b7   :  { %2885 = vmatpush1.bf16.msra.mxu0 %v2884_v35  ;;  %2953 = vmatpush1.bf16.msra.mxu1 %v2952_v12  ;;  %v1932_v61 = vpop.permute.xlu0 %1931  ;;  %v1630_v46 = vpop.permute.xlu1 %1629  ;;  %v2041_v12 = vld [vmem:[#allocation9 + $0x20] sm:$0xff] }
 0x3b8   :  { %v1936_v5 = vsel %vm348_vm5, %v1924_v48, %v1932_v61  ;;  %v1940_v19 = vsel %vm348_vm5, %v1932_v61, %v1924_v48 }
 0x3b9   :  { %v1947_v3 = vmul.f32 %v1936_v5, %v5245_v43  ;;  %v1948_v10 = vmul.f32 %v1940_v19, %v5241_v47 }
 0x3bb   :  { %v2956_v36 = vpack.c.bf16 %v1947_v3, %v1945_v44  ;;  %v1632_v24 = vpop.permute.xlu0 %1631  ;;  %v2954_v15 = vpack.c.bf16 %v1948_v10, %v1946_v33  ;;  %v1638_v4 = vpop.permute.xlu1 %1637  ;;  %v2040_v33 = vld [vmem:[#allocation9 + $0x18] sm:$0xff] }
 0x3bc   :  { %v1645_v28 = vsel %vm397_vm6, %v1630_v46, %v1638_v4  ;;  %v1649_v26 = vsel %vm397_vm6, %v1638_v4, %v1630_v46 }
 0x3bd   :  { %2955 = vmatprep.subr.bf16.mxu1 %v2954_v15  ;;  %v1653_v41 = vmul.f32 %v1645_v28, %v5252_v17  ;;  %v1654_v42 = vmul.f32 %v1649_v26, %v5253_v27  ;;  %v2043_v26 = vld [vmem:[#allocation9 + $0x30] sm:$0xff] }
 0x3be   :  { %2957 = vmatpush1.bf16.msra.mxu1 %v2956_v36 }
 0x3bf   :  { %v1640_v51 = vpop.permute.xlu0 %1639  ;;  %v1958_v0 = vpop.permute.xlu1 %1957 }
 0x3c0   :  { %v1646_v32 = vsel %vm397_vm6, %v1632_v24, %v1640_v51  ;;  %v1650_v57 = vsel %vm397_vm6, %v1640_v51, %v1632_v24  ;;  %v2044_v24 = vld [vmem:[#allocation9 + $0x38] sm:$0xff] }
 0x3c1   :  { %v1655_v14 = vmul.f32 %v1646_v32, %v5252_v17  ;;  %v1656_v7 = vmul.f32 %v1650_v57, %v5253_v27  ;;  %v2047_v32 = vld [vmem:[#allocation9 + $0x50] sm:$0xff] }
 0x3c2   :  { %v5031_v57 = vld [vmem:[%s5118_s5 + $0x10] ss:$0 sm:$0xff] }
 0x3c3   :  { %v2888_v52 = vpack.c.bf16 %v1655_v14, %v1653_v41  ;;  %v1960_v25 = vpop.permute.xlu0 %1959  ;;  %v2886_v8 = vpack.c.bf16 %v1656_v7, %v1654_v42  ;;  %v1966_v47 = vpop.permute.xlu1 %1965  ;;  %v5041_v42 = vld [vmem:[%s5118_s5 + $0x18] ss:$0 sm:$0xff]  ;;  %s3171_s5 = smov [#allocation10]  }
 0x3c4   :  { %v1973_v21 = vsel %vm397_vm6, %v1958_v0, %v1966_v47  ;;  %v1977_v29 = vsel %vm397_vm6, %v1966_v47, %v1958_v0  ;;  %s2655_s23 = sshll.u32 %s3171_s5, 4  ;;  %s2656_s23 = int_to_ptr.vmem [resolvable:$true] %s2655_s23 }
 0x3c5   :  { %2887 = vmatprep.subr.bf16.mxu0 %v2886_v8  ;;  %v1981_v58 = vmul.f32 %v1973_v21, %v5252_v17  ;;  %v1982_v50 = vmul.f32 %v1977_v29, %v5253_v27  ;;  %s3127_s24 = scalar_lea.vmem %s2656_s23, 2048  ;;  %p3132_p11 = scmp.lt.s32.totalorder %s2656_s23, %s2656_s23 }
 0x3c6   :  { %2889 = vmatpush1.bf16.msra.mxu0 %v2888_v52  ;;  %p3128_p10 = scmp.ne.s32.totalorder %s2656_s23, %s3127_s24  ;;  %p3133_p12 = scmp.lt.s32.totalorder %s3127_s24, %s3127_s24 }
 0x3c7   :  { %v1968_v6 = vpop.permute.xlu0 %1967  ;;  %v1634_v2 = vpop.permute.xlu1 %1633 }
 0x3c8   :  { %v1974_v39 = vsel %vm397_vm6, %v1960_v25, %v1968_v6  ;;  %v1978_v40 = vsel %vm397_vm6, %v1968_v6, %v1960_v25  ;;  %v2046_v25 = vld [vmem:[#allocation9 + $0x48] sm:$0xff]  ;;  %p3134_p13 = por %p3133_p12, %p3132_p11 }
 0x3c9   :  { %v1983_v53 = vmul.f32 %v1974_v39, %v5252_v17  ;;  %v1984_v9 = vmul.f32 %v1978_v40, %v5253_v27 }
 0x3ca   :  { %p3135_p0 = pnand %p3134_p13, %p3128_p10 }
 0x3cb   :  { %v2960_v59 = vpack.c.bf16 %v1983_v53, %v1981_v58  ;;  %v1636_v43 = vpop.permute.xlu0 %1635  ;;  %v2958_v11 = vpack.c.bf16 %v1984_v9, %v1982_v50  ;;  %v1642_v31 = vpop.permute.xlu1 %1641 }
 0x3cc   :  { %v1647_v30 = vsel %vm397_vm6, %v1634_v2, %v1642_v31  ;;  %v1651_v54 = vsel %vm397_vm6, %v1642_v31, %v1634_v2  ;;  %v5254_v2 = vmov 0.0  }
 0x3cd   :  { %2959 = vmatprep.subr.bf16.mxu1 %v2958_v11  ;;  %v1657_v49 = vmul.f32 %v1647_v30, %v5252_v17  ;;  %v1658_v55 = vmul.f32 %v1651_v54, %v5253_v27 }
 0x3ce   :  { %2961 = vmatpush1.bf16.msra.mxu1 %v2960_v59 }
 0x3cf   :  { %v1644_v56 = vpop.permute.xlu0 %1643  ;;  %v1962_v1 = vpop.permute.xlu1 %1961 }
 0x3d0   :  { %v1648_v45 = vsel %vm397_vm6, %v1636_v43, %v1644_v56  ;;  %v1652_v38 = vsel %vm397_vm6, %v1644_v56, %v1636_v43 }
 0x3d1   :  { %v1659_v16 = vmul.f32 %v1648_v45, %v5252_v17  ;;  %v1660_v22 = vmul.f32 %v1652_v38, %v5253_v27 }
 0x3d3   :  { %v2892_v63 = vpack.c.bf16 %v1659_v16, %v1657_v49  ;;  %v1964_v35 = vpop.permute.xlu0 %1963  ;;  %v2890_v23 = vpack.c.bf16 %v1660_v22, %v1658_v55  ;;  %v1970_v20 = vpop.permute.xlu1 %1969 }
 0x3d4   :  { %v1975_v37 = vsel %vm397_vm6, %v1962_v1, %v1970_v20  ;;  %v1979_v48 = vsel %vm397_vm6, %v1970_v20, %v1962_v1 }
 0x3d5   :  { %2891 = vmatprep.subr.bf16.mxu0 %v2890_v23  ;;  %v1985_v5 = vmul.f32 %v1975_v37, %v5252_v17  ;;  %v1986_v19 = vmul.f32 %v1979_v48, %v5253_v27 }
 0x3d6   :  { %2893 = vmatpush1.bf16.msra.mxu0 %v2892_v63 }
 0x3d7   :  { %v1972_v34 = vpop.permute.xlu0 %1971  ;;  %v1670_v61 = vpop.permute.xlu1 %1669 }
 0x3d8   :  { %v1976_v62 = vsel %vm397_vm6, %v1964_v35, %v1972_v34  ;;  %v1980_v60 = vsel %vm397_vm6, %v1972_v34, %v1964_v35 }
 0x3d9   :  { %v1987_v46 = vmul.f32 %v1976_v62, %v5252_v17  ;;  %v1988_v44 = vmul.f32 %v1980_v60, %v5253_v27  ;;  %2294 = vmatmul.mubr.f32.vlgmr.msra.gmra.mrb[8].mxu0 %v2037_v13  ;;  %v2039_v62 = vld [vmem:[#allocation9 + $0x10] sm:$0xff] }
 0x3da   :  { %2299 = vmatprep.mubr.f32.mxu0 %v2041_v12 }
 0x3db   :  { %v2964_v3 = vpack.c.bf16 %v1987_v46, %v1985_v5  ;;  %v1672_v10 = vpop.permute.xlu0 %1671  ;;  %v2962_v36 = vpack.c.bf16 %v1988_v44, %v1986_v19  ;;  %v1678_v15 = vpop.permute.xlu1 %1677 }
 0x3dc   :  { %v1685_v4 = vsel %vm446_vm7, %v1670_v61, %v1678_v15  ;;  %v1689_v28 = vsel %vm446_vm7, %v1678_v15, %v1670_v61 }
 0x3dd   :  { %2963 = vmatprep.subr.bf16.mxu1 %v2962_v36  ;;  %2300 = vmatmul.mubr.f32.gmra.mrb[10].mxu0 %v2040_v33  ;;  %v1693_v0 = vmul.f32 %v5031_v57, %v1685_v4  ;;  %v1694_v14 = vmul.f32 %v5041_v42, %v1689_v28  ;;  %v2585_v28 = vld [vmem:[#allocation4] sm:$0xff] }
 0x3de   :  { %2965 = vmatpush1.bf16.msra.mxu1 %v2964_v3  ;;  %2305 = vmatprep.mubr.f32.mxu0 %v2044_v24  ;;  %v2042_v3 = vld [vmem:[#allocation9 + $0x28] sm:$0xff] }
 0x3df   :  { %v1680_v51 = vpop.permute.xlu0 %1679  ;;  %v1998_v27 = vpop.permute.xlu1 %1997 }
 0x3e0   :  { %v1686_v17 = vsel %vm446_vm7, %v1672_v10, %v1680_v51  ;;  %v1690_v41 = vsel %vm446_vm7, %v1680_v51, %v1672_v10 }
 0x3e1   :  { %v1695_v7 = vmul.f32 %v5031_v57, %v1686_v17  ;;  %v1696_v52 = vmul.f32 %v5041_v42, %v1690_v41  ;;  %2472 = vmatmul.mubr.f32.vlgmr.msra.gmra.mrb[8].mxu1 %v2037_v13  ;;  %2306 = vmatmul.mubr.f32.gmra.mrb[12].mxu0 %v2043_v26 }
 0x3e2   :  { %2311 = vmatprep.mubr.f32.mxu0 %v2047_v32  ;;  %2477 = vmatprep.mubr.f32.mxu1 %v2041_v12 }
 0x3e3   :  { %v2896_v8 = vpack.c.bf16 %v1695_v7, %v1693_v0  ;;  %v2000_v47 = vpop.permute.xlu0 %1999  ;;  %v2894_v21 = vpack.c.bf16 %v1696_v52, %v1694_v14  ;;  %v2006_v29 = vpop.permute.xlu1 %2005 }
 0x3e4   :  { %v2013_v6 = vsel %vm446_vm7, %v1998_v27, %v2006_v29  ;;  %v2017_v39 = vsel %vm446_vm7, %v2006_v29, %v1998_v27 }
 0x3e5   :  { %2895 = vmatprep.subr.bf16.mxu0 %v2894_v21  ;;  %2312 = vmatmul.mubr.f32.gmra.mrb[14].mxu0 %v2046_v25  ;;  %v2021_v9 = vmul.f32 %v5031_v57, %v2013_v6  ;;  %v2022_v59 = vmul.f32 %v5041_v42, %v2017_v39 }
 0x3e6   :  { %2897 = vmatpush1.bf16.msra.mxu0 %v2896_v8  ;;  %2478 = vmatmul.mubr.f32.gmra.mrb[10].mxu1 %v2040_v33 }
 0x3e7   :  { %v2008_v40 = vpop.permute.xlu0 %2007  ;;  %2382 = vmatprep.mubr.f32.mxu0 %v5254_v2  ;;  %2483 = vmatprep.mubr.f32.mxu1 %v2044_v24  ;;  %v1674_v53 = vpop.permute.xlu1 %1673  ;;  %v2048_v24 = vld [vmem:[#allocation9 + $0x58] sm:$0xff] }
 0x3e8   :  { %v2014_v58 = vsel %vm446_vm7, %v2000_v47, %v2008_v40  ;;  %v2018_v50 = vsel %vm446_vm7, %v2008_v40, %v2000_v47  ;;  %v2589_v40 = vld [vmem:[#allocation4 + $0x20] sm:$0xff] }
 0x3e9   :  { %v2023_v43 = vmul.f32 %v5031_v57, %v2014_v58  ;;  %v2024_v11 = vmul.f32 %v5041_v42, %v2018_v50  ;;  %v2617_v58 = vld [vmem:[#allocation4 + $0x40] sm:$0xff] }
 0x3ea   :  { %2484 = vmatmul.mubr.f32.gmra.mrb[12].mxu1 %v2043_v26 }
 0x3eb   :  { %v2968_v31 = vpack.c.bf16 %v2023_v43, %v2021_v9  ;;  %v1676_v30 = vpop.permute.xlu0 %1675  ;;  %v2966_v54 = vpack.c.bf16 %v2024_v11, %v2022_v59  ;;  %2489 = vmatprep.mubr.f32.mxu1 %v2047_v32  ;;  %v1682_v56 = vpop.permute.xlu1 %1681  ;;  %v2586_v32 = vld [vmem:[#allocation4 + $0x8] sm:$0xff] }
 0x3ec   :  { %v1687_v45 = vsel %vm446_vm7, %v1674_v53, %v1682_v56  ;;  %v1691_v38 = vsel %vm446_vm7, %v1682_v56, %v1674_v53  ;;  %v2590_v43 = vld [vmem:[#allocation4 + $0x28] sm:$0xff] }
 0x3ed   :  { %2967 = vmatprep.subr.bf16.mxu1 %v2966_v54  ;;  %v1697_v22 = vmul.f32 %v5031_v57, %v1687_v45  ;;  %v1698_v63 = vmul.f32 %v5041_v42, %v1691_v38 }
 0x3ee   :  { %2969 = vmatpush1.bf16.msra.mxu1 %v2968_v31  ;;  %v2618_v31 = vld [vmem:[#allocation4 + $0x48] sm:$0xff] }
 0x3ef   :  { %v1684_v1 = vpop.permute.xlu0 %1683  ;;  %2490 = vmatmul.mubr.f32.gmra.mrb[14].mxu1 %v2046_v25  ;;  %v2002_v16 = vpop.permute.xlu1 %2001  ;;  %v2588_v25 = vld [vmem:[#allocation4 + $0x18] sm:$0xff] }
 0x3f0   :  { %v1688_v49 = vsel %vm446_vm7, %v1676_v30, %v1684_v1  ;;  %v1692_v55 = vsel %vm446_vm7, %v1684_v1, %v1676_v30  ;;  %2560 = vmatprep.mubr.f32.mxu1 %v5254_v2 }
 0x3f1   :  { %v1699_v35 = vmul.f32 %v5031_v57, %v1688_v49  ;;  %v1700_v23 = vmul.f32 %v5041_v42, %v1692_v55 }
 0x3f3   :  { %v2900_v20 = vpack.c.bf16 %v1699_v35, %v1697_v22  ;;  %v2004_v37 = vpop.permute.xlu0 %2003  ;;  %v2898_v48 = vpack.c.bf16 %v1700_v23, %v1698_v63  ;;  %v2010_v13 = vpop.permute.xlu1 %2009  ;;  %v2591_v22 = vld [vmem:[#allocation4 + $0x30] sm:$0xff] }
 0x3f4   :  { %v2015_v34 = vsel %vm446_vm7, %v2002_v16, %v2010_v13  ;;  %v2019_v12 = vsel %vm446_vm7, %v2010_v13, %v2002_v16  ;;  %v2619_v35 = vld [vmem:[#allocation4 + $0x50] sm:$0xff] }
 0x3f5   :  { %2899 = vmatprep.subr.bf16.mxu0 %v2898_v48  ;;  %v2025_v19 = vmul.f32 %v5031_v57, %v2015_v34  ;;  %v2026_v46 = vmul.f32 %v5041_v42, %v2019_v12  ;;  %v2592_v34 = vld [vmem:[#allocation4 + $0x38] sm:$0xff] }
 0x3f6   :  { %2901 = vmatpush1.bf16.msra.mxu0 %v2900_v20 }
 0x3f7   :  { %v2012_v60 = vpop.permute.xlu0 %2011 }
 0x3f8   :  { %v2016_v61 = vsel %vm446_vm7, %v2004_v37, %v2012_v60  ;;  %v2020_v5 = vsel %vm446_vm7, %v2012_v60, %v2004_v37 }
 0x3f9   :  { %v2027_v44 = vmul.f32 %v5031_v57, %v2016_v61  ;;  %v2028_v33 = vmul.f32 %v5041_v42, %v2020_v5  ;;  %2678 = vmatmul.mubr.msk.f32.vlgmr.msra.gmra.mrb[8].mxu0 %vm996_vm8, %v2039_v62  ;;  %v2587_v42 = vld [vmem:[#allocation4 + $0x10] sm:$0xff] }
 0x3fa   :  { %2388 = vmatprep.mubr.f32.mxu0 %v5254_v2 }
 0x3fb   :  { %v2972_v10 = vpack.c.bf16 %v2027_v44, %v2025_v19  ;;  %v2970_v36 = vpack.c.bf16 %v2028_v33, %v2026_v46 }
 0x3fd   :  { %2679 = vmatmul.mubr.msk.f32.gmra.mrb[10].mxu0 %vm996_vm8, %v2042_v3  ;;  %2971 = vmatprep.subr.bf16.mxu1 %v2970_v36  ;;  %v2621_v36 = vld [vmem:[#allocation4 + $0x60] sm:$0xff] }
 0x3fe   :  { %2973 = vmatpush1.bf16.msra.mxu1 %v2972_v10  ;;  %2394 = vmatprep.mubr.f32.mxu0 %v5254_v2 }
 0x401   :  { %2680 = vmatmul.mubr.msk.f32.gmra.mrb[12].mxu0 %vm996_vm8, %v2045_v18  ;;  %2682 = vmatmul.mubr.msk.f32.vlgmr.msra.gmra.mrb[8].mxu1 %vm996_vm8, %v2039_v62  ;;  %v2620_v62 = vld [vmem:[#allocation4 + $0x58] sm:$0xff] }
 0x402   :  { %2566 = vmatprep.mubr.f32.mxu1 %v5254_v2  ;;  %2400 = vmatprep.mubr.f32.mxu0 %v5254_v2 }
 0x404   :  { %v2200_v15 = vpop.permute.xlu1 %2199 }
 0x405   :  { %2681 = vmatmul.mubr.msk.f32.gmra.mrb[14].mxu0 %vm996_vm8, %v2048_v24  ;;  %2683 = vmatmul.mubr.msk.f32.gmra.mrb[10].mxu1 %vm996_vm8, %v2042_v3 }
 0x406   :  { %2572 = vmatprep.mubr.f32.mxu1 %v5254_v2 }
 0x408   :  { %v2205_v17 = vpop.permute.xlu0 %2204  ;;  %v2210_v21 = vpop.permute.xlu1 %2209 }
 0x409   :  { %2684 = vmatmul.mubr.msk.f32.gmra.mrb[12].mxu1 %vm996_vm8, %v2045_v18 }
 0x40a   :  { %2578 = vmatprep.mubr.f32.mxu1 %v5254_v2 }
 0x40c   :  { %v2215_v45 = vpop.permute.xlu0 %2214 }
 0x40d   :  { %2685 = vmatmul.mubr.msk.f32.gmra.mrb[14].mxu1 %vm996_vm8, %v2048_v24 }
 0x4cc   :  { %v2384_v4 = vpop.f32.mrb[8].mxu0 }
 0x4cd   :  { %v2990_v26 = vadd.f32 %v2384_v4, %v2200_v15  ;;  %v2386_v51 = vpop.f32.mrb[9].mxu0 }
 0x4ce   :  { %v2991_v57 = vadd.f32 %v2386_v51, %v2200_v15 }
 0x4cf   :  { %v2593_v0 = vadd.f32 %v2990_v26, %v2585_v28  ;;  %v2622_v28 = vld [vmem:[#allocation4 + $0x68] sm:$0xff] }
 0x4d0   :  { %v2594_v41 = vadd.f32 %v2991_v57, %v2586_v32  ;;  %v2390_v27 = vpop.f32.mrb[10].mxu0 }
 0x4d1   :  { %v2601_v14 = vmax.f32 %v2593_v0, 0.0  ;;  %v2992_v7 = vadd.f32 %v2390_v27, %v2205_v17  ;;  %v2392_v52 = vpop.f32.mrb[11].mxu0 }
 0x4d2   :  { %v2602_v8 = vmax.f32 %v2594_v41, 0.0  ;;  %v2993_v47 = vadd.f32 %v2392_v52, %v2205_v17  ;;  %v2623_v41 = vld [vmem:[#allocation4 + $0x70] sm:$0xff] }
 0x4d3   :  { %2609 = vst [vmem:[#allocation10] sm:$0xff] %v2601_v14  ;;  %v2595_v29 = vadd.f32 %v2992_v7, %v2587_v42  ;;  %v2624_v7 = vld [vmem:[#allocation4 + $0x78] sm:$0xff] }
 0x4d4   :  { %2610 = vst [vmem:[#allocation10 + $0x8] sm:$0xff] %v2602_v8  ;;  %v2596_v6 = vadd.f32 %v2993_v47, %v2588_v25  ;;  %v2396_v39 = vpop.f32.mrb[12].mxu0  ;;  %v2562_v2 = vpop.f32.mrb[8].mxu1 }
 0x4d5   :  { %v2603_v50 = vmax.f32 %v2595_v29, 0.0  ;;  %v2994_v53 = vadd.f32 %v2396_v39, %v2210_v21  ;;  %v2998_v9 = vadd.f32 %v2562_v2, %v2200_v15  ;;  %v2398_v59 = vpop.f32.mrb[13].mxu0  ;;  %v2564_v11 = vpop.f32.mrb[9].mxu1 }
 0x4d6   :  { %v2604_v30 = vmax.f32 %v2596_v6, 0.0  ;;  %v2995_v54 = vadd.f32 %v2398_v59, %v2210_v21  ;;  %v2999_v56 = vadd.f32 %v2564_v11, %v2200_v15 }
 0x4d7   :  { %2611 = vst [vmem:[#allocation10 + $0x10] sm:$0xff] %v2603_v50  ;;  %v2597_v38 = vadd.f32 %v2994_v53, %v2589_v40  ;;  %v2625_v1 = vadd.f32 %v2998_v9, %v2617_v58 }
 0x4d8   :  { %2612 = vst [vmem:[#allocation10 + $0x18] sm:$0xff] %v2604_v30  ;;  %v2598_v49 = vadd.f32 %v2995_v54, %v2590_v43  ;;  %v2626_v55 = vadd.f32 %v2999_v56, %v2618_v31  ;;  %v2402_v16 = vpop.f32.mrb[14].mxu0  ;;  %v2568_v63 = vpop.f32.mrb[10].mxu1 }
 0x4d9   :  { %v2605_v23 = vmax.f32 %v2597_v38, 0.0  ;;  %v2633_v20 = vmax.f32 %v2625_v1, 0.0  ;;  %v2996_v37 = vadd.f32 %v2402_v16, %v2215_v45  ;;  %v3000_v48 = vadd.f32 %v2568_v63, %v2205_v17  ;;  %v2404_v13 = vpop.f32.mrb[15].mxu0  ;;  %v2570_v12 = vpop.f32.mrb[11].mxu1 }
 0x4da   :  { %v2606_v60 = vmax.f32 %v2598_v49, 0.0  ;;  %v2634_v61 = vmax.f32 %v2626_v55, 0.0  ;;  %v2997_v5 = vadd.f32 %v2404_v13, %v2215_v45  ;;  %v3001_v19 = vadd.f32 %v2570_v12, %v2205_v17 }
 0x4db   :  { %2613 = vst [vmem:[#allocation10 + $0x20] sm:$0xff] %v2605_v23  ;;  %2642 = vst [vmem:[#allocation10 + $0x40] sm:$0xff] %v2633_v20  ;;  %v2599_v46 = vadd.f32 %v2996_v37, %v2591_v22  ;;  %v2627_v44 = vadd.f32 %v3000_v48, %v2619_v35 }
 0x4dc   :  { %2614 = vst [vmem:[#allocation10 + $0x28] sm:$0xff] %v2606_v60  ;;  %2643 = vst [vmem:[#allocation10 + $0x48] sm:$0xff] %v2634_v61  ;;  %v2600_v33 = vadd.f32 %v2997_v5, %v2592_v34  ;;  %v2628_v3 = vadd.f32 %v3001_v19, %v2620_v62  ;;  %v2574_v10 = vpop.f32.mrb[12].mxu1 }
 0x4dd   :  { %v2607_v18 = vmax.f32 %v2599_v46, 0.0  ;;  %v2635_v24 = vmax.f32 %v2627_v44, 0.0  ;;  %v3002_v15 = vadd.f32 %v2574_v10, %v2210_v21  ;;  %v2576_v4 = vpop.f32.mrb[13].mxu1 }
 0x4de   :  { %v2608_v26 = vmax.f32 %v2600_v33, 0.0  ;;  %v2636_v51 = vmax.f32 %v2628_v3, 0.0  ;;  %v3003_v32 = vadd.f32 %v2576_v4, %v2210_v21 }
 0x4df   :  { %2615 = vst [vmem:[#allocation10 + $0x30] sm:$0xff] %v2607_v18  ;;  %2644 = vst [vmem:[#allocation10 + $0x50] sm:$0xff] %v2635_v24  ;;  %v2629_v57 = vadd.f32 %v3002_v15, %v2621_v36 }
 0x4e0   :  { %2616 = vst [vmem:[#allocation10 + $0x38] sm:$0xff] %v2608_v26  ;;  %2645 = vst [vmem:[#allocation10 + $0x58] sm:$0xff] %v2636_v51  ;;  %v2630_v0 = vadd.f32 %v3003_v32, %v2622_v28  ;;  %v2580_v17 = vpop.f32.mrb[14].mxu1 }
 0x4e1   :  { %v2637_v27 = vmax.f32 %v2629_v57, 0.0  ;;  %v3004_v42 = vadd.f32 %v2580_v17, %v2215_v45  ;;  %v2582_v14 = vpop.f32.mrb[15].mxu1 }
 0x4e2   :  { %v2638_v52 = vmax.f32 %v2630_v0, 0.0  ;;  %v3005_v25 = vadd.f32 %v2582_v14, %v2215_v45 }
 0x4e3   :  { %2646 = vst [vmem:[#allocation10 + $0x60] sm:$0xff] %v2637_v27  ;;  %v2631_v8 = vadd.f32 %v3004_v42, %v2623_v41 }
 0x4e4   :  { %2647 = vst [vmem:[#allocation10 + $0x68] sm:$0xff] %v2638_v52  ;;  %v2632_v47 = vadd.f32 %v3005_v25, %v2624_v7 }
 0x4e5   :  { %v2639_v21 = vmax.f32 %v2631_v8, 0.0 }
 0x4e6   :  { %v2640_v29 = vmax.f32 %v2632_v47, 0.0 }
 0x4e7   :  { %2648 = vst [vmem:[#allocation10 + $0x70] sm:$0xff] %v2639_v21 }
 0x4e8   :  { %2649 = vst [vmem:[#allocation10 + $0x78] sm:$0xff] %v2640_v29 }
 0x4e9   :  { %3138 = shalt.err (!%p3135_p0)
}
 0x4ea   :  { %s3139_s27 = scalar_lea.hbm %s5119_s6, 2048 }
 0x4eb   :  { %p3140_p1 = scmp.ne.s32.totalorder %s5119_s6, %s3139_s27  ;;  %p3143_p2 = scmp.lt.u32.totalorder %s3139_s27, %s5119_s6 }
 0x4ed   :  { %p3145_p3 = pnand %p3143_p2, %p3140_p1 }
 0x4ef   :  { %3148 = shalt.err (!%p3145_p3)
}
 0x4f0   :  { %2661 = dma.vmem_to_hbm [thread:$0]  %s2656_s23, 2048, %s5119_s6, [#allocation6], %s3159_s1, %s3159_s1, %s3160_s21  }
 0x4f1   :  { %3153 = dma.done.wait [#allocation6], 2048  }
 0x4f2   :  { %3154 = vsyncadd [#allocation6], 4294965248 }
 0x4f3   :  { %2665 = vsyncpa [#allocation5], 1 }
 0x4f4   :  { %2666 = vsyncpa [#allocation8], 1 }
 0x4f5   :  { %2667 = vsyncpa [#allocation6], 1 }

</bundles_post_ra>
